<compile_context>
chip_gen: v6e
topology: v6e:2x2x1
jax: 0.10.0
libtpu: 0.0.40
codegen_flags: <defaults>
</compile_context>

<pallas_src>
import functools

import jax
import jax.numpy as jnp
from jax.experimental import pallas as pl
from jax.experimental.pallas import tpu as pltpu


# --------------------------------------------------------------------------
# Pass 1: conv (tap-accumulated matmuls) + per-image partial BN statistics
# --------------------------------------------------------------------------
def _conv_stats_kernel(x_ref, w_ref, mask_ref, y_ref, stats_ref, *,
                       taps, wp, acc_rows):
    """One grid step = one image.

    x_ref:     (1, X_ROWS, C_in)    padded NHWC image; row index = h*Wp + w (+ tail pad)
    w_ref:     (KH*KW, C_in, C_out) per-tap weight matrices
    mask_ref:  (1, ACC_ROWS, 1)     1.0 for valid output columns, 0.0 for junk
    y_ref:     (1, ACC_ROWS, C_out) conv output on the padded-row grid (junk cols kept)
    stats_ref: (1, 2, C_out)        per-image [sum; sum_of_squares] over valid pixels
    """
    c_out = w_ref.shape[-1]
    acc = jnp.zeros((acc_rows, c_out), jnp.float32)
    for t, (kh, kw) in enumerate(taps):
        off = kh * wp + kw                               # static python int per tap
        lhs = x_ref[0, pl.ds(off, acc_rows), :]          # (ACC_ROWS, C_in)
        acc = acc + jnp.dot(lhs, w_ref[t],               # MXU, f32 accumulation
                            preferred_element_type=jnp.float32)

    y_ref[0] = acc.astype(y_ref.dtype)

    # Per-channel partial sums over valid pixels only (each Wp-row band contains
    # OW valid output columns followed by Wp-OW junk columns).
    m = acc * mask_ref[0]                                # (ACC_ROWS, C_out)
    stats_ref[0, 0:1, :] = jnp.sum(m, axis=0, keepdims=True)
    stats_ref[0, 1:2, :] = jnp.sum(m * m, axis=0, keepdims=True)


# --------------------------------------------------------------------------
# Pass 2: folded BatchNorm (one FMA) + ReLU on a lane-dense view
# --------------------------------------------------------------------------
def _scale_shift_relu_kernel(y_ref, scale_ref, shift_ref, o_ref):
    o_ref[...] = jnp.maximum(
        y_ref[...] * scale_ref[...] + shift_ref[...], 0.0).astype(o_ref.dtype)


def _vmem_limit_bytes(per_step_bytes):
    # Generous multiple of the real per-step working set, clamped to stay within
    # v7x's 64 MiB physical VMEM (v5e/v6e have 128 MiB, so this is always safe).
    return int(min(64 * 2**20, max(32 * 2**20, 4 * per_step_bytes)))


def conv_block_forward(x, weight, bias, gamma, beta, *, padding=0,
                       eps=1e-5, mxu_dtype=jnp.float32):
    """Forward pass of ConvolutionBlock: Conv2d(stride 1) -> BatchNorm2d
    (training-mode batch statistics, eps) -> ReLU.

    x: (N, C_in, H, W); weight: (C_out, C_in, KH, KW); bias/gamma/beta: (C_out,)
    Returns (N, C_out, OH, OW) in NCHW, matching the PyTorch module.

    `bias` is accepted for interface parity but unused: under train-mode
    BatchNorm the conv bias cancels exactly in (y - mean).
    `mxu_dtype=jnp.bfloat16` casts only the matmul inputs (accumulation and all
    BN statistics stay f32) for higher MXU throughput on v6e/v7x.
    """
    del bias  # mathematically dead under train-mode BN
    N, C_in, H, W = x.shape
    C_out, _, KH, KW = weight.shape
    OH = H + 2 * padding - KH + 1
    OW = W + 2 * padding - KW + 1
    Hp, Wp = H + 2 * padding, W + 2 * padding

    # ---- layout prep (O(input) bytes; no im2col blowup) ----
    x_nhwc = jnp.pad(x, ((0, 0), (0, 0), (padding, padding), (padding, padding)))
    x_nhwc = x_nhwc.transpose(0, 2, 3, 1)                # (N, Hp, Wp, C_in)
    x2d = x_nhwc.reshape(N, Hp * Wp, C_in)

    acc_rows = OH * Wp                                   # conv output on padded-row grid
    max_off = (KH - 1) * Wp + (KW - 1)
    tail = max(0, max_off + acc_rows - Hp * Wp)          # keep every tap slice in-bounds
    if tail:
        x2d = jnp.pad(x2d, ((0, 0), (0, tail), (0, 0)))
    x_rows = Hp * Wp + tail

    w_taps = weight.transpose(2, 3, 1, 0).reshape(KH * KW, C_in, C_out)
    if mxu_dtype != jnp.float32:
        x2d = x2d.astype(mxu_dtype)
        w_taps = w_taps.astype(mxu_dtype)

    # validity mask of the padded-row output grid (column < OW inside each Wp band)
    valid = (jnp.arange(acc_rows) % Wp) < OW
    valid_mask = valid.astype(jnp.float32).reshape(1, acc_rows, 1)

    taps = tuple((kh, kw) for kh in range(KH) for kw in range(KW))

    # ---- pass 1: conv + per-image partial BN statistics (grid over images) ----
    per_step1 = 4 * (x_rows * max(C_in, 128)
                     + 2 * acc_rows * max(C_out, 128)    # y block + f32 accumulator
                     + KH * KW * C_in * max(C_out, 128)
                     + acc_rows + 2 * max(C_out, 128))
    flops1 = 2 * N * acc_rows * KH * KW * C_in * C_out
    bytes1 = (x2d.size * x2d.dtype.itemsize + w_taps.size * w_taps.dtype.itemsize
              + N * acc_rows * C_out * 4 + N * 2 * C_out * 4)

    kernel1 = functools.partial(_conv_stats_kernel, taps=taps, wp=Wp,
                                acc_rows=acc_rows)
    y_pad, stats = pl.pallas_call(
        kernel1,
        out_shape=(jax.ShapeDtypeStruct((N, acc_rows, C_out), jnp.float32),
                   jax.ShapeDtypeStruct((N, 2, C_out), jnp.float32)),
        grid=(N,),
        in_specs=[
            pl.BlockSpec((1, x_rows, C_in), lambda n: (n, 0, 0)),
            pl.BlockSpec((KH * KW, C_in, C_out), lambda n: (0, 0, 0)),
            pl.BlockSpec((1, acc_rows, 1), lambda n: (0, 0, 0)),
        ],
        out_specs=(
            pl.BlockSpec((1, acc_rows, C_out), lambda n: (n, 0, 0)),
            pl.BlockSpec((1, 2, C_out), lambda n: (n, 0, 0)),
        ),
        compiler_params=pltpu.CompilerParams(
            dimension_semantics=("parallel",),
            vmem_limit_bytes=_vmem_limit_bytes(per_step1)),
        cost_estimate=pl.CostEstimate(flops=flops1, transcendentals=0,
                                      bytes_accessed=bytes1),
    )(x2d, w_taps, valid_mask)

    # ---- exact batch statistics + BN fold (tiny per-channel math, f32) ----
    # TODO(synk): BatchNorm running_mean/running_var (momentum) buffer updates are
    # training-state side effects and do not affect the forward output; omitted.
    count = jnp.float32(N * OH * OW)
    ch_sum = stats[:, 0, :].sum(axis=0)
    ch_sqsum = stats[:, 1, :].sum(axis=0)
    mean = ch_sum / count
    var = jnp.maximum(ch_sqsum / count - mean * mean, 0.0)   # biased batch variance
    scale = gamma.astype(jnp.float32) * jax.lax.rsqrt(var + eps)
    shift = beta.astype(jnp.float32) - mean * scale

    # ---- pass 2: fused scale/shift + ReLU on a lane-dense view ----
    rows = N * OH
    lane = Wp * C_out
    y2 = y_pad.reshape(rows, lane)                       # free row-major reshape
    scale_row = jnp.tile(scale, Wp).reshape(1, lane)
    shift_row = jnp.tile(shift, Wp).reshape(1, lane)

    # largest multiple-of-8 row tile that divides `rows` and fits ~2 MiB
    tile_r = rows
    for t in range(8, rows + 1, 8):
        if rows % t == 0 and t * lane * 4 <= 2 * 2**20:
            tile_r = t

    per_step2 = 4 * (2 * tile_r * lane + 2 * lane)
    out2 = pl.pallas_call(
        _scale_shift_relu_kernel,
        out_shape=jax.ShapeDtypeStruct((rows, lane), jnp.float32),
        grid=(rows // tile_r,),
        in_specs=[
            pl.BlockSpec((tile_r, lane), lambda i: (i, 0)),
            pl.BlockSpec((1, lane), lambda i: (0, 0)),
            pl.BlockSpec((1, lane), lambda i: (0, 0)),
        ],
        out_specs=pl.BlockSpec((tile_r, lane), lambda i: (i, 0)),
        compiler_params=pltpu.CompilerParams(
            dimension_semantics=("parallel",),
            vmem_limit_bytes=_vmem_limit_bytes(per_step2)),
        cost_estimate=pl.CostEstimate(flops=2 * rows * lane, transcendentals=0,
                                      bytes_accessed=2 * rows * lane * 4 + 2 * lane * 4),
    )(y2, scale_row, shift_row)

    # strip the Wp-OW junk columns and return NCHW to match the PyTorch module
    out_nhwc = out2.reshape(N, OH, Wp, C_out)[:, :, :OW, :]
    # TODO(synk): skip this NHWC->NCHW transpose if the downstream consumer accepts NHWC.
    return out_nhwc.transpose(0, 3, 1, 2)


if __name__ == "__main__":
    # ConvolutionBlock(in_features=4, out_features=8, kernel_size=3, padding=1)
    N, C_in, H, W = 2, 4, 16, 16
    C_out, KH, KW, pad = 8, 3, 3, 1

    key = jax.random.PRNGKey(0)
    kx, kw_, kb, kg, kbe = jax.random.split(key, 5)

    x = jax.random.normal(kx, (N, C_in, H, W), dtype=jnp.float32)
    fan_in = C_in * KH * KW
    bound = 1.0 / (fan_in ** 0.5)
    weight = jax.random.uniform(kw_, (C_out, C_in, KH, KW), jnp.float32, -bound, bound)
    bias = jax.random.uniform(kb, (C_out,), jnp.float32, -bound, bound)
    gamma = jax.random.uniform(kg, (C_out,), jnp.float32, 0.5, 1.5)    # BN weight
    beta = jax.random.uniform(kbe, (C_out,), jnp.float32, -0.5, 0.5)   # BN bias

    fwd = jax.jit(functools.partial(conv_block_forward, padding=pad))
    y = fwd(x, weight, bias, gamma, beta)
    jax.block_until_ready(y)

    # pure-JAX reference: Conv2d + train-mode BatchNorm (biased variance) + ReLU
    ref_conv = jax.lax.conv_general_dilated(
        x, weight, window_strides=(1, 1), padding=[(pad, pad), (pad, pad)],
        dimension_numbers=("NCHW", "OIHW", "NCHW")) + bias[None, :, None, None]
    mu = ref_conv.mean(axis=(0, 2, 3), keepdims=True)
    var = ((ref_conv - mu) ** 2).mean(axis=(0, 2, 3), keepdims=True)
    ref = jnp.maximum((ref_conv - mu) * jax.lax.rsqrt(var + 1e-5)
                      * gamma[None, :, None, None] + beta[None, :, None, None], 0.0)

    assert y.shape == (N, C_out, H, W)
    err = float(jnp.max(jnp.abs(y - ref)))
    assert err < 5e-4, f"max abs error vs reference: {err}"
    print("KERNEL_OK")
</pallas_src>

<mosaic_0001>
module attributes {stable_mosaic.version = 11 : i64} {
  func.func @_conv_stats_kernel(%arg0: i32, %arg1: memref<1x326x4xf32, #tpu.memory_space<vmem>>, %arg2: memref<9x4x8xf32, #tpu.memory_space<vmem>>, %arg3: memref<1x288x1xf32, #tpu.memory_space<vmem>>, %arg4: memref<1x288x8xf32, #tpu.memory_space<vmem>>, %arg5: memref<1x2x8xf32, #tpu.memory_space<vmem>>) attributes {dimension_semantics = [#tpu.dimension_semantics<parallel>], iteration_bounds = array<i64: 2>, scalar_prefetch = 0 : i64, scratch_operands = 0 : i64, tpu.core_type = #tpu.core_type<tc>, window_params = [{transform_indices = @transform_0, window_bounds = array<i64: 1, 326, 4>}, {pipeline_mode = #tpu.pipeline_mode<synchronous>, transform_indices = @transform_1, window_bounds = array<i64: 9, 4, 8>}, {pipeline_mode = #tpu.pipeline_mode<synchronous>, transform_indices = @transform_2, window_bounds = array<i64: 1, 288, 1>}, {transform_indices = @transform_3, window_bounds = array<i64: 1, 288, 8>}, {transform_indices = @transform_4, window_bounds = array<i64: 1, 2, 8>}]} {
    %cst = arith.constant 0.000000e+00 : f32
    %0 = vector.broadcast %cst : f32 to vector<288x8xf32>
    %c0 = arith.constant 0 : index
    %c0_0 = arith.constant 0 : index
    %c0_1 = arith.constant 0 : index
    %1 = vector.load %arg1[%c0, %c0_0, %c0_1] : memref<1x326x4xf32, #tpu.memory_space<vmem>>, vector<1x288x4xf32>
    %2 = vector.shape_cast %1 : vector<1x288x4xf32> to vector<288x4xf32>
    %c0_2 = arith.constant 0 : index
    %c0_3 = arith.constant 0 : index
    %c0_4 = arith.constant 0 : index
    %3 = vector.load %arg2[%c0_2, %c0_3, %c0_4] : memref<9x4x8xf32, #tpu.memory_space<vmem>>, vector<1x4x8xf32>
    %4 = vector.shape_cast %3 : vector<1x4x8xf32> to vector<4x8xf32>
    %cst_5 = arith.constant dense<0.000000e+00> : vector<288x8xf32>
    %5 = tpu.matmul %2, %4, %cst_5 {dimension_numbers = #tpu.dot_dimension_numbers<[1], [0], [0], [1], [0, 0, 1, 1], [], []>} : vector<288x4xf32>, vector<4x8xf32>, vector<288x8xf32> -> vector<288x8xf32>
    %6 = arith.addf %0, %5 : vector<288x8xf32>
    %c0_6 = arith.constant 0 : index
    %c1 = arith.constant 1 : index
    %c0_7 = arith.constant 0 : index
    %7 = vector.load %arg1[%c0_6, %c1, %c0_7] : memref<1x326x4xf32, #tpu.memory_space<vmem>>, vector<1x288x4xf32>
    %8 = vector.shape_cast %7 : vector<1x288x4xf32> to vector<288x4xf32>
    %c1_8 = arith.constant 1 : index
    %c0_9 = arith.constant 0 : index
    %c0_10 = arith.constant 0 : index
    %9 = vector.load %arg2[%c1_8, %c0_9, %c0_10] : memref<9x4x8xf32, #tpu.memory_space<vmem>>, vector<1x4x8xf32>
    %10 = vector.shape_cast %9 : vector<1x4x8xf32> to vector<4x8xf32>
    %cst_11 = arith.constant dense<0.000000e+00> : vector<288x8xf32>
    %11 = tpu.matmul %8, %10, %cst_11 {dimension_numbers = #tpu.dot_dimension_numbers<[1], [0], [0], [1], [0, 0, 1, 1], [], []>} : vector<288x4xf32>, vector<4x8xf32>, vector<288x8xf32> -> vector<288x8xf32>
    %12 = arith.addf %6, %11 : vector<288x8xf32>
    %c0_12 = arith.constant 0 : index
    %c2 = arith.constant 2 : index
    %c0_13 = arith.constant 0 : index
    %13 = vector.load %arg1[%c0_12, %c2, %c0_13] : memref<1x326x4xf32, #tpu.memory_space<vmem>>, vector<1x288x4xf32>
    %14 = vector.shape_cast %13 : vector<1x288x4xf32> to vector<288x4xf32>
    %c2_14 = arith.constant 2 : index
    %c0_15 = arith.constant 0 : index
    %c0_16 = arith.constant 0 : index
    %15 = vector.load %arg2[%c2_14, %c0_15, %c0_16] : memref<9x4x8xf32, #tpu.memory_space<vmem>>, vector<1x4x8xf32>
    %16 = vector.shape_cast %15 : vector<1x4x8xf32> to vector<4x8xf32>
    %cst_17 = arith.constant dense<0.000000e+00> : vector<288x8xf32>
    %17 = tpu.matmul %14, %16, %cst_17 {dimension_numbers = #tpu.dot_dimension_numbers<[1], [0], [0], [1], [0, 0, 1, 1], [], []>} : vector<288x4xf32>, vector<4x8xf32>, vector<288x8xf32> -> vector<288x8xf32>
    %18 = arith.addf %12, %17 : vector<288x8xf32>
    %c0_18 = arith.constant 0 : index
    %c18 = arith.constant 18 : index
    %c0_19 = arith.constant 0 : index
    %19 = vector.load %arg1[%c0_18, %c18, %c0_19] : memref<1x326x4xf32, #tpu.memory_space<vmem>>, vector<1x288x4xf32>
    %20 = vector.shape_cast %19 : vector<1x288x4xf32> to vector<288x4xf32>
    %c3 = arith.constant 3 : index
    %c0_20 = arith.constant 0 : index
    %c0_21 = arith.constant 0 : index
    %21 = vector.load %arg2[%c3, %c0_20, %c0_21] : memref<9x4x8xf32, #tpu.memory_space<vmem>>, vector<1x4x8xf32>
    %22 = vector.shape_cast %21 : vector<1x4x8xf32> to vector<4x8xf32>
    %cst_22 = arith.constant dense<0.000000e+00> : vector<288x8xf32>
    %23 = tpu.matmul %20, %22, %cst_22 {dimension_numbers = #tpu.dot_dimension_numbers<[1], [0], [0], [1], [0, 0, 1, 1], [], []>} : vector<288x4xf32>, vector<4x8xf32>, vector<288x8xf32> -> vector<288x8xf32>
    %24 = arith.addf %18, %23 : vector<288x8xf32>
    %c0_23 = arith.constant 0 : index
    %c19 = arith.constant 19 : index
    %c0_24 = arith.constant 0 : index
    %25 = vector.load %arg1[%c0_23, %c19, %c0_24] : memref<1x326x4xf32, #tpu.memory_space<vmem>>, vector<1x288x4xf32>
    %26 = vector.shape_cast %25 : vector<1x288x4xf32> to vector<288x4xf32>
    %c4 = arith.constant 4 : index
    %c0_25 = arith.constant 0 : index
    %c0_26 = arith.constant 0 : index
    %27 = vector.load %arg2[%c4, %c0_25, %c0_26] : memref<9x4x8xf32, #tpu.memory_space<vmem>>, vector<1x4x8xf32>
    %28 = vector.shape_cast %27 : vector<1x4x8xf32> to vector<4x8xf32>
    %cst_27 = arith.constant dense<0.000000e+00> : vector<288x8xf32>
    %29 = tpu.matmul %26, %28, %cst_27 {dimension_numbers = #tpu.dot_dimension_numbers<[1], [0], [0], [1], [0, 0, 1, 1], [], []>} : vector<288x4xf32>, vector<4x8xf32>, vector<288x8xf32> -> vector<288x8xf32>
    %30 = arith.addf %24, %29 : vector<288x8xf32>
    %c0_28 = arith.constant 0 : index
    %c20 = arith.constant 20 : index
    %c0_29 = arith.constant 0 : index
    %31 = vector.load %arg1[%c0_28, %c20, %c0_29] : memref<1x326x4xf32, #tpu.memory_space<vmem>>, vector<1x288x4xf32>
    %32 = vector.shape_cast %31 : vector<1x288x4xf32> to vector<288x4xf32>
    %c5 = arith.constant 5 : index
    %c0_30 = arith.constant 0 : index
    %c0_31 = arith.constant 0 : index
    %33 = vector.load %arg2[%c5, %c0_30, %c0_31] : memref<9x4x8xf32, #tpu.memory_space<vmem>>, vector<1x4x8xf32>
    %34 = vector.shape_cast %33 : vector<1x4x8xf32> to vector<4x8xf32>
    %cst_32 = arith.constant dense<0.000000e+00> : vector<288x8xf32>
    %35 = tpu.matmul %32, %34, %cst_32 {dimension_numbers = #tpu.dot_dimension_numbers<[1], [0], [0], [1], [0, 0, 1, 1], [], []>} : vector<288x4xf32>, vector<4x8xf32>, vector<288x8xf32> -> vector<288x8xf32>
    %36 = arith.addf %30, %35 : vector<288x8xf32>
    %c0_33 = arith.constant 0 : index
    %c36 = arith.constant 36 : index
    %c0_34 = arith.constant 0 : index
    %37 = vector.load %arg1[%c0_33, %c36, %c0_34] : memref<1x326x4xf32, #tpu.memory_space<vmem>>, vector<1x288x4xf32>
    %38 = vector.shape_cast %37 : vector<1x288x4xf32> to vector<288x4xf32>
    %c6 = arith.constant 6 : index
    %c0_35 = arith.constant 0 : index
    %c0_36 = arith.constant 0 : index
    %39 = vector.load %arg2[%c6, %c0_35, %c0_36] : memref<9x4x8xf32, #tpu.memory_space<vmem>>, vector<1x4x8xf32>
    %40 = vector.shape_cast %39 : vector<1x4x8xf32> to vector<4x8xf32>
    %cst_37 = arith.constant dense<0.000000e+00> : vector<288x8xf32>
    %41 = tpu.matmul %38, %40, %cst_37 {dimension_numbers = #tpu.dot_dimension_numbers<[1], [0], [0], [1], [0, 0, 1, 1], [], []>} : vector<288x4xf32>, vector<4x8xf32>, vector<288x8xf32> -> vector<288x8xf32>
    %42 = arith.addf %36, %41 : vector<288x8xf32>
    %c0_38 = arith.constant 0 : index
    %c37 = arith.constant 37 : index
    %c0_39 = arith.constant 0 : index
    %43 = vector.load %arg1[%c0_38, %c37, %c0_39] : memref<1x326x4xf32, #tpu.memory_space<vmem>>, vector<1x288x4xf32>
    %44 = vector.shape_cast %43 : vector<1x288x4xf32> to vector<288x4xf32>
    %c7 = arith.constant 7 : index
    %c0_40 = arith.constant 0 : index
    %c0_41 = arith.constant 0 : index
    %45 = vector.load %arg2[%c7, %c0_40, %c0_41] : memref<9x4x8xf32, #tpu.memory_space<vmem>>, vector<1x4x8xf32>
    %46 = vector.shape_cast %45 : vector<1x4x8xf32> to vector<4x8xf32>
    %cst_42 = arith.constant dense<0.000000e+00> : vector<288x8xf32>
    %47 = tpu.matmul %44, %46, %cst_42 {dimension_numbers = #tpu.dot_dimension_numbers<[1], [0], [0], [1], [0, 0, 1, 1], [], []>} : vector<288x4xf32>, vector<4x8xf32>, vector<288x8xf32> -> vector<288x8xf32>
    %48 = arith.addf %42, %47 : vector<288x8xf32>
    %c0_43 = arith.constant 0 : index
    %c38 = arith.constant 38 : index
    %c0_44 = arith.constant 0 : index
    %49 = vector.load %arg1[%c0_43, %c38, %c0_44] : memref<1x326x4xf32, #tpu.memory_space<vmem>>, vector<1x288x4xf32>
    %50 = vector.shape_cast %49 : vector<1x288x4xf32> to vector<288x4xf32>
    %c8 = arith.constant 8 : index
    %c0_45 = arith.constant 0 : index
    %c0_46 = arith.constant 0 : index
    %51 = vector.load %arg2[%c8, %c0_45, %c0_46] : memref<9x4x8xf32, #tpu.memory_space<vmem>>, vector<1x4x8xf32>
    %52 = vector.shape_cast %51 : vector<1x4x8xf32> to vector<4x8xf32>
    %cst_47 = arith.constant dense<0.000000e+00> : vector<288x8xf32>
    %53 = tpu.matmul %50, %52, %cst_47 {dimension_numbers = #tpu.dot_dimension_numbers<[1], [0], [0], [1], [0, 0, 1, 1], [], []>} : vector<288x4xf32>, vector<4x8xf32>, vector<288x8xf32> -> vector<288x8xf32>
    %54 = arith.addf %48, %53 : vector<288x8xf32>
    %c0_48 = arith.constant 0 : index
    %c0_49 = arith.constant 0 : index
    %c0_50 = arith.constant 0 : index
    %55 = vector.load %arg4[%c0_48, %c0_49, %c0_50] : memref<1x288x8xf32, #tpu.memory_space<vmem>>, vector<1x288x8xf32>
    %56 = vector.shape_cast %55 : vector<1x288x8xf32> to vector<288x8xf32>
    %57 = vector.shape_cast %54 : vector<288x8xf32> to vector<1x288x8xf32>
    tpu.vector_store %arg4[%c0_48, %c0_49, %c0_50], %57 {strides = array<i32>} : memref<1x288x8xf32, #tpu.memory_space<vmem>>, vector<1x288x8xf32>,
    %c0_51 = arith.constant 0 : index
    %c0_52 = arith.constant 0 : index
    %c0_53 = arith.constant 0 : index
    %58 = vector.load %arg3[%c0_51, %c0_52, %c0_53] : memref<1x288x1xf32, #tpu.memory_space<vmem>>, vector<1x288x1xf32>
    %59 = vector.shape_cast %58 : vector<1x288x1xf32> to vector<288x1xf32>
    %60 = vector.broadcast %59 : vector<288x1xf32> to vector<288x8xf32>
    %61 = arith.mulf %54, %60 : vector<288x8xf32>
    %cst_54 = arith.constant dense<0.000000e+00> : vector<8xf32>
    %62 = vector.multi_reduction <add>, %61, %cst_54 [0] : vector<288x8xf32> to vector<8xf32>
    %63 = vector.shape_cast %62 : vector<8xf32> to vector<1x8xf32>
    %c0_55 = arith.constant 0 : index
    %c0_56 = arith.constant 0 : index
    %c0_57 = arith.constant 0 : index
    %64 = vector.load %arg5[%c0_55, %c0_56, %c0_57] : memref<1x2x8xf32, #tpu.memory_space<vmem>>, vector<1x1x8xf32>
    %65 = vector.shape_cast %64 : vector<1x1x8xf32> to vector<1x8xf32>
    %66 = vector.shape_cast %63 : vector<1x8xf32> to vector<1x1x8xf32>
    tpu.vector_store %arg5[%c0_55, %c0_56, %c0_57], %66 {strides = array<i32>} : memref<1x2x8xf32, #tpu.memory_space<vmem>>, vector<1x1x8xf32>,
    %67 = arith.mulf %61, %61 : vector<288x8xf32>
    %cst_58 = arith.constant dense<0.000000e+00> : vector<8xf32>
    %68 = vector.multi_reduction <add>, %67, %cst_58 [0] : vector<288x8xf32> to vector<8xf32>
    %69 = vector.shape_cast %68 : vector<8xf32> to vector<1x8xf32>
    %c0_59 = arith.constant 0 : index
    %c1_60 = arith.constant 1 : index
    %c0_61 = arith.constant 0 : index
    %70 = vector.load %arg5[%c0_59, %c1_60, %c0_61] : memref<1x2x8xf32, #tpu.memory_space<vmem>>, vector<1x1x8xf32>
    %71 = vector.shape_cast %70 : vector<1x1x8xf32> to vector<1x8xf32>
    %72 = vector.shape_cast %69 : vector<1x8xf32> to vector<1x1x8xf32>
    tpu.vector_store %arg5[%c0_59, %c1_60, %c0_61], %72 {strides = array<i32>} : memref<1x2x8xf32, #tpu.memory_space<vmem>>, vector<1x1x8xf32>,
    return
  }
  func.func @transform_0(%arg0: i32) -> (i32, i32, i32) {
    %c0_i32 = arith.constant 0 : i32
    %c0_i32_0 = arith.constant 0 : i32
    %c0_i32_1 = arith.constant 0 : i32
    return %arg0, %c0_i32, %c0_i32_0 : i32, i32, i32
  }
  func.func @transform_1(%arg0: i32) -> (i32, i32, i32) {
    %c0_i32 = arith.constant 0 : i32
    %c0_i32_0 = arith.constant 0 : i32
    %c0_i32_1 = arith.constant 0 : i32
    %c0_i32_2 = arith.constant 0 : i32
    return %c0_i32, %c0_i32_0, %c0_i32_1 : i32, i32, i32
  }
  func.func @transform_2(%arg0: i32) -> (i32, i32, i32) {
    %c0_i32 = arith.constant 0 : i32
    %c0_i32_0 = arith.constant 0 : i32
    %c0_i32_1 = arith.constant 0 : i32
    %c0_i32_2 = arith.constant 0 : i32
    return %c0_i32, %c0_i32_0, %c0_i32_1 : i32, i32, i32
  }
  func.func @transform_3(%arg0: i32) -> (i32, i32, i32) {
    %c0_i32 = arith.constant 0 : i32
    %c0_i32_0 = arith.constant 0 : i32
    %c0_i32_1 = arith.constant 0 : i32
    return %arg0, %c0_i32, %c0_i32_0 : i32, i32, i32
  }
  func.func @transform_4(%arg0: i32) -> (i32, i32, i32) {
    %c0_i32 = arith.constant 0 : i32
    %c0_i32_0 = arith.constant 0 : i32
    %c0_i32_1 = arith.constant 0 : i32
    return %arg0, %c0_i32, %c0_i32_0 : i32, i32, i32
  }
}

module attributes {stable_mosaic.version = 11 : i64} {
  func.func @_scale_shift_relu_kernel(%arg0: i32, %arg1: memref<32x144xf32, #tpu.memory_space<vmem>>, %arg2: memref<1x144xf32, #tpu.memory_space<vmem>>, %arg3: memref<1x144xf32, #tpu.memory_space<vmem>>, %arg4: memref<32x144xf32, #tpu.memory_space<vmem>>) attributes {dimension_semantics = [#tpu.dimension_semantics<parallel>], iteration_bounds = array<i64: 1>, scalar_prefetch = 0 : i64, scratch_operands = 0 : i64, tpu.core_type = #tpu.core_type<tc>, window_params = [{transform_indices = @transform_0, window_bounds = array<i64: 32, 144>}, {pipeline_mode = #tpu.pipeline_mode<synchronous>, transform_indices = @transform_1, window_bounds = array<i64: 1, 144>}, {pipeline_mode = #tpu.pipeline_mode<synchronous>, transform_indices = @transform_2, window_bounds = array<i64: 1, 144>}, {transform_indices = @transform_3, window_bounds = array<i64: 32, 144>}]} {
    %c0 = arith.constant 0 : index
    %c0_0 = arith.constant 0 : index
    %0 = vector.load %arg1[%c0, %c0_0] : memref<32x144xf32, #tpu.memory_space<vmem>>, vector<32x144xf32>
    %c0_1 = arith.constant 0 : index
    %c0_2 = arith.constant 0 : index
    %1 = vector.load %arg2[%c0_1, %c0_2] : memref<1x144xf32, #tpu.memory_space<vmem>>, vector<1x144xf32>
    %2 = vector.broadcast %1 : vector<1x144xf32> to vector<32x144xf32>
    %3 = arith.mulf %0, %2 : vector<32x144xf32>
    %c0_3 = arith.constant 0 : index
    %c0_4 = arith.constant 0 : index
    %4 = vector.load %arg3[%c0_3, %c0_4] : memref<1x144xf32, #tpu.memory_space<vmem>>, vector<1x144xf32>
    %5 = vector.broadcast %4 : vector<1x144xf32> to vector<32x144xf32>
    %6 = arith.addf %3, %5 : vector<32x144xf32>
    %cst = arith.constant 0.000000e+00 : f32
    %7 = vector.broadcast %cst : f32 to vector<32x144xf32>
    %8 = arith.maximumf %6, %7 : vector<32x144xf32>
    %c0_5 = arith.constant 0 : index
    %c0_6 = arith.constant 0 : index
    %9 = vector.load %arg4[%c0_5, %c0_6] : memref<32x144xf32, #tpu.memory_space<vmem>>, vector<32x144xf32>
    tpu.vector_store %arg4[%c0_5, %c0_6], %8 {strides = array<i32>} : memref<32x144xf32, #tpu.memory_space<vmem>>, vector<32x144xf32>,
    return
  }
  func.func @transform_0(%arg0: i32) -> (i32, i32) {
    %c0_i32 = arith.constant 0 : i32
    %c0_i32_0 = arith.constant 0 : i32
    return %arg0, %c0_i32 : i32, i32
  }
  func.func @transform_1(%arg0: i32) -> (i32, i32) {
    %c0_i32 = arith.constant 0 : i32
    %c0_i32_0 = arith.constant 0 : i32
    %c0_i32_1 = arith.constant 0 : i32
    return %c0_i32, %c0_i32_0 : i32, i32
  }
  func.func @transform_2(%arg0: i32) -> (i32, i32) {
    %c0_i32 = arith.constant 0 : i32
    %c0_i32_0 = arith.constant 0 : i32
    %c0_i32_1 = arith.constant 0 : i32
    return %c0_i32, %c0_i32_0 : i32, i32
  }
  func.func @transform_3(%arg0: i32) -> (i32, i32) {
    %c0_i32 = arith.constant 0 : i32
    %c0_i32_0 = arith.constant 0 : i32
    return %arg0, %c0_i32 : i32, i32
  }
}

</mosaic_0001>

<bundles_post_ra>
// kernel: tile.13
= control target key start
LH: loop header
LB: loop body
LE: loop exit
PB: predicated region body
PF: predicated region fallthrough
CT: control target
= control target key end

     0   :  { %s34_s0 = inlined_call_operand.vmem [shape: f32[8], index: 0, kind: input, shape index: {}]   ;;  %s35_s1 = inlined_call_operand.vmem [shape: f32[18,8], index: 1, kind: output, shape index: {}]  }
   0x1   :  { %v4_v0 = vld [vmem:[%s34_s0] ss:$0 sm:$0xff] }
   0x2   :  { %5 = vst [vmem:[%s35_s1] sm:$0xff] %v4_v0  ;;  %10 = vst [vmem:[%s35_s1 + $0x8] sm:$0xff] %v4_v0 }
   0x3   :  { %11 = vst [vmem:[%s35_s1 + $0x10] sm:$0xff] %v4_v0 }

// kernel: tile.14
= control target key start
LH: loop header
LB: loop body
LE: loop exit
PB: predicated region body
PF: predicated region fallthrough
CT: control target
= control target key end

     0   :  { %s142_s10 = smov 120   ;;  %s143_s11 = smov 104   ;;  %vm4_vm0 = vcmask 64512   ;;  %vm10_vm1 = vcmask 1048512   ;;  %vm16_vm2 = vcmask 982912   ;;  %vm22_vm3 = vcmask 917312   ;;  %s221_s0 = inlined_call_operand.vmem [shape: f32[18,8], index: 0, kind: input, shape index: {}]   ;;  %s222_s1 = inlined_call_operand.vmem [shape: f32[1,144], index: 1, kind: output, shape index: {}]  }
   0x1   :  { %v111_v0 = vld [vmem:[%s221_s0 + $0xf] sm:$0x1]   ;;  %v113_v1 = vld [vmem:[%s221_s0 + $0xd] sm:$0x1]   ;;  %v112_v2 = vld [vmem:[%s221_s0 + $0xe] sm:$0x1]  }
   0x2   :  { %8 = vrot.lane.b32.xlu0 %v111_v0, %s142_s10  ;;  %20 = vrot.lane.b32.xlu1 %v113_v1, %s143_s11  ;;  %v114_v3 = vld [vmem:[%s221_s0 + $0xc] sm:$0x1]   ;;  %s144_s16 = smov 112   ;;  %s145_s17 = smov 96   ;;  %v115_v4 = vld [vmem:[%s221_s0 + $0xb] sm:$0x1]  }
   0x3   :  { %v116_v5 = vld [vmem:[%s221_s0 + $0xa] sm:$0x1]   ;;  %s2_s22 = smov 3  ;;  %s146_s23 = smov 88   ;;  %v117_v7 = vld [vmem:[%s221_s0 + $0x9] sm:$0x1]  }
   0x4   :  { %s147_s24 = smov 80   ;;  %v3_v6 = vld [vmem:[%s221_s0] ss:$16 sm:%s2_s22]   ;;  %v118_v8 = vld [vmem:[%s221_s0 + $0x8] sm:$0x1]   ;;  %s148_s2 = smov 72  }
   0x5   :  { %5 = vst.msk [vmem:[#allocation0] ss:$8 sm:$0x3] %vm4_vm0, %v3_v6   ;;  %s149_s3 = smov 64   ;;  %v119_v9 = vld [vmem:[%s221_s0 + $0x7] sm:$0x1]  }
   0x6   :  { %14 = vrot.lane.b32.xlu0 %v112_v2, %s144_s16  ;;  %26 = vrot.lane.b32.xlu1 %v114_v3, %s145_s17  ;;  %v120_v10 = vld [vmem:[%s221_s0 + $0x6] sm:$0x1]   ;;  %s150_s8 = smov 56   ;;  %s151_s9 = smov 48   ;;  %v121_v11 = vld [vmem:[%s221_s0 + $0x5] sm:$0x1]  }
   0x7   :  { %v122_v12 = vld [vmem:[%s221_s0 + $0x4] sm:$0x1]   ;;  %s152_s14 = smov 40   ;;  %s153_s15 = smov 32   ;;  %v123_v13 = vld [vmem:[%s221_s0 + $0x3] sm:$0x1]  }
   0x8   :  { %v124_v14 = vld [vmem:[%s221_s0 + $0x2] sm:$0x1]   ;;  %s91_s20 = smov 3  ;;  %s154_s21 = smov 24   ;;  %vm28_vm4 = vcmask 851712   ;;  %vm34_vm5 = vcmask 786112  }
   0x9   :  { %s155_s22 = smov 16   ;;  %v125_v15 = vld [vmem:[%s221_s0 + $0x1] ss:$16 sm:%s91_s20]   ;;  %s156_s0 = smov 8   ;;  %vm40_vm6 = vcmask 720512   ;;  %vm46_vm7 = vcmask 654912  }
   0xa   :  { %32 = vrot.lane.b32.xlu0 %v115_v4, %s146_s23  ;;  %38 = vrot.lane.b32.xlu1 %v116_v5, %s147_s24  ;;  %vm52_vm8 = vcmask 589312   ;;  %vm58_vm9 = vcmask 523712   ;;  %vm64_vm10 = vcmask 458112   ;;  %vm70_vm11 = vcmask 392512  }
   0xb   :  { %vm76_vm12 = vcmask 326912   ;;  %vm82_vm13 = vcmask 261312   ;;  %vm88_vm14 = vcmask 195712   ;;  %vm95_vm15 = vcmask 130112  }
   0xe   :  { %44 = vrot.lane.b32.xlu0 %v117_v7, %s148_s2  ;;  %50 = vrot.lane.b32.xlu1 %v118_v8, %s149_s3 }
  0x12   :  { %56 = vrot.lane.b32.xlu0 %v119_v9, %s150_s8  ;;  %62 = vrot.lane.b32.xlu1 %v120_v10, %s151_s9 }
  0x16   :  { %68 = vrot.lane.b32.xlu0 %v121_v11, %s152_s14  ;;  %74 = vrot.lane.b32.xlu1 %v122_v12, %s153_s15 }
  0x1a   :  { %80 = vrot.lane.b32.xlu0 %v123_v13, %s154_s21  ;;  %86 = vrot.lane.b32.xlu1 %v124_v14, %s155_s22 }
  0x1e   :  { %93 = vrot.lane.b32.xlu0 %v125_v15, %s156_s0 }
  0x74   :  { %v9_v16 = vpop.permute.xlu0 %8   ;;  %v21_v17 = vpop.permute.xlu1 %20  }
  0x75   :  { %11 = vst.msk [vmem:[#allocation0] sm:$0x1] %vm10_vm1, %v9_v16  }
  0x78   :  { %v15_v18 = vpop.permute.xlu0 %14   ;;  %v27_v19 = vpop.permute.xlu1 %26  }
  0x79   :  { %17 = vst.msk [vmem:[#allocation0] sm:$0x1] %vm16_vm2, %v15_v18  }
  0x7a   :  { %23 = vst.msk [vmem:[#allocation0] sm:$0x1] %vm22_vm3, %v21_v17  }
  0x7b   :  { %29 = vst.msk [vmem:[#allocation0] sm:$0x1] %vm28_vm4, %v27_v19  }
  0x7c   :  { %v33_v20 = vpop.permute.xlu0 %32   ;;  %v39_v21 = vpop.permute.xlu1 %38  }
  0x7d   :  { %35 = vst.msk [vmem:[#allocation0] sm:$0x1] %vm34_vm5, %v33_v20  }
  0x7e   :  { %41 = vst.msk [vmem:[#allocation0] sm:$0x1] %vm40_vm6, %v39_v21  }
  0x80   :  { %v45_v22 = vpop.permute.xlu0 %44   ;;  %v51_v23 = vpop.permute.xlu1 %50  }
  0x81   :  { %47 = vst.msk [vmem:[#allocation0] sm:$0x1] %vm46_vm7, %v45_v22  }
  0x82   :  { %53 = vst.msk [vmem:[#allocation0] sm:$0x1] %vm52_vm8, %v51_v23  }
  0x84   :  { %v57_v24 = vpop.permute.xlu0 %56   ;;  %v63_v25 = vpop.permute.xlu1 %62  }
  0x85   :  { %59 = vst.msk [vmem:[#allocation0] sm:$0x1] %vm58_vm9, %v57_v24  }
  0x86   :  { %65 = vst.msk [vmem:[#allocation0] sm:$0x1] %vm64_vm10, %v63_v25  }
  0x88   :  { %v69_v26 = vpop.permute.xlu0 %68   ;;  %v75_v27 = vpop.permute.xlu1 %74  }
  0x89   :  { %71 = vst.msk [vmem:[#allocation0] sm:$0x1] %vm70_vm11, %v69_v26  }
  0x8a   :  { %77 = vst.msk [vmem:[#allocation0] sm:$0x1] %vm76_vm12, %v75_v27  }
  0x8c   :  { %v81_v28 = vpop.permute.xlu0 %80   ;;  %v87_v29 = vpop.permute.xlu1 %86  }
  0x8d   :  { %83 = vst.msk [vmem:[#allocation0] sm:$0x1] %vm82_vm13, %v81_v28  }
  0x8e   :  { %89 = vst.msk [vmem:[#allocation0] sm:$0x1] %vm88_vm14, %v87_v29  }
  0x90   :  { %v94_v30 = vpop.permute.xlu0 %93  }
  0x91   :  { %96 = vst.msk [vmem:[#allocation0] ss:$8 sm:$0x3] %vm95_vm15, %v94_v30  }
  0x98   :  { %v101_v31 = vld [vmem:[#allocation0] sm:$0x1]  ;;  %v106_v32 = vld [vmem:[#allocation0 + $0x8] sm:$0x1] }
  0x99   :  { %104 = vst [vmem:[%s222_s1] sm:$0x1] %v101_v31  ;;  %126 = vst [vmem:[%s222_s1 + $0x1] sm:$0x1] %v106_v32 }

// kernel: conv_block_forward.3
= control target key start
LH: loop header
LB: loop body
LE: loop exit
PB: predicated region body
PF: predicated region fallthrough
CT: control target
= control target key end

     0   :  { %v24_v0 = vlaneseq  ;;  %vm71_vm0 = vcmask 130048   ;;  %s161_s1 = inlined_call_operand.vmem [shape: f32[1,144], index: 1, kind: input, shape index: {}]   ;;  %s162_s2 = inlined_call_operand.vmem [shape: f32[1,144], index: 2, kind: input, shape index: {}]   ;;  %s163_s0 = inlined_call_operand.vmem [shape: f32[32,144], index: 0, kind: input, shape index: {}]   ;;  %s164_s3 = inlined_call_operand.vmem [shape: f32[32,144], index: 3, kind: output, shape index: {}]  }
   0x1   :  { %v22_v2 = vld [vmem:[%s161_s1] sm:$0x3]  ;;  %v15_v7 = vld [vmem:[%s163_s0 + $0x8] sm:$0xff]  ;;  %v16_v8 = vld [vmem:[%s163_s0 + $0x10] sm:$0xff] }
   0x2   :  { %v25_v1 = vshrl.u32 %v24_v0, 7  ;;  %v42_v3 = vld [vmem:[%s162_s2] sm:$0x3]  ;;  %v17_v9 = vld [vmem:[%s163_s0 + $0x18] sm:$0xff]  ;;  %v19_v15 = vld [vmem:[%s163_s0 + $0x28] sm:$0xff] }
   0x3   :  { %v14_v4 = vld [vmem:[%s163_s0] sm:$0xff]  ;;  %v20_v16 = vld [vmem:[%s163_s0 + $0x30] sm:$0xff]  ;;  %v21_v17 = vld [vmem:[%s163_s0 + $0x38] sm:$0xff] }
   0x4   :  { %v26_v5 = vsub.s32 0, %v25_v1  ;;  %v30_v6 = vsub.s32 1, %v25_v1  ;;  %v18_v10 = vld [vmem:[%s163_s0 + $0x20] sm:$0xff] }
   0x6   :  { %v27_v11 = vrot.slane %v22_v2, %v26_v5  ;;  %v31_v12 = vrot.slane %v22_v2, %v30_v6  ;;  %v47_v13 = vrot.slane %v42_v3, %v26_v5  ;;  %v51_v14 = vrot.slane %v42_v3, %v30_v6 }
   0x8   :  { %v34_v18 = vmul.f32 %v27_v11, %v14_v4  ;;  %v35_v19 = vmul.f32 %v31_v12, %v15_v7  ;;  %v36_v20 = vmul.f32 %v27_v11, %v16_v8  ;;  %v37_v21 = vmul.f32 %v31_v12, %v17_v9 }
   0x9   :  { %v38_v22 = vmul.f32 %v27_v11, %v18_v10  ;;  %v39_v23 = vmul.f32 %v31_v12, %v19_v15  ;;  %v40_v24 = vmul.f32 %v27_v11, %v20_v16  ;;  %v41_v25 = vmul.f32 %v31_v12, %v21_v17 }
   0xa   :  { %v54_v26 = vadd.f32 %v47_v13, %v34_v18  ;;  %v55_v27 = vadd.f32 %v51_v14, %v35_v19  ;;  %v56_v28 = vadd.f32 %v47_v13, %v36_v20  ;;  %v57_v29 = vadd.f32 %v51_v14, %v37_v21 }
   0xb   :  { %v58_v30 = vadd.f32 %v47_v13, %v38_v22  ;;  %v59_v31 = vadd.f32 %v51_v14, %v39_v23  ;;  %v60_v32 = vadd.f32 %v47_v13, %v40_v24  ;;  %v61_v33 = vadd.f32 %v51_v14, %v41_v25 }
   0xc   :  { %v62_v34 = vmax.f32 %v54_v26, 0.0  ;;  %v63_v35 = vmax.f32 %v55_v27, 0.0  ;;  %v64_v36 = vmax.f32 %v56_v28, 0.0  ;;  %v65_v37 = vmax.f32 %v57_v29, 0.0 }
   0xd   :  { %v66_v38 = vmax.f32 %v58_v30, 0.0  ;;  %v67_v39 = vmax.f32 %v59_v31, 0.0  ;;  %v68_v40 = vmax.f32 %v60_v32, 0.0  ;;  %v69_v41 = vmax.f32 %v61_v33, 0.0 }
   0xe   :  { %70 = vst [vmem:[%s164_s3] sm:$0xff] %v62_v34  ;;  %72 = vst.msk [vmem:[%s164_s3 + $0x8] sm:$0xff] %vm71_vm0, %v63_v35 }
   0xf   :  { %73 = vst [vmem:[%s164_s3 + $0x10] sm:$0xff] %v64_v36  ;;  %74 = vst.msk [vmem:[%s164_s3 + $0x18] sm:$0xff] %vm71_vm0, %v65_v37 }
  0x10   :  { %75 = vst [vmem:[%s164_s3 + $0x20] sm:$0xff] %v66_v38  ;;  %76 = vst.msk [vmem:[%s164_s3 + $0x28] sm:$0xff] %vm71_vm0, %v67_v39 }
  0x11   :  { %77 = vst [vmem:[%s164_s3 + $0x30] sm:$0xff] %v68_v40  ;;  %78 = vst.msk [vmem:[%s164_s3 + $0x38] sm:$0xff] %vm71_vm0, %v69_v41 }

// kernel: conv_block_forward.2
= control target key start
LH: loop header
LB: loop body
LE: loop exit
PB: predicated region body
PF: predicated region fallthrough
CT: control target
= control target key end

     0   :  { %s5813_s15 = smov 0   ;;  %s7388_s0 = inlined_call_operand.vmem [shape: f32[2,326,4], index: 0, kind: input, shape index: {}]   ;;  %s7389_s1 = inlined_call_operand.vmem [shape: f32[9,4,8], index: 1, kind: input, shape index: {}]   ;;  %s7390_s2 = inlined_call_operand.vmem [shape: f32[1,288,1], index: 2, kind: input, shape index: {}]   ;;  %s7391_s3 = inlined_call_operand.vmem [shape: f32[2,288,8], index: 3, kind: output, shape index: {0}]   ;;  %s7392_s4 = inlined_call_operand.vmem [shape: f32[2,2,8], index: 4, kind: output, shape index: {1}]  }
   0x1 LB: > { %s4576_s16 = sadd.s32 4294967295, %s5785_s15   ;;  %p4580_p0 = scmp.ge.s32.totalorder %s5785_s15, 1  ;;  %s5785_s15 = sphi %s5813_s15, %s15_s15  }
   0x2   : > { %p165_p1 = scmp.lt.s32.totalorder %s5785_s15, 3 }
   0x4   : > { %p166_p2 = pnand %p4580_p0, %p165_p1 }
   0x5   : > { %p195_p3 = scmp.lt.s32.totalorder (!%p166_p2), %s4576_s16, 1 }
   0x6   : > { %169 = sbr.rel (%p166_p2) target bundleno = 558 (0x22e), region = 32 }
   0xb   : > { %v4584_v0 = vld [vmem:[%s7389_s1 + $0x4] sm:$0xf]  ;;  %vm393_vm0 = vcmask 1043456   ;;  %v245_v1 = vld [vmem:[%s7389_s1] sm:$0xf]  ;;  %s7394_s16 = smov (!%p195_p3, %s4576_s16), 1 }
   0xc   : > { %5764 = vmatprep.subr.msk.mxu1 %vm393_vm0, %v4584_v0  ;;  %5260 = vmatprep.subr.msk.mxu0 %vm393_vm0, %v4584_v0  ;;  %v4659_v2 = vld [vmem:[%s7389_s1 + $0x8] sm:$0xf]  ;;  %s5766_s23 = smul.u32 328, %s7394_s16  ;;  %vm284_vm1 = vcmask 31744   ;;  %v5857_v9 = vld [vmem:[%s7389_s1 + $0xc] sm:$0xf] }
   0xd   : > { %5765 = vmatpush3.msk.msra.mxu1 %vm393_vm0, %v4584_v0  ;;  %5261 = vmatpush3.msk.msra.mxu0 %vm393_vm0, %v4584_v0  ;;  %v5862_v10 = vld [vmem:[%s7389_s1 + $0x10] sm:$0xf]  ;;  %v5947_v47 = vld [vmem:[%s7389_s1 + $0x14] sm:$0xf]  ;;  %v5952_v48 = vld [vmem:[%s7389_s1 + $0x18] sm:$0xf] }
   0xe   : > { %5316 = vmatprep.subr.msk.mxu1 %vm393_vm0, %v245_v1  ;;  %5372 = vmatprep.subr.msk.mxu0 %vm393_vm0, %v4659_v2  ;;  %s5842_s26 = scalar_lea.vmem %s7388_s0, %s5766_s23  ;;  %vm4008_vm2 = vcmask 64512   ;;  %s4583_s21 = sshll.u32 %s7394_s16, 1  ;;  %vm4374_vm3 = vcmask 57344  }
   0xf   : > { %v246_v3 = vld [vmem:[%s5842_s26 + $0x1] sm:$0xff]  ;;  %v264_v4 = vld [vmem:[%s5842_s26 + $0x91] sm:$0xff]  ;;  %v247_v5 = vld [vmem:[%s5842_s26 + $0x9] sm:$0xff]  ;;  %s208_s24 = scalar_lea.vmem %s7392_s4, %s4583_s21 }
  0x10   : > { %5262 = vmatprep.mubr.msk.f32.mxu0 %vm284_vm1, %v246_v3  ;;  %5289 = vmatprep.mubr.msk.f32.mxu1 %vm284_vm1, %v264_v4  ;;  %v265_v6 = vld [vmem:[%s5842_s26 + $0x99] sm:$0xff]  ;;  %v248_v7 = vld [vmem:[%s5842_s26 + $0x11] sm:$0xff]  ;;  %v266_v8 = vld [vmem:[%s5842_s26 + $0xa1] sm:$0xff] }
  0x11   : > { %5263 = vmatmul.mubr.msk.f32.vlgmr.msra.gmra.mxu0 %vm284_vm1, %v247_v5  ;;  %5290 = vmatmul.mubr.msk.f32.vlgmr.msra.gmra.mxu1 %vm284_vm1, %v265_v6  ;;  %v249_v11 = vld [vmem:[%s5842_s26 + $0x19] sm:$0xff]  ;;  %v267_v12 = vld [vmem:[%s5842_s26 + $0xa9] sm:$0xff]  ;;  %v250_v13 = vld [vmem:[%s5842_s26 + $0x21] sm:$0xff] }
  0x12   : > { %5317 = vmatpush3.msk.msra.mxu1 %vm393_vm0, %v245_v1  ;;  %5373 = vmatpush3.msk.msra.mxu0 %vm393_vm0, %v4659_v2  ;;  %v268_v14 = vld [vmem:[%s5842_s26 + $0xb1] sm:$0xff]  ;;  %v251_v15 = vld [vmem:[%s5842_s26 + $0x29] sm:$0xff]  ;;  %v269_v16 = vld [vmem:[%s5842_s26 + $0xb9] sm:$0xff] }
  0x13   : > { %5265 = vmatprep.mubr.msk.f32.mxu0 %vm284_vm1, %v248_v7  ;;  %5292 = vmatprep.mubr.msk.f32.mxu1 %vm284_vm1, %v266_v8  ;;  %v252_v17 = vld [vmem:[%s5842_s26 + $0x31] sm:$0xff]  ;;  %v270_v18 = vld [vmem:[%s5842_s26 + $0xc1] sm:$0xff]  ;;  %v253_v19 = vld [vmem:[%s5842_s26 + $0x39] sm:$0xff] }
  0x14   : > { %5428 = vmatprep.subr.msk.mxu1 %vm393_vm0, %v5857_v9  ;;  %5484 = vmatprep.subr.msk.mxu0 %vm393_vm0, %v5862_v10  ;;  %v271_v20 = vld [vmem:[%s5842_s26 + $0xc9] sm:$0xff]  ;;  %v254_v21 = vld [vmem:[%s5842_s26 + $0x41] sm:$0xff]  ;;  %v272_v22 = vld [vmem:[%s5842_s26 + $0xd1] sm:$0xff] }
  0x15   : > { %5266 = vmatmul.mubr.msk.f32.gmra.mxu0 %vm284_vm1, %v249_v11  ;;  %5293 = vmatmul.mubr.msk.f32.gmra.mxu1 %vm284_vm1, %v267_v12  ;;  %v255_v23 = vld [vmem:[%s5842_s26 + $0x49] sm:$0xff]  ;;  %v273_v24 = vld [vmem:[%s5842_s26 + $0xd9] sm:$0xff]  ;;  %v256_v25 = vld [vmem:[%s5842_s26 + $0x51] sm:$0xff] }
  0x16   : > { %5268 = vmatprep.mubr.msk.f32.mxu0 %vm284_vm1, %v250_v13  ;;  %5295 = vmatprep.mubr.msk.f32.mxu1 %vm284_vm1, %v268_v14  ;;  %v274_v26 = vld [vmem:[%s5842_s26 + $0xe1] sm:$0xff]  ;;  %v257_v27 = vld [vmem:[%s5842_s26 + $0x59] sm:$0xff]  ;;  %v275_v28 = vld [vmem:[%s5842_s26 + $0xe9] sm:$0xff] }
  0x17   : > { %v258_v29 = vld [vmem:[%s5842_s26 + $0x61] sm:$0xff]  ;;  %v276_v30 = vld [vmem:[%s5842_s26 + $0xf1] sm:$0xff]  ;;  %v259_v31 = vld [vmem:[%s5842_s26 + $0x69] sm:$0xff] }
  0x18   : > { %v277_v32 = vld [vmem:[%s5842_s26 + $0xf9] sm:$0xff]  ;;  %v260_v33 = vld [vmem:[%s5842_s26 + $0x71] sm:$0xff]  ;;  %v278_v34 = vld [vmem:[%s5842_s26 + $0x101] sm:$0xff] }
  0x19   : > { %5269 = vmatmul.mubr.msk.f32.gmra.mxu0 %vm284_vm1, %v251_v15  ;;  %5296 = vmatmul.mubr.msk.f32.gmra.mxu1 %vm284_vm1, %v269_v16  ;;  %v261_v35 = vld [vmem:[%s5842_s26 + $0x79] sm:$0xff]  ;;  %v279_v36 = vld [vmem:[%s5842_s26 + $0x109] sm:$0xff]  ;;  %v262_v37 = vld [vmem:[%s5842_s26 + $0x81] sm:$0xff] }
  0x1a   : > { %5271 = vmatprep.mubr.msk.f32.mxu0 %vm284_vm1, %v252_v17  ;;  %5298 = vmatprep.mubr.msk.f32.mxu1 %vm284_vm1, %v270_v18  ;;  %v280_v38 = vld [vmem:[%s5842_s26 + $0x111] sm:$0xff]  ;;  %v263_v39 = vld [vmem:[%s5842_s26 + $0x89] sm:$0xff]  ;;  %v281_v40 = vld [vmem:[%s5842_s26 + $0x119] sm:$0xff] }
  0x1b   : > { %v209_v41 = vld [vmem:[%s5842_s26] sm:$0xff]  ;;  %v210_v43 = vld [vmem:[%s5842_s26 + $0x8] sm:$0xff]  ;;  %v211_v45 = vld [vmem:[%s5842_s26 + $0x10] sm:$0xff] }
  0x1c   : > { %v998_v42 = vld [vmem:[%s5842_s26 + $0x2] sm:$0xff]  ;;  %v999_v44 = vld [vmem:[%s5842_s26 + $0xa] sm:$0xff]  ;;  %v5940_v46 = vld [vmem:[%s5842_s26 + $0x12] sm:$0xff] }
  0x1d   : > { %5272 = vmatmul.mubr.msk.f32.gmra.mxu0 %vm284_vm1, %v253_v19  ;;  %5299 = vmatmul.mubr.msk.f32.gmra.mxu1 %vm284_vm1, %v271_v20  ;;  %v212_v49 = vld [vmem:[%s5842_s26 + $0x18] sm:$0xff]  ;;  %v213_v51 = vld [vmem:[%s5842_s26 + $0x20] sm:$0xff]  ;;  %v214_v53 = vld [vmem:[%s5842_s26 + $0x28] sm:$0xff] }
  0x1e   : > { %5274 = vmatprep.mubr.msk.f32.mxu0 %vm284_vm1, %v254_v21  ;;  %5301 = vmatprep.mubr.msk.f32.mxu1 %vm284_vm1, %v272_v22  ;;  %v5960_v50 = vld [vmem:[%s5842_s26 + $0x1a] sm:$0xff]  ;;  %v5967_v52 = vld [vmem:[%s5842_s26 + $0x22] sm:$0xff]  ;;  %v5981_v54 = vld [vmem:[%s5842_s26 + $0x2a] sm:$0xff] }
  0x1f   : > { %v215_v55 = vld [vmem:[%s5842_s26 + $0x30] sm:$0xff]  ;;  %v216_v57 = vld [vmem:[%s5842_s26 + $0x38] sm:$0xff]  ;;  %v217_v59 = vld [vmem:[%s5842_s26 + $0x40] sm:$0xff] }
  0x20   : > { %v5985_v56 = vld [vmem:[%s5842_s26 + $0x32] sm:$0xff]  ;;  %v5995_v58 = vld [vmem:[%s5842_s26 + $0x3a] sm:$0xff]  ;;  %v5999_v60 = vld [vmem:[%s5842_s26 + $0x42] sm:$0xff] }
  0x21   : > { %5275 = vmatmul.mubr.msk.f32.gmra.mxu0 %vm284_vm1, %v255_v23  ;;  %5302 = vmatmul.mubr.msk.f32.gmra.mxu1 %vm284_vm1, %v273_v24  ;;  %v218_v61 = vld [vmem:[%s5842_s26 + $0x48] sm:$0xff]  ;;  %v219_v63 = vld [vmem:[%s5842_s26 + $0x50] sm:$0xff]  ;;  %v220_v1 = vld [vmem:[%s5842_s26 + $0x58] sm:$0xff] }
  0x22   : > { %5277 = vmatprep.mubr.msk.f32.mxu0 %vm284_vm1, %v256_v25  ;;  %5304 = vmatprep.mubr.msk.f32.mxu1 %vm284_vm1, %v274_v26  ;;  %v6009_v62 = vld [vmem:[%s5842_s26 + $0x4a] sm:$0xff]  ;;  %v6013_v0 = vld [vmem:[%s5842_s26 + $0x52] sm:$0xff]  ;;  %v6023_v2 = vld [vmem:[%s5842_s26 + $0x5a] sm:$0xff] }
  0x23   : > { %v221_v3 = vld [vmem:[%s5842_s26 + $0x60] sm:$0xff]  ;;  %v222_v5 = vld [vmem:[%s5842_s26 + $0x68] sm:$0xff]  ;;  %v223_v7 = vld [vmem:[%s5842_s26 + $0x70] sm:$0xff] }
  0x24   : > { %v6027_v4 = vld [vmem:[%s5842_s26 + $0x62] sm:$0xff]  ;;  %v6037_v6 = vld [vmem:[%s5842_s26 + $0x6a] sm:$0xff]  ;;  %v6041_v8 = vld [vmem:[%s5842_s26 + $0x72] sm:$0xff] }
  0x25   : > { %5278 = vmatmul.mubr.msk.f32.gmra.mxu0 %vm284_vm1, %v257_v27  ;;  %5305 = vmatmul.mubr.msk.f32.gmra.mxu1 %vm284_vm1, %v275_v28  ;;  %v225_v11 = vld [vmem:[%s5842_s26 + $0x80] sm:$0xff]  ;;  %v226_v13 = vld [vmem:[%s5842_s26 + $0x88] sm:$0xff]  ;;  %v227_v15 = vld [vmem:[%s5842_s26 + $0x90] sm:$0xff] }
  0x26   : > { %5280 = vmatprep.mubr.msk.f32.mxu0 %vm284_vm1, %v258_v29  ;;  %5307 = vmatprep.mubr.msk.f32.mxu1 %vm284_vm1, %v276_v30  ;;  %v6055_v12 = vld [vmem:[%s5842_s26 + $0x82] sm:$0xff]  ;;  %v6065_v14 = vld [vmem:[%s5842_s26 + $0x8a] sm:$0xff]  ;;  %v6069_v16 = vld [vmem:[%s5842_s26 + $0x92] sm:$0xff] }
  0x27   : > { %v228_v17 = vld [vmem:[%s5842_s26 + $0x98] sm:$0xff]  ;;  %v229_v19 = vld [vmem:[%s5842_s26 + $0xa0] sm:$0xff]  ;;  %v230_v21 = vld [vmem:[%s5842_s26 + $0xa8] sm:$0xff] }
  0x28   : > { %v6079_v18 = vld [vmem:[%s5842_s26 + $0x9a] sm:$0xff]  ;;  %v6083_v20 = vld [vmem:[%s5842_s26 + $0xa2] sm:$0xff]  ;;  %v6093_v22 = vld [vmem:[%s5842_s26 + $0xaa] sm:$0xff] }
  0x29   : > { %5281 = vmatmul.mubr.msk.f32.gmra.mxu0 %vm284_vm1, %v259_v31  ;;  %5308 = vmatmul.mubr.msk.f32.gmra.mxu1 %vm284_vm1, %v277_v32  ;;  %v231_v23 = vld [vmem:[%s5842_s26 + $0xb0] sm:$0xff]  ;;  %v232_v25 = vld [vmem:[%s5842_s26 + $0xb8] sm:$0xff]  ;;  %v233_v27 = vld [vmem:[%s5842_s26 + $0xc0] sm:$0xff] }
  0x2a   : > { %5283 = vmatprep.mubr.msk.f32.mxu0 %vm284_vm1, %v260_v33  ;;  %5310 = vmatprep.mubr.msk.f32.mxu1 %vm284_vm1, %v278_v34  ;;  %v6097_v24 = vld [vmem:[%s5842_s26 + $0xb2] sm:$0xff]  ;;  %v6107_v26 = vld [vmem:[%s5842_s26 + $0xba] sm:$0xff]  ;;  %v6111_v28 = vld [vmem:[%s5842_s26 + $0xc2] sm:$0xff] }
  0x2b   : > { %v234_v29 = vld [vmem:[%s5842_s26 + $0xc8] sm:$0xff]  ;;  %v235_v31 = vld [vmem:[%s5842_s26 + $0xd0] sm:$0xff]  ;;  %v236_v33 = vld [vmem:[%s5842_s26 + $0xd8] sm:$0xff] }
  0x2c   : > { %v6121_v30 = vld [vmem:[%s5842_s26 + $0xca] sm:$0xff]  ;;  %v6125_v32 = vld [vmem:[%s5842_s26 + $0xd2] sm:$0xff]  ;;  %v6135_v34 = vld [vmem:[%s5842_s26 + $0xda] sm:$0xff] }
  0x2d   : > { %5284 = vmatmul.mubr.msk.f32.gmra.mxu0 %vm284_vm1, %v261_v35  ;;  %5311 = vmatmul.mubr.msk.f32.gmra.mxu1 %vm284_vm1, %v279_v36  ;;  %v237_v35 = vld [vmem:[%s5842_s26 + $0xe0] sm:$0xff] }
  0x2e   : > { %5286 = vmatprep.mubr.msk.f32.mxu0 %vm284_vm1, %v262_v37  ;;  %5313 = vmatprep.mubr.msk.f32.mxu1 %vm284_vm1, %v280_v38  ;;  %v6139_v36 = vld [vmem:[%s5842_s26 + $0xe2] sm:$0xff]  ;;  %v6149_v38 = vld [vmem:[%s5842_s26 + $0xea] sm:$0xff] }
  0x2f   : > { %v238_v37 = vld [vmem:[%s5842_s26 + $0xe8] sm:$0xff] }
  0x31   : > { %5287 = vmatmul.mubr.msk.f32.gmra.mxu0 %vm284_vm1, %v263_v39  ;;  %5314 = vmatmul.mubr.msk.f32.gmra.mxu1 %vm284_vm1, %v281_v40  ;;  %v239_v39 = vld [vmem:[%s5842_s26 + $0xf0] sm:$0xff] }
  0x32   : > { %5318 = vmatprep.mubr.msk.f32.mxu1 %vm284_vm1, %v209_v41  ;;  %5374 = vmatprep.mubr.msk.f32.mxu0 %vm284_vm1, %v998_v42  ;;  %v6153_v40 = vld [vmem:[%s5842_s26 + $0xf2] sm:$0xff]  ;;  %v6163_v42 = vld [vmem:[%s5842_s26 + $0xfa] sm:$0xff] }
  0x33   : > { %v240_v41 = vld [vmem:[%s5842_s26 + $0xf8] sm:$0xff] }
  0x35   : > { %5319 = vmatmul.mubr.msk.f32.vlgmr.msra.gmra.mxu1 %vm284_vm1, %v210_v43  ;;  %5375 = vmatmul.mubr.msk.f32.vlgmr.msra.gmra.mxu0 %vm284_vm1, %v999_v44  ;;  %v241_v43 = vld [vmem:[%s5842_s26 + $0x100] sm:$0xff] }
  0x36   : > { %5429 = vmatpush3.msk.msra.mxu1 %vm393_vm0, %v5857_v9  ;;  %5485 = vmatpush3.msk.msra.mxu0 %vm393_vm0, %v5862_v10  ;;  %v224_v9 = vld [vmem:[%s5842_s26 + $0x78] sm:$0xff]  ;;  %v6167_v44 = vld [vmem:[%s5842_s26 + $0x102] sm:$0xff] }
  0x37   : > { %5321 = vmatprep.mubr.msk.f32.mxu1 %vm284_vm1, %v211_v45  ;;  %5377 = vmatprep.mubr.msk.f32.mxu0 %vm284_vm1, %v5940_v46  ;;  %v6051_v10 = vld [vmem:[%s5842_s26 + $0x7a] sm:$0xff]  ;;  %v242_v45 = vld [vmem:[%s5842_s26 + $0x108] sm:$0xff] }
  0x38   : > { %5540 = vmatprep.subr.msk.mxu1 %vm393_vm0, %v5947_v47  ;;  %5596 = vmatprep.subr.msk.mxu0 %vm393_vm0, %v5952_v48 }
  0x39   : > { %5322 = vmatmul.mubr.msk.f32.gmra.mxu1 %vm284_vm1, %v212_v49  ;;  %5378 = vmatmul.mubr.msk.f32.gmra.mxu0 %vm284_vm1, %v5960_v50  ;;  %v6177_v49 = vld [vmem:[%s5842_s26 + $0x10a] sm:$0xff] }
  0x3a   : > { %5324 = vmatprep.mubr.msk.f32.mxu1 %vm284_vm1, %v213_v51  ;;  %5380 = vmatprep.mubr.msk.f32.mxu0 %vm284_vm1, %v5967_v52  ;;  %v243_v51 = vld [vmem:[%s5842_s26 + $0x110] sm:$0xff] }
  0x3d   : > { %5325 = vmatmul.mubr.msk.f32.gmra.mxu1 %vm284_vm1, %v214_v53  ;;  %5381 = vmatmul.mubr.msk.f32.gmra.mxu0 %vm284_vm1, %v5981_v54  ;;  %v6181_v53 = vld [vmem:[%s5842_s26 + $0x112] sm:$0xff] }
  0x3e   : > { %5327 = vmatprep.mubr.msk.f32.mxu1 %vm284_vm1, %v215_v55  ;;  %5383 = vmatprep.mubr.msk.f32.mxu0 %vm284_vm1, %v5985_v56  ;;  %v244_v55 = vld [vmem:[%s5842_s26 + $0x118] sm:$0xff] }
  0x41   : > { %5328 = vmatmul.mubr.msk.f32.gmra.mxu1 %vm284_vm1, %v216_v57  ;;  %5384 = vmatmul.mubr.msk.f32.gmra.mxu0 %vm284_vm1, %v5995_v58  ;;  %v6191_v57 = vld [vmem:[%s5842_s26 + $0x11a] sm:$0xff] }
  0x42   : > { %5330 = vmatprep.mubr.msk.f32.mxu1 %vm284_vm1, %v217_v59  ;;  %5386 = vmatprep.mubr.msk.f32.mxu0 %vm284_vm1, %v5999_v60  ;;  %v1858_v59 = vld [vmem:[%s5842_s26 + $0x13] sm:$0xff] }
  0x45   : > { %5331 = vmatmul.mubr.msk.f32.gmra.mxu1 %vm284_vm1, %v218_v61  ;;  %5387 = vmatmul.mubr.msk.f32.gmra.mxu0 %vm284_vm1, %v6009_v62  ;;  %v1859_v61 = vld [vmem:[%s5842_s26 + $0x1b] sm:$0xff] }
  0x46   : > { %5333 = vmatprep.mubr.msk.f32.mxu1 %vm284_vm1, %v219_v63  ;;  %5389 = vmatprep.mubr.msk.f32.mxu0 %vm284_vm1, %v6013_v0  ;;  %v1860_v63 = vld [vmem:[%s5842_s26 + $0x23] sm:$0xff] }
  0x49   : > { %5334 = vmatmul.mubr.msk.f32.gmra.mxu1 %vm284_vm1, %v220_v1  ;;  %5390 = vmatmul.mubr.msk.f32.gmra.mxu0 %vm284_vm1, %v6023_v2  ;;  %v6208_v1 = vld [vmem:[%s7389_s1 + $0x1c] sm:$0xf] }
  0x4a   : > { %5336 = vmatprep.mubr.msk.f32.mxu1 %vm284_vm1, %v221_v3  ;;  %5392 = vmatprep.mubr.msk.f32.mxu0 %vm284_vm1, %v6027_v4  ;;  %v1862_v3 = vld [vmem:[%s5842_s26 + $0x33] sm:$0xff] }
  0x4d   : > { %5337 = vmatmul.mubr.msk.f32.gmra.mxu1 %vm284_vm1, %v222_v5  ;;  %5393 = vmatmul.mubr.msk.f32.gmra.mxu0 %vm284_vm1, %v6037_v6  ;;  %v5787_v5 = vmov 0  }
  0x4e   : > { %5339 = vmatprep.mubr.msk.f32.mxu1 %vm284_vm1, %v223_v7  ;;  %5395 = vmatprep.mubr.msk.f32.mxu0 %vm284_vm1, %v6041_v8  ;;  %v4046_v7 = vld [vmem:[%s7390_s2 + $0x8] sm:$0xff] }
  0x4f   : > { %5777 = vset.pattern.permute.xlu0 %v5787_v5  ;;  %5778 = vset.pattern.permute.xlu1 %v5787_v5  ;;  %v2726_v5 = vld [vmem:[%s5842_s26 + $0x64] sm:$0xff] }
  0x51   : > { %5340 = vmatmul.mubr.msk.f32.gmra.mxu1 %vm284_vm1, %v224_v9  ;;  %5396 = vmatmul.mubr.msk.f32.gmra.mxu0 %vm284_vm1, %v6051_v10  ;;  %v1874_v9 = vld [vmem:[%s5842_s26 + $0x93] sm:$0xff] }
  0x52   : > { %5342 = vmatprep.mubr.msk.f32.mxu1 %vm284_vm1, %v225_v11  ;;  %5398 = vmatprep.mubr.msk.f32.mxu0 %vm284_vm1, %v6055_v12  ;;  %v4049_v11 = vld [vmem:[%s7390_s2 + $0x20] sm:$0xff] }
  0x55   : > { %5343 = vmatmul.mubr.msk.f32.gmra.mxu1 %vm284_vm1, %v226_v13  ;;  %5399 = vmatmul.mubr.msk.f32.gmra.mxu0 %vm284_vm1, %v6065_v14  ;;  %v1876_v13 = vld [vmem:[%s5842_s26 + $0xa3] sm:$0xff] }
  0x56   : > { %5345 = vmatprep.mubr.msk.f32.mxu1 %vm284_vm1, %v227_v15  ;;  %5401 = vmatprep.mubr.msk.f32.mxu0 %vm284_vm1, %v6069_v16  ;;  %v4051_v15 = vld [vmem:[%s7390_s2 + $0x30] sm:$0xff] }
  0x59   : > { %5346 = vmatmul.mubr.msk.f32.gmra.mxu1 %vm284_vm1, %v228_v17  ;;  %5402 = vmatmul.mubr.msk.f32.gmra.mxu0 %vm284_vm1, %v6079_v18  ;;  %v1878_v17 = vld [vmem:[%s5842_s26 + $0xb3] sm:$0xff] }
  0x5a   : > { %5348 = vmatprep.mubr.msk.f32.mxu1 %vm284_vm1, %v229_v19  ;;  %5404 = vmatprep.mubr.msk.f32.mxu0 %vm284_vm1, %v6083_v20  ;;  %v4053_v19 = vld [vmem:[%s7390_s2 + $0x40] sm:$0xff] }
  0x5d   : > { %5349 = vmatmul.mubr.msk.f32.gmra.mxu1 %vm284_vm1, %v230_v21  ;;  %5405 = vmatmul.mubr.msk.f32.gmra.mxu0 %vm284_vm1, %v6093_v22  ;;  %v1880_v21 = vld [vmem:[%s5842_s26 + $0xc3] sm:$0xff] }
  0x5e   : > { %5351 = vmatprep.mubr.msk.f32.mxu1 %vm284_vm1, %v231_v23  ;;  %5407 = vmatprep.mubr.msk.f32.mxu0 %vm284_vm1, %v6097_v24  ;;  %v4055_v23 = vld [vmem:[%s7390_s2 + $0x50] sm:$0xff] }
  0x61   : > { %5352 = vmatmul.mubr.msk.f32.gmra.mxu1 %vm284_vm1, %v232_v25  ;;  %5408 = vmatmul.mubr.msk.f32.gmra.mxu0 %vm284_vm1, %v6107_v26  ;;  %v1882_v25 = vld [vmem:[%s5842_s26 + $0xd3] sm:$0xff] }
  0x62   : > { %5354 = vmatprep.mubr.msk.f32.mxu1 %vm284_vm1, %v233_v27  ;;  %5410 = vmatprep.mubr.msk.f32.mxu0 %vm284_vm1, %v6111_v28  ;;  %v4057_v27 = vld [vmem:[%s7390_s2 + $0x60] sm:$0xff] }
  0x65   : > { %5355 = vmatmul.mubr.msk.f32.gmra.mxu1 %vm284_vm1, %v234_v29  ;;  %5411 = vmatmul.mubr.msk.f32.gmra.mxu0 %vm284_vm1, %v6121_v30  ;;  %v1884_v29 = vld [vmem:[%s5842_s26 + $0xe3] sm:$0xff] }
  0x66   : > { %5357 = vmatprep.mubr.msk.f32.mxu1 %vm284_vm1, %v235_v31  ;;  %5413 = vmatprep.mubr.msk.f32.mxu0 %vm284_vm1, %v6125_v32  ;;  %v4059_v31 = vld [vmem:[%s7390_s2 + $0x70] sm:$0xff] }
  0x69   : > { %5358 = vmatmul.mubr.msk.f32.gmra.mxu1 %vm284_vm1, %v236_v33  ;;  %5414 = vmatmul.mubr.msk.f32.gmra.mxu0 %vm284_vm1, %v6135_v34  ;;  %v1886_v33 = vld [vmem:[%s5842_s26 + $0xf3] sm:$0xff] }
  0x6a   : > { %5360 = vmatprep.mubr.msk.f32.mxu1 %vm284_vm1, %v237_v35  ;;  %5416 = vmatprep.mubr.msk.f32.mxu0 %vm284_vm1, %v6139_v36  ;;  %v4061_v35 = vld [vmem:[%s7390_s2 + $0x80] sm:$0xff] }
  0x6d   : > { %5361 = vmatmul.mubr.msk.f32.gmra.mxu1 %vm284_vm1, %v238_v37  ;;  %5417 = vmatmul.mubr.msk.f32.gmra.mxu0 %vm284_vm1, %v6149_v38  ;;  %v1888_v37 = vld [vmem:[%s5842_s26 + $0x103] sm:$0xff] }
  0x6e   : > { %5363 = vmatprep.mubr.msk.f32.mxu1 %vm284_vm1, %v239_v39  ;;  %5419 = vmatprep.mubr.msk.f32.mxu0 %vm284_vm1, %v6153_v40  ;;  %v4063_v39 = vld [vmem:[%s7390_s2 + $0x90] sm:$0xff] }
  0x71   : > { %5364 = vmatmul.mubr.msk.f32.gmra.mxu1 %vm284_vm1, %v240_v41  ;;  %5420 = vmatmul.mubr.msk.f32.gmra.mxu0 %vm284_vm1, %v6163_v42  ;;  %v1890_v41 = vld [vmem:[%s5842_s26 + $0x113] sm:$0xff] }
  0x72   : > { %5366 = vmatprep.mubr.msk.f32.mxu1 %vm284_vm1, %v241_v43  ;;  %5422 = vmatprep.mubr.msk.f32.mxu0 %vm284_vm1, %v6167_v44  ;;  %v4065_v43 = vld [vmem:[%s7390_s2 + $0xa0] sm:$0xff] }
  0x75   : > { %5367 = vmatmul.mubr.msk.f32.gmra.mxu1 %vm284_vm1, %v242_v45  ;;  %5423 = vmatmul.mubr.msk.f32.gmra.mxu0 %vm284_vm1, %v6177_v49  ;;  %v1462_v45 = vld [vmem:[%s5842_s26 + $0x122] sm:$0xff] }
  0x76   : > { %5369 = vmatprep.mubr.msk.f32.mxu1 %vm284_vm1, %v243_v51  ;;  %5425 = vmatprep.mubr.msk.f32.mxu0 %vm284_vm1, %v6181_v53  ;;  %v4066_v51 = vld [vmem:[%s7390_s2 + $0xa8] sm:$0xff] }
  0x79   : > { %5370 = vmatmul.mubr.msk.f32.gmra.mxu1 %vm284_vm1, %v244_v55  ;;  %5426 = vmatmul.mubr.msk.f32.gmra.mxu0 %vm284_vm1, %v6191_v57  ;;  %v1463_v55 = vld [vmem:[%s5842_s26 + $0x12a] sm:$0xff] }
  0x7a   : > { %5430 = vmatprep.mubr.msk.f32.mxu1 %vm284_vm1, %v5940_v46  ;;  %5486 = vmatprep.mubr.msk.f32.mxu0 %vm284_vm1, %v1858_v59  ;;  %v6213_v46 = vld [vmem:[%s7389_s1 + $0x20] sm:$0xf]  ;;  %v1893_v59 = vld [vmem:[%s5842_s26 + $0x12b] sm:$0xff] }
  0x7d   : > { %5431 = vmatmul.mubr.msk.f32.vlgmr.msra.gmra.mxu1 %vm284_vm1, %v5960_v50  ;;  %5487 = vmatmul.mubr.msk.f32.vlgmr.msra.gmra.mxu0 %vm284_vm1, %v1859_v61  ;;  %v1861_v50 = vld [vmem:[%s5842_s26 + $0x2b] sm:$0xff] }
  0x7e   : > { %5541 = vmatpush3.msk.msra.mxu1 %vm393_vm0, %v5947_v47  ;;  %5597 = vmatpush3.msk.msra.mxu0 %vm393_vm0, %v5952_v48  ;;  %v1863_v47 = vld [vmem:[%s5842_s26 + $0x3b] sm:$0xff]  ;;  %v1864_v48 = vld [vmem:[%s5842_s26 + $0x43] sm:$0xff] }
  0x7f   : > { %5433 = vmatprep.mubr.msk.f32.mxu1 %vm284_vm1, %v5967_v52  ;;  %5489 = vmatprep.mubr.msk.f32.mxu0 %vm284_vm1, %v1860_v63  ;;  %v1865_v52 = vld [vmem:[%s5842_s26 + $0x4b] sm:$0xff]  ;;  %v4068_v63 = vld [vmem:[%s7390_s2 + $0xb8] sm:$0xff] }
  0x80   : > { %5652 = vmatprep.subr.msk.mxu1 %vm393_vm0, %v6208_v1  ;;  %5708 = vmatprep.subr.msk.mxu0 %vm393_vm0, %v6213_v46  ;;  %v2718_v61 = vld [vmem:[%s5842_s26 + $0x24] sm:$0xff] }
  0x81   : > { %5434 = vmatmul.mubr.msk.f32.gmra.mxu1 %vm284_vm1, %v5981_v54  ;;  %5490 = vmatmul.mubr.msk.f32.gmra.mxu0 %vm284_vm1, %v1861_v50  ;;  %v1866_v54 = vld [vmem:[%s5842_s26 + $0x53] sm:$0xff]  ;;  %v4069_v50 = vld [vmem:[%s7390_s2 + $0xc0] sm:$0xff] }
  0x82   : > { %5436 = vmatprep.mubr.msk.f32.mxu1 %vm284_vm1, %v5985_v56  ;;  %5492 = vmatprep.mubr.msk.f32.mxu0 %vm284_vm1, %v1862_v3  ;;  %v1867_v56 = vld [vmem:[%s5842_s26 + $0x5b] sm:$0xff] }
  0x83   : > { %v2289_v3 = vld [vmem:[%s5842_s26 + $0x1c] sm:$0xff] }
  0x85   : > { %5437 = vmatmul.mubr.msk.f32.gmra.mxu1 %vm284_vm1, %v5995_v58  ;;  %5493 = vmatmul.mubr.msk.f32.gmra.mxu0 %vm284_vm1, %v1863_v47  ;;  %v1868_v58 = vld [vmem:[%s5842_s26 + $0x63] sm:$0xff]  ;;  %v2719_v47 = vld [vmem:[%s5842_s26 + $0x2c] sm:$0xff] }
  0x86   : > { %5439 = vmatprep.mubr.msk.f32.mxu1 %vm284_vm1, %v5999_v60  ;;  %5495 = vmatprep.mubr.msk.f32.mxu0 %vm284_vm1, %v1864_v48  ;;  %v1869_v60 = vld [vmem:[%s5842_s26 + $0x6b] sm:$0xff]  ;;  %v2720_v48 = vld [vmem:[%s5842_s26 + $0x34] sm:$0xff] }
  0x89   : > { %5440 = vmatmul.mubr.msk.f32.gmra.mxu1 %vm284_vm1, %v6009_v62  ;;  %5496 = vmatmul.mubr.msk.f32.gmra.mxu0 %vm284_vm1, %v1865_v52  ;;  %v1870_v62 = vld [vmem:[%s5842_s26 + $0x73] sm:$0xff]  ;;  %v4070_v52 = vld [vmem:[%s7390_s2 + $0xc8] sm:$0xff] }
  0x8a   : > { %5442 = vmatprep.mubr.msk.f32.mxu1 %vm284_vm1, %v6013_v0  ;;  %5498 = vmatprep.mubr.msk.f32.mxu0 %vm284_vm1, %v1866_v54  ;;  %v4045_v0 = vld [vmem:[%s7390_s2] sm:$0xff]  ;;  %v4071_v54 = vld [vmem:[%s7390_s2 + $0xd0] sm:$0xff] }
  0x8b   : > { %4083 = vperm.xlu0 %5777, %v4045_v0   ;;  %v4074_v0 = vld [vmem:[%s7390_s2 + $0xe8] sm:$0xff] }
  0x8d   : > { %5443 = vmatmul.mubr.msk.f32.gmra.mxu1 %vm284_vm1, %v6023_v2  ;;  %5499 = vmatmul.mubr.msk.f32.gmra.mxu0 %vm284_vm1, %v1867_v56  ;;  %v1871_v2 = vld [vmem:[%s5842_s26 + $0x7b] sm:$0xff] }
  0x8e   : > { %5445 = vmatprep.mubr.msk.f32.mxu1 %vm284_vm1, %v6027_v4  ;;  %5501 = vmatprep.mubr.msk.f32.mxu0 %vm284_vm1, %v1868_v58  ;;  %v1872_v4 = vld [vmem:[%s5842_s26 + $0x83] sm:$0xff] }
  0x8f   : > { %4088 = vperm.xlu0 %5777, %v4046_v7   ;;  %v2721_v56 = vld [vmem:[%s5842_s26 + $0x3c] sm:$0xff]  ;;  %v2722_v58 = vld [vmem:[%s5842_s26 + $0x44] sm:$0xff] }
  0x91   : > { %5446 = vmatmul.mubr.msk.f32.gmra.mxu1 %vm284_vm1, %v6037_v6  ;;  %5502 = vmatmul.mubr.msk.f32.gmra.mxu0 %vm284_vm1, %v1869_v60  ;;  %v4047_v6 = vld [vmem:[%s7390_s2 + $0x10] sm:$0xff] }
  0x92   : > { %5448 = vmatprep.mubr.msk.f32.mxu1 %vm284_vm1, %v6041_v8  ;;  %5504 = vmatprep.mubr.msk.f32.mxu0 %vm284_vm1, %v1870_v62  ;;  %v1873_v8 = vld [vmem:[%s5842_s26 + $0x8b] sm:$0xff]  ;;  %v2724_v62 = vld [vmem:[%s5842_s26 + $0x54] sm:$0xff] }
  0x93   : > { %4093 = vperm.xlu1 %5778, %v4047_v6   ;;  %4103 = vperm.xlu0 %5777, %v4049_v11   ;;  %v2723_v60 = vld [vmem:[%s5842_s26 + $0x4c] sm:$0xff] }
  0x95   : > { %5449 = vmatmul.mubr.msk.f32.gmra.mxu1 %vm284_vm1, %v6051_v10  ;;  %5505 = vmatmul.mubr.msk.f32.gmra.mxu0 %vm284_vm1, %v1871_v2  ;;  %v4048_v10 = vld [vmem:[%s7390_s2 + $0x18] sm:$0xff]  ;;  %v4075_v2 = vld [vmem:[%s7390_s2 + $0xf0] sm:$0xff] }
  0x96   : > { %5451 = vmatprep.mubr.msk.f32.mxu1 %vm284_vm1, %v6055_v12  ;;  %5507 = vmatprep.mubr.msk.f32.mxu0 %vm284_vm1, %v1872_v4  ;;  %v1875_v12 = vld [vmem:[%s5842_s26 + $0x9b] sm:$0xff] }
  0x97   : > { %4098 = vperm.xlu1 %5778, %v4048_v10   ;;  %4113 = vperm.xlu0 %5777, %v4051_v15   ;;  %v2725_v4 = vld [vmem:[%s5842_s26 + $0x5c] sm:$0xff]  ;;  %v2727_v10 = vld [vmem:[%s5842_s26 + $0x6c] sm:$0xff] }
  0x99   : > { %5452 = vmatmul.mubr.msk.f32.gmra.mxu1 %vm284_vm1, %v6065_v14  ;;  %5508 = vmatmul.mubr.msk.f32.gmra.mxu0 %vm284_vm1, %v1873_v8  ;;  %v4050_v14 = vld [vmem:[%s7390_s2 + $0x28] sm:$0xff]  ;;  %v4076_v8 = vld [vmem:[%s7390_s2 + $0xf8] sm:$0xff] }
  0x9a   : > { %5454 = vmatprep.mubr.msk.f32.mxu1 %vm284_vm1, %v6069_v16  ;;  %5510 = vmatprep.mubr.msk.f32.mxu0 %vm284_vm1, %v1874_v9  ;;  %v1877_v16 = vld [vmem:[%s5842_s26 + $0xab] sm:$0xff]  ;;  %v4077_v9 = vld [vmem:[%s7390_s2 + $0x100] sm:$0xff] }
  0x9b   : > { %4108 = vperm.xlu1 %5778, %v4050_v14   ;;  %4123 = vperm.xlu0 %5777, %v4053_v19  }
  0x9d   : > { %5455 = vmatmul.mubr.msk.f32.gmra.mxu1 %vm284_vm1, %v6079_v18  ;;  %5511 = vmatmul.mubr.msk.f32.gmra.mxu0 %vm284_vm1, %v1875_v12  ;;  %v4052_v18 = vld [vmem:[%s7390_s2 + $0x38] sm:$0xff] }
  0x9e   : > { %5457 = vmatprep.mubr.msk.f32.mxu1 %vm284_vm1, %v6083_v20  ;;  %5513 = vmatprep.mubr.msk.f32.mxu0 %vm284_vm1, %v1876_v13  ;;  %v1879_v20 = vld [vmem:[%s5842_s26 + $0xbb] sm:$0xff] }
  0x9f   : > { %4118 = vperm.xlu1 %5778, %v4052_v18   ;;  %4133 = vperm.xlu0 %5777, %v4055_v23   ;;  %v2728_v13 = vld [vmem:[%s5842_s26 + $0x74] sm:$0xff]  ;;  %v2729_v18 = vld [vmem:[%s5842_s26 + $0x7c] sm:$0xff] }
  0xa1   : > { %5458 = vmatmul.mubr.msk.f32.gmra.mxu1 %vm284_vm1, %v6093_v22  ;;  %5514 = vmatmul.mubr.msk.f32.gmra.mxu0 %vm284_vm1, %v1877_v16  ;;  %v4054_v22 = vld [vmem:[%s7390_s2 + $0x48] sm:$0xff] }
  0xa2   : > { %5460 = vmatprep.mubr.msk.f32.mxu1 %vm284_vm1, %v6097_v24  ;;  %5516 = vmatprep.mubr.msk.f32.mxu0 %vm284_vm1, %v1878_v17  ;;  %v1881_v24 = vld [vmem:[%s5842_s26 + $0xcb] sm:$0xff] }
  0xa3   : > { %4128 = vperm.xlu1 %5778, %v4054_v22   ;;  %4143 = vperm.xlu0 %5777, %v4057_v27   ;;  %v4078_v16 = vld [vmem:[%s7390_s2 + $0x108] sm:$0xff]  ;;  %v4079_v17 = vld [vmem:[%s7390_s2 + $0x110] sm:$0xff] }
  0xa5   : > { %5461 = vmatmul.mubr.msk.f32.gmra.mxu1 %vm284_vm1, %v6107_v26  ;;  %5517 = vmatmul.mubr.msk.f32.gmra.mxu0 %vm284_vm1, %v1879_v20  ;;  %v4056_v26 = vld [vmem:[%s7390_s2 + $0x58] sm:$0xff] }
  0xa6   : > { %5463 = vmatprep.mubr.msk.f32.mxu1 %vm284_vm1, %v6111_v28  ;;  %5519 = vmatprep.mubr.msk.f32.mxu0 %vm284_vm1, %v1880_v21  ;;  %v1883_v28 = vld [vmem:[%s5842_s26 + $0xdb] sm:$0xff]  ;;  %v2730_v21 = vld [vmem:[%s5842_s26 + $0x84] sm:$0xff] }
  0xa7   : > { %4138 = vperm.xlu1 %5778, %v4056_v26   ;;  %4153 = vperm.xlu0 %5777, %v4059_v31   ;;  %v2733_v31 = vld [vmem:[%s5842_s26 + $0x9c] sm:$0xff] }
  0xa9   : > { %5464 = vmatmul.mubr.msk.f32.gmra.mxu1 %vm284_vm1, %v6121_v30  ;;  %5520 = vmatmul.mubr.msk.f32.gmra.mxu0 %vm284_vm1, %v1881_v24  ;;  %v4058_v30 = vld [vmem:[%s7390_s2 + $0x68] sm:$0xff]  ;;  %v4080_v24 = vld [vmem:[%s7390_s2 + $0x118] sm:$0xff] }
  0xaa   : > { %5466 = vmatprep.mubr.msk.f32.mxu1 %vm284_vm1, %v6125_v32  ;;  %5522 = vmatprep.mubr.msk.f32.mxu0 %vm284_vm1, %v1882_v25  ;;  %v1885_v32 = vld [vmem:[%s5842_s26 + $0xeb] sm:$0xff] }
  0xab   : > { %4148 = vperm.xlu1 %5778, %v4058_v30   ;;  %4163 = vperm.xlu0 %5777, %v4061_v35   ;;  %v2731_v25 = vld [vmem:[%s5842_s26 + $0x8c] sm:$0xff] }
  0xad   : > { %5467 = vmatmul.mubr.msk.f32.gmra.mxu1 %vm284_vm1, %v6135_v34  ;;  %5523 = vmatmul.mubr.msk.f32.gmra.mxu0 %vm284_vm1, %v1883_v28  ;;  %v4060_v34 = vld [vmem:[%s7390_s2 + $0x78] sm:$0xff] }
  0xae   : > { %5469 = vmatprep.mubr.msk.f32.mxu1 %vm284_vm1, %v6139_v36  ;;  %5525 = vmatprep.mubr.msk.f32.mxu0 %vm284_vm1, %v1884_v29  ;;  %v1887_v36 = vld [vmem:[%s5842_s26 + $0xfb] sm:$0xff] }
  0xaf   : > { %4158 = vperm.xlu1 %5778, %v4060_v34   ;;  %4173 = vperm.xlu0 %5777, %v4063_v39   ;;  %v2732_v28 = vld [vmem:[%s5842_s26 + $0x94] sm:$0xff]  ;;  %v2734_v34 = vld [vmem:[%s5842_s26 + $0xa4] sm:$0xff] }
  0xb1   : > { %5470 = vmatmul.mubr.msk.f32.gmra.mxu1 %vm284_vm1, %v6149_v38  ;;  %5526 = vmatmul.mubr.msk.f32.gmra.mxu0 %vm284_vm1, %v1885_v32  ;;  %v4062_v38 = vld [vmem:[%s7390_s2 + $0x88] sm:$0xff] }
  0xb2   : > { %5472 = vmatprep.mubr.msk.f32.mxu1 %vm284_vm1, %v6153_v40  ;;  %5528 = vmatprep.mubr.msk.f32.mxu0 %vm284_vm1, %v1886_v33  ;;  %v1889_v40 = vld [vmem:[%s5842_s26 + $0x10b] sm:$0xff] }
  0xb3   : > { %4168 = vperm.xlu1 %5778, %v4062_v38   ;;  %4183 = vperm.xlu0 %5777, %v4065_v43   ;;  %v2737_v43 = vld [vmem:[%s5842_s26 + $0xbc] sm:$0xff] }
  0xb5   : > { %5473 = vmatmul.mubr.msk.f32.gmra.mxu1 %vm284_vm1, %v6163_v42  ;;  %5529 = vmatmul.mubr.msk.f32.gmra.mxu0 %vm284_vm1, %v1887_v36  ;;  %v4064_v42 = vld [vmem:[%s7390_s2 + $0x98] sm:$0xff] }
  0xb6   : > { %5475 = vmatprep.mubr.msk.f32.mxu1 %vm284_vm1, %v6167_v44  ;;  %5531 = vmatprep.mubr.msk.f32.mxu0 %vm284_vm1, %v1888_v37  ;;  %v1891_v44 = vld [vmem:[%s5842_s26 + $0x11b] sm:$0xff]  ;;  %v2735_v37 = vld [vmem:[%s5842_s26 + $0xac] sm:$0xff] }
  0xb7   : > { %4178 = vperm.xlu1 %5778, %v4064_v42  }
  0xb9   : > { %5476 = vmatmul.mubr.msk.f32.gmra.mxu1 %vm284_vm1, %v6177_v49  ;;  %5532 = vmatmul.mubr.msk.f32.gmra.mxu0 %vm284_vm1, %v1889_v40  ;;  %v1892_v49 = vld [vmem:[%s5842_s26 + $0x123] sm:$0xff]  ;;  %v2736_v40 = vld [vmem:[%s5842_s26 + $0xb4] sm:$0xff] }
  0xba   : > { %5478 = vmatprep.mubr.msk.f32.mxu1 %vm284_vm1, %v6181_v53  ;;  %5534 = vmatprep.mubr.msk.f32.mxu0 %vm284_vm1, %v1890_v41  ;;  %v4067_v53 = vld [vmem:[%s7390_s2 + $0xb0] sm:$0xff] }
  0xbb   : > { %4188 = vperm.xlu1 %5778, %v4066_v51   ;;  %4193 = vperm.xlu0 %5777, %v4067_v53  }
  0xbd   : > { %5479 = vmatmul.mubr.msk.f32.gmra.mxu1 %vm284_vm1, %v6191_v57  ;;  %5535 = vmatmul.mubr.msk.f32.gmra.mxu0 %vm284_vm1, %v1891_v44  ;;  %v2288_v57 = vld [vmem:[%s5842_s26 + $0x14] sm:$0xff] }
  0xbe   : > { %5481 = vmatprep.mubr.msk.f32.mxu1 %vm284_vm1, %v1462_v45  ;;  %5537 = vmatprep.mubr.msk.f32.mxu0 %vm284_vm1, %v1892_v49  ;;  %v2738_v49 = vld [vmem:[%s5842_s26 + $0xc4] sm:$0xff] }
  0xbf   : > { %4198 = vperm.xlu1 %5778, %v4068_v63   ;;  %4203 = vperm.xlu0 %5777, %v4069_v50  }
  0xc1   : > { %5482 = vmatmul.mubr.msk.f32.gmra.mxu1 %vm284_vm1, %v1463_v55  ;;  %5538 = vmatmul.mubr.msk.f32.gmra.mxu0 %vm284_vm1, %v1893_v59  ;;  %v2739_v55 = vld [vmem:[%s5842_s26 + $0xcc] sm:$0xff] }
  0xc2   : > { %5542 = vmatprep.mubr.msk.f32.mxu1 %vm284_vm1, %v2288_v57  ;;  %5598 = vmatprep.mubr.msk.f32.mxu0 %vm284_vm1, %v2718_v61 }
  0xc3   : > { %4208 = vperm.xlu1 %5778, %v4070_v52   ;;  %4213 = vperm.xlu0 %5777, %v4071_v54   ;;  %v2742_v52 = vld [vmem:[%s5842_s26 + $0xe4] sm:$0xff] }
  0xc5   : > { %5543 = vmatmul.mubr.msk.f32.vlgmr.msra.gmra.mxu1 %vm284_vm1, %v2289_v3  ;;  %5599 = vmatmul.mubr.msk.f32.vlgmr.msra.gmra.mxu0 %vm284_vm1, %v2719_v47  ;;  %v2741_v3 = vld [vmem:[%s5842_s26 + $0xdc] sm:$0xff] }
  0xc6   : > { %5653 = vmatpush3.msk.msra.mxu1 %vm393_vm0, %v6208_v1  ;;  %5709 = vmatpush3.msk.msra.mxu0 %vm393_vm0, %v6213_v46  ;;  %v4072_v1 = vld [vmem:[%s7390_s2 + $0xd8] sm:$0xff]  ;;  %v4073_v46 = vld [vmem:[%s7390_s2 + $0xe0] sm:$0xff] }
  0xc7   : > { %5545 = vmatprep.mubr.msk.f32.mxu1 %vm284_vm1, %v2718_v61  ;;  %5601 = vmatprep.mubr.msk.f32.mxu0 %vm284_vm1, %v2720_v48  ;;  %v2740_v61 = vld [vmem:[%s5842_s26 + $0xd4] sm:$0xff] }
  0xc8   : > { %4218 = vperm.xlu1 %5778, %v4072_v1   ;;  %4223 = vperm.xlu0 %5777, %v4073_v46  }
  0xc9   : > { %5546 = vmatmul.mubr.msk.f32.gmra.mxu1 %vm284_vm1, %v2719_v47  ;;  %5602 = vmatmul.mubr.msk.f32.gmra.mxu0 %vm284_vm1, %v2721_v56 }
  0xca   : > { %5548 = vmatprep.mubr.msk.f32.mxu1 %vm284_vm1, %v2720_v48  ;;  %5604 = vmatprep.mubr.msk.f32.mxu0 %vm284_vm1, %v2722_v58 }
  0xcc   : > { %4228 = vperm.xlu1 %5778, %v4074_v0   ;;  %4233 = vperm.xlu0 %5777, %v4075_v2  }
  0xcd   : > { %5549 = vmatmul.mubr.msk.f32.gmra.mxu1 %vm284_vm1, %v2721_v56  ;;  %5605 = vmatmul.mubr.msk.f32.gmra.mxu0 %vm284_vm1, %v2723_v60 }
  0xce   : > { %5551 = vmatprep.mubr.msk.f32.mxu1 %vm284_vm1, %v2722_v58  ;;  %5607 = vmatprep.mubr.msk.f32.mxu0 %vm284_vm1, %v2724_v62  ;;  %v2743_v58 = vld [vmem:[%s5842_s26 + $0xec] sm:$0xff] }
  0xd0   : > { %4238 = vperm.xlu1 %5778, %v4076_v8   ;;  %4243 = vperm.xlu0 %5777, %v4077_v9   ;;  %v2746_v9 = vld [vmem:[%s5842_s26 + $0x104] sm:$0xff] }
  0xd1   : > { %v6480_v6 = vpop.f32.mrf.mxu0  ;;  %v6482_v7 = vpop.f32.mrf.mxu1  ;;  %5552 = vmatmul.mubr.msk.f32.gmra.mxu1 %vm284_vm1, %v2723_v60  ;;  %5608 = vmatmul.mubr.msk.f32.gmra.mxu0 %vm284_vm1, %v2725_v4  ;;  %v2744_v60 = vld [vmem:[%s5842_s26 + $0xf4] sm:$0xff] }
  0xd2   : > { %5554 = vmatprep.mubr.msk.f32.mxu1 %vm284_vm1, %v2724_v62  ;;  %5610 = vmatprep.mubr.msk.f32.mxu0 %vm284_vm1, %v2726_v5 }
  0xd3   : > { %v6495_v11 = vpop.f32.mrf.mxu0  ;;  %v6497_v12 = vpop.f32.mrf.mxu1 }
  0xd4   : > { %4248 = vperm.xlu1 %5778, %v4078_v16   ;;  %4253 = vperm.xlu0 %5777, %v4079_v17  }
  0xd5   : > { %v6500_v14 = vpop.f32.mrf.mxu0  ;;  %v6502_v15 = vpop.f32.mrf.mxu1  ;;  %5555 = vmatmul.mubr.msk.f32.gmra.mxu1 %vm284_vm1, %v2725_v4  ;;  %5611 = vmatmul.mubr.msk.f32.gmra.mxu0 %vm284_vm1, %v2727_v10  ;;  %v2745_v4 = vld [vmem:[%s5842_s26 + $0xfc] sm:$0xff] }
  0xd6   : > { %5557 = vmatprep.mubr.msk.f32.mxu1 %vm284_vm1, %v2726_v5  ;;  %5613 = vmatprep.mubr.msk.f32.mxu0 %vm284_vm1, %v2728_v13 }
  0xd7   : > { %v6515_v19 = vpop.f32.mrf.mxu0  ;;  %v6517_v20 = vpop.f32.mrf.mxu1 }
  0xd8   : > { %4258 = vperm.xlu1 %5778, %v4080_v24  }
  0xd9   : > { %v6520_v22 = vpop.f32.mrf.mxu0  ;;  %v6522_v23 = vpop.f32.mrf.mxu1  ;;  %5558 = vmatmul.mubr.msk.f32.gmra.mxu1 %vm284_vm1, %v2727_v10  ;;  %5614 = vmatmul.mubr.msk.f32.gmra.mxu0 %vm284_vm1, %v2729_v18 }
  0xda   : > { %5560 = vmatprep.mubr.msk.f32.mxu1 %vm284_vm1, %v2728_v13  ;;  %5616 = vmatprep.mubr.msk.f32.mxu0 %vm284_vm1, %v2730_v21 }
  0xdb   : > { %v6532_v26 = vpop.f32.mrf.mxu0  ;;  %v6534_v27 = vpop.f32.mrf.mxu1 }
  0xdd   : > { %v6537_v29 = vpop.f32.mrf.mxu0  ;;  %v6539_v30 = vpop.f32.mrf.mxu1  ;;  %5561 = vmatmul.mubr.msk.f32.gmra.mxu1 %vm284_vm1, %v2729_v18  ;;  %5617 = vmatmul.mubr.msk.f32.gmra.mxu0 %vm284_vm1, %v2731_v25 }
  0xde   : > { %5563 = vmatprep.mubr.msk.f32.mxu1 %vm284_vm1, %v2730_v21  ;;  %5619 = vmatprep.mubr.msk.f32.mxu0 %vm284_vm1, %v2732_v28  ;;  %v2747_v21 = vld [vmem:[%s5842_s26 + $0x10c] sm:$0xff] }
  0xdf   : > { %v6546_v32 = vpop.f32.mrf.mxu0  ;;  %v6548_v33 = vpop.f32.mrf.mxu1 }
  0xe1   : > { %v6551_v35 = vpop.f32.mrf.mxu0  ;;  %v6553_v36 = vpop.f32.mrf.mxu1  ;;  %5564 = vmatmul.mubr.msk.f32.gmra.mxu1 %vm284_vm1, %v2731_v25  ;;  %5620 = vmatmul.mubr.msk.f32.gmra.mxu0 %vm284_vm1, %v2733_v31 }
  0xe2   : > { %5566 = vmatprep.mubr.msk.f32.mxu1 %vm284_vm1, %v2732_v28  ;;  %5622 = vmatprep.mubr.msk.f32.mxu0 %vm284_vm1, %v2734_v34 }
  0xe3   : > { %v6560_v38 = vpop.f32.mrf.mxu0  ;;  %v6562_v39 = vpop.f32.mrf.mxu1 }
  0xe5   : > { %v6565_v41 = vpop.f32.mrf.mxu0  ;;  %v6567_v42 = vpop.f32.mrf.mxu1  ;;  %5567 = vmatmul.mubr.msk.f32.gmra.mxu1 %vm284_vm1, %v2733_v31  ;;  %5623 = vmatmul.mubr.msk.f32.gmra.mxu0 %vm284_vm1, %v2735_v37 }
  0xe6   : > { %5569 = vmatprep.mubr.msk.f32.mxu1 %vm284_vm1, %v2734_v34  ;;  %5625 = vmatprep.mubr.msk.f32.mxu0 %vm284_vm1, %v2736_v40 }
  0xe7   : > { %v6574_v44 = vpop.f32.mrf.mxu0  ;;  %v6576_v45 = vpop.f32.mrf.mxu1 }
  0xe9   : > { %v6579_v51 = vpop.f32.mrf.mxu0  ;;  %v6581_v53 = vpop.f32.mrf.mxu1  ;;  %5570 = vmatmul.mubr.msk.f32.gmra.mxu1 %vm284_vm1, %v2735_v37  ;;  %5626 = vmatmul.mubr.msk.f32.gmra.mxu0 %vm284_vm1, %v2737_v43 }
  0xea   : > { %5572 = vmatprep.mubr.msk.f32.mxu1 %vm284_vm1, %v2736_v40  ;;  %5628 = vmatprep.mubr.msk.f32.mxu0 %vm284_vm1, %v2738_v49 }
  0xeb   : > { %v6588_v59 = vpop.f32.mrf.mxu0  ;;  %v6590_v57 = vpop.f32.mrf.mxu1 }
  0xed   : > { %v6593_v63 = vpop.f32.mrf.mxu0  ;;  %v6595_v50 = vpop.f32.mrf.mxu1  ;;  %5573 = vmatmul.mubr.msk.f32.gmra.mxu1 %vm284_vm1, %v2737_v43  ;;  %5629 = vmatmul.mubr.msk.f32.gmra.mxu0 %vm284_vm1, %v2739_v55  ;;  %v2749_v43 = vld [vmem:[%s5842_s26 + $0x11c] sm:$0xff] }
  0xee   : > { %5575 = vmatprep.mubr.msk.f32.mxu1 %vm284_vm1, %v2738_v49  ;;  %5631 = vmatprep.mubr.msk.f32.mxu0 %vm284_vm1, %v2740_v61 }
  0xef   : > { %v6602_v47 = vpop.f32.mrf.mxu0  ;;  %v6604_v48 = vpop.f32.mrf.mxu1 }
  0xf1   : > { %v6607_v54 = vpop.f32.mrf.mxu0  ;;  %v6609_v56 = vpop.f32.mrf.mxu1  ;;  %5576 = vmatmul.mubr.msk.f32.gmra.mxu1 %vm284_vm1, %v2739_v55  ;;  %5632 = vmatmul.mubr.msk.f32.gmra.mxu0 %vm284_vm1, %v2741_v3 }
  0xf2   : > { %5578 = vmatprep.mubr.msk.f32.mxu1 %vm284_vm1, %v2740_v61  ;;  %5634 = vmatprep.mubr.msk.f32.mxu0 %vm284_vm1, %v2742_v52 }
  0xf3   : > { %v6616_v1 = vpop.f32.mrf.mxu0  ;;  %v6618_v46 = vpop.f32.mrf.mxu1 }
  0xf5   : > { %v5320_v62 = vpop.f32.mrf.mxu1  ;;  %v5376_v0 = vpop.f32.mrf.mxu0  ;;  %5579 = vmatmul.mubr.msk.f32.gmra.mxu1 %vm284_vm1, %v2741_v3  ;;  %5635 = vmatmul.mubr.msk.f32.gmra.mxu0 %vm284_vm1, %v2743_v58 }
  0xf6   : > { %v825_v2 = vadd.f32 %v5320_v62, %v6480_v6  ;;  %5581 = vmatprep.mubr.msk.f32.mxu1 %vm284_vm1, %v2742_v52  ;;  %5637 = vmatprep.mubr.msk.f32.mxu0 %vm284_vm1, %v2744_v60  ;;  %v2751_v62 = vld [vmem:[%s5842_s26 + $0x12c] sm:$0xff] }
  0xf7   : > { %v819_v5 = vpop.f32.mrf.mxu1  ;;  %v1213_v8 = vpop.f32.mrf.mxu0 }
  0xf8   : > { %v6628_v10 = vadd.f32 %v5376_v0, %v825_v2  ;;  %v820_v13 = vadd.f32 %v819_v5, %v6495_v11  ;;  %v2748_v11 = vld [vmem:[%s5842_s26 + $0x114] sm:$0xff] }
  0xf9   : > { %v5323_v16 = vpop.f32.mrf.mxu1  ;;  %v5379_v17 = vpop.f32.mrf.mxu0  ;;  %5582 = vmatmul.mubr.msk.f32.gmra.mxu1 %vm284_vm1, %v2743_v58  ;;  %5638 = vmatmul.mubr.msk.f32.gmra.mxu0 %vm284_vm1, %v2745_v4 }
  0xfa   : > { %v6633_v6 = vadd.f32 %v1213_v8, %v820_v13  ;;  %v835_v18 = vadd.f32 %v5323_v16, %v6500_v14  ;;  %5584 = vmatprep.mubr.msk.f32.mxu1 %vm284_vm1, %v2744_v60  ;;  %5640 = vmatprep.mubr.msk.f32.mxu0 %vm284_vm1, %v2746_v9  ;;  %v2753_v16 = vld [vmem:[%s5842_s26 + $0x13c] sm:$0xff] }
  0xfb   : > { %v829_v24 = vpop.f32.mrf.mxu1  ;;  %v1223_v25 = vpop.f32.mrf.mxu0 }
  0xfc   : > { %v6640_v28 = vadd.f32 %v5379_v17, %v835_v18  ;;  %v830_v31 = vadd.f32 %v829_v24, %v6515_v19  ;;  %v2750_v19 = vld [vmem:[%s5842_s26 + $0x124] sm:$0xff] }
  0xfd   : > { %v5326_v34 = vpop.f32.mrf.mxu1  ;;  %v5382_v37 = vpop.f32.mrf.mxu0  ;;  %5585 = vmatmul.mubr.msk.f32.gmra.mxu1 %vm284_vm1, %v2745_v4  ;;  %5641 = vmatmul.mubr.msk.f32.gmra.mxu0 %vm284_vm1, %v2747_v21 }
  0xfe   : > { %v6645_v14 = vadd.f32 %v1223_v25, %v830_v31  ;;  %v845_v40 = vadd.f32 %v5326_v34, %v6520_v22  ;;  %5587 = vmatprep.mubr.msk.f32.mxu1 %vm284_vm1, %v2746_v9  ;;  %5643 = vmatprep.mubr.msk.f32.mxu0 %vm284_vm1, %v2748_v11 }
  0xff   : > { %v839_v49 = vpop.f32.mrf.mxu1  ;;  %v1233_v55 = vpop.f32.mrf.mxu0 }
 0x100   : > { %v6652_v61 = vadd.f32 %v5382_v37, %v845_v40  ;;  %v840_v3 = vadd.f32 %v839_v49, %v6532_v26  ;;  %v2752_v26 = vld [vmem:[%s5842_s26 + $0x134] sm:$0xff] }
 0x101   : > { %v5329_v52 = vpop.f32.mrf.mxu1  ;;  %v5385_v58 = vpop.f32.mrf.mxu0  ;;  %5588 = vmatmul.mubr.msk.f32.gmra.mxu1 %vm284_vm1, %v2747_v21  ;;  %5644 = vmatmul.mubr.msk.f32.gmra.mxu0 %vm284_vm1, %v2749_v43  ;;  %v3578_v21 = vld [vmem:[%s5842_s26 + $0x26] sm:$0xff]  ;;  %v3579_v40 = vld [vmem:[%s5842_s26 + $0x2e] sm:$0xff] }
 0x102   : > { %v6657_v22 = vadd.f32 %v1233_v55, %v840_v3  ;;  %v855_v60 = vadd.f32 %v5329_v52, %v6537_v29  ;;  %5590 = vmatprep.mubr.msk.f32.mxu1 %vm284_vm1, %v2748_v11  ;;  %5646 = vmatprep.mubr.msk.f32.mxu0 %vm284_vm1, %v2750_v19  ;;  %v3149_v37 = vld [vmem:[%s5842_s26 + $0x2d] sm:$0xff]  ;;  %v3150_v49 = vld [vmem:[%s5842_s26 + $0x35] sm:$0xff] }
 0x103   : > { %v849_v0 = vpop.f32.mrf.mxu1  ;;  %v1243_v2 = vpop.f32.mrf.mxu0  ;;  %v3580_v55 = vld [vmem:[%s5842_s26 + $0x36] sm:$0xff] }
 0x104   : > { %v6664_v4 = vadd.f32 %v5385_v58, %v855_v60  ;;  %v850_v5 = vadd.f32 %v849_v0, %v6546_v32  ;;  %v3148_v32 = vld [vmem:[%s5842_s26 + $0x25] sm:$0xff] }
 0x105   : > { %v5332_v8 = vpop.f32.mrf.mxu1  ;;  %v5388_v9 = vpop.f32.mrf.mxu0  ;;  %5591 = vmatmul.mubr.msk.f32.gmra.mxu1 %vm284_vm1, %v2749_v43  ;;  %5647 = vmatmul.mubr.msk.f32.gmra.mxu0 %vm284_vm1, %v2751_v62  ;;  %v3581_v0 = vld [vmem:[%s5842_s26 + $0x3e] sm:$0xff] }
 0x106   : > { %v6669_v29 = vadd.f32 %v1243_v2, %v850_v5  ;;  %v865_v13 = vadd.f32 %v5332_v8, %v6551_v35  ;;  %5593 = vmatprep.mubr.msk.f32.mxu1 %vm284_vm1, %v2750_v19  ;;  %5649 = vmatprep.mubr.msk.f32.mxu0 %vm284_vm1, %v2752_v26  ;;  %v3152_v26 = vld [vmem:[%s5842_s26 + $0x45] sm:$0xff] }
 0x107   : > { %v859_v17 = vpop.f32.mrf.mxu1  ;;  %v1253_v18 = vpop.f32.mrf.mxu0  ;;  %v3582_v5 = vld [vmem:[%s5842_s26 + $0x46] sm:$0xff] }
 0x108   : > { %v6677_v24 = vadd.f32 %v5388_v9, %v865_v13  ;;  %v860_v25 = vadd.f32 %v859_v17, %v6560_v38 }
 0x109   : > { %v5335_v11 = vpop.f32.mrf.mxu1  ;;  %v5391_v31 = vpop.f32.mrf.mxu0  ;;  %5594 = vmatmul.mubr.msk.f32.gmra.mxu1 %vm284_vm1, %v2751_v62  ;;  %5650 = vmatmul.mubr.msk.f32.gmra.mxu0 %vm284_vm1, %v2753_v16  ;;  %v3151_v62 = vld [vmem:[%s5842_s26 + $0x3d] sm:$0xff] }
 0x10a   : > { %v6682_v35 = vadd.f32 %v1253_v18, %v860_v25  ;;  %v875_v34 = vadd.f32 %v5335_v11, %v6565_v41  ;;  %5654 = vmatprep.mubr.msk.f32.mxu1 %vm284_vm1, %v3148_v32  ;;  %5710 = vmatprep.mubr.msk.f32.mxu0 %vm284_vm1, %v3578_v21  ;;  %v3153_v18 = vld [vmem:[%s5842_s26 + $0x4d] sm:$0xff]  ;;  %v3154_v25 = vld [vmem:[%s5842_s26 + $0x55] sm:$0xff] }
 0x10b   : > { %v869_v43 = vpop.f32.mrf.mxu1  ;;  %v1263_v38 = vpop.f32.mrf.mxu0  ;;  %v3583_v32 = vld [vmem:[%s5842_s26 + $0x4e] sm:$0xff]  ;;  %v3584_v11 = vld [vmem:[%s5842_s26 + $0x56] sm:$0xff] }
 0x10c   : > { %v6691_v19 = vadd.f32 %v5391_v31, %v875_v34  ;;  %v870_v3 = vadd.f32 %v869_v43, %v6574_v44 }
 0x10d   : > { %v5338_v52 = vpop.f32.mrf.mxu1  ;;  %v5394_v41 = vpop.f32.mrf.mxu0  ;;  %5655 = vmatmul.mubr.msk.f32.vlgmr.msra.gmra.mxu1 %vm284_vm1, %v3149_v37  ;;  %5711 = vmatmul.mubr.msk.f32.vlgmr.msra.gmra.mxu0 %vm284_vm1, %v3579_v40 }
 0x10e   : > { %v6696_v58 = vadd.f32 %v1263_v38, %v870_v3  ;;  %v885_v60 = vadd.f32 %v5338_v52, %v6579_v51  ;;  %5657 = vmatprep.mubr.msk.f32.mxu1 %vm284_vm1, %v3150_v49  ;;  %5713 = vmatprep.mubr.msk.f32.mxu0 %vm284_vm1, %v3580_v55  ;;  %v3155_v38 = vld [vmem:[%s5842_s26 + $0x5d] sm:$0xff]  ;;  %v3156_v3 = vld [vmem:[%s5842_s26 + $0x65] sm:$0xff] }
 0x10f   : > { %v879_v2 = vpop.f32.mrf.mxu1  ;;  %v1273_v44 = vpop.f32.mrf.mxu0  ;;  %v3585_v49 = vld [vmem:[%s5842_s26 + $0x5e] sm:$0xff]  ;;  %v3586_v52 = vld [vmem:[%s5842_s26 + $0x66] sm:$0xff] }
 0x110   : > { %v6705_v8 = vadd.f32 %v5394_v41, %v885_v60  ;;  %v880_v9 = vadd.f32 %v879_v2, %v6588_v59 }
 0x111   : > { %v5341_v13 = vpop.f32.mrf.mxu1  ;;  %v5397_v51 = vpop.f32.mrf.mxu0  ;;  %5658 = vmatmul.mubr.msk.f32.gmra.mxu1 %vm284_vm1, %v3151_v62  ;;  %5714 = vmatmul.mubr.msk.f32.gmra.mxu0 %vm284_vm1, %v3581_v0 }
 0x112   : > { %v6710_v16 = vadd.f32 %v1273_v44, %v880_v9  ;;  %v895_v17 = vadd.f32 %v5341_v13, %v6593_v63  ;;  %5660 = vmatprep.mubr.msk.f32.mxu1 %vm284_vm1, %v3152_v26  ;;  %5716 = vmatprep.mubr.msk.f32.mxu0 %vm284_vm1, %v3582_v5  ;;  %v3157_v44 = vld [vmem:[%s5842_s26 + $0x6d] sm:$0xff]  ;;  %v3158_v9 = vld [vmem:[%s5842_s26 + $0x75] sm:$0xff] }
 0x113   : > { %v889_v21 = vpop.f32.mrf.mxu1  ;;  %v1283_v59 = vpop.f32.mrf.mxu0  ;;  %v3587_v26 = vld [vmem:[%s5842_s26 + $0x6e] sm:$0xff]  ;;  %v3588_v13 = vld [vmem:[%s5842_s26 + $0x76] sm:$0xff] }
 0x114   : > { %v6719_v31 = vadd.f32 %v5397_v51, %v895_v17  ;;  %v890_v34 = vadd.f32 %v889_v21, %v6602_v47 }
 0x115   : > { %v5344_v37 = vpop.f32.mrf.mxu1  ;;  %v5400_v63 = vpop.f32.mrf.mxu0  ;;  %5661 = vmatmul.mubr.msk.f32.gmra.mxu1 %vm284_vm1, %v3153_v18  ;;  %5717 = vmatmul.mubr.msk.f32.gmra.mxu0 %vm284_vm1, %v3583_v32 }
 0x116   : > { %v6724_v40 = vadd.f32 %v1283_v59, %v890_v34  ;;  %v905_v43 = vadd.f32 %v5344_v37, %v6607_v54  ;;  %5663 = vmatprep.mubr.msk.f32.mxu1 %vm284_vm1, %v3154_v25  ;;  %5719 = vmatprep.mubr.msk.f32.mxu0 %vm284_vm1, %v3584_v11  ;;  %v3159_v59 = vld [vmem:[%s5842_s26 + $0x7d] sm:$0xff]  ;;  %v3160_v34 = vld [vmem:[%s5842_s26 + $0x85] sm:$0xff] }
 0x117   : > { %v899_v55 = vpop.f32.mrf.mxu1  ;;  %v1293_v47 = vpop.f32.mrf.mxu0  ;;  %v3589_v25 = vld [vmem:[%s5842_s26 + $0x7e] sm:$0xff]  ;;  %v3590_v37 = vld [vmem:[%s5842_s26 + $0x86] sm:$0xff] }
 0x118   : > { %v6733_v41 = vadd.f32 %v5400_v63, %v905_v43  ;;  %v900_v60 = vadd.f32 %v899_v55, %v6616_v1 }
 0x119   : > { %v5347_v62 = vpop.f32.mrf.mxu1  ;;  %v5403_v54 = vpop.f32.mrf.mxu0  ;;  %5664 = vmatmul.mubr.msk.f32.gmra.mxu1 %vm284_vm1, %v3155_v38  ;;  %5720 = vmatmul.mubr.msk.f32.gmra.mxu0 %vm284_vm1, %v3585_v49 }
 0x11a   : > { %v6738_v0 = vadd.f32 %v1293_v47, %v900_v60  ;;  %v915_v2 = vadd.f32 %v5347_v62, %v6482_v7  ;;  %5666 = vmatprep.mubr.msk.f32.mxu1 %vm284_vm1, %v3156_v3  ;;  %5722 = vmatprep.mubr.msk.f32.mxu0 %vm284_vm1, %v3586_v52  ;;  %v3161_v47 = vld [vmem:[%s5842_s26 + $0x8d] sm:$0xff]  ;;  %v3162_v60 = vld [vmem:[%s5842_s26 + $0x95] sm:$0xff] }
 0x11b   : > { %v909_v5 = vpop.f32.mrf.mxu1  ;;  %v1303_v1 = vpop.f32.mrf.mxu0  ;;  %v3591_v3 = vld [vmem:[%s5842_s26 + $0x8e] sm:$0xff]  ;;  %v3592_v62 = vld [vmem:[%s5842_s26 + $0x96] sm:$0xff] }
 0x11c   : > { %v6747_v51 = vadd.f32 %v5403_v54, %v915_v2  ;;  %v910_v17 = vadd.f32 %v909_v5, %v6497_v12 }
 0x11d   : > { %v5350_v18 = vpop.f32.mrf.mxu1  ;;  %v5406_v7 = vpop.f32.mrf.mxu0  ;;  %5667 = vmatmul.mubr.msk.f32.gmra.mxu1 %vm284_vm1, %v3157_v44  ;;  %5723 = vmatmul.mubr.msk.f32.gmra.mxu0 %vm284_vm1, %v3587_v26 }
 0x11e   : > { %v6752_v32 = vadd.f32 %v1303_v1, %v910_v17  ;;  %v925_v21 = vadd.f32 %v5350_v18, %v6502_v15  ;;  %5669 = vmatprep.mubr.msk.f32.mxu1 %vm284_vm1, %v3158_v9  ;;  %5725 = vmatprep.mubr.msk.f32.mxu0 %vm284_vm1, %v3588_v13  ;;  %v3163_v1 = vld [vmem:[%s5842_s26 + $0x9d] sm:$0xff]  ;;  %v3164_v17 = vld [vmem:[%s5842_s26 + $0xa5] sm:$0xff] }
 0x11f   : > { %v919_v11 = vpop.f32.mrf.mxu1  ;;  %v1313_v12 = vpop.f32.mrf.mxu0  ;;  %v3593_v9 = vld [vmem:[%s5842_s26 + $0x9e] sm:$0xff]  ;;  %v3594_v18 = vld [vmem:[%s5842_s26 + $0xa6] sm:$0xff] }
 0x120   : > { %v6761_v63 = vadd.f32 %v5406_v7, %v925_v21  ;;  %v920_v43 = vadd.f32 %v919_v11, %v6517_v20 }
 0x121   : > { %v5353_v38 = vpop.f32.mrf.mxu1  ;;  %v5409_v15 = vpop.f32.mrf.mxu0  ;;  %5670 = vmatmul.mubr.msk.f32.gmra.mxu1 %vm284_vm1, %v3159_v59  ;;  %5726 = vmatmul.mubr.msk.f32.gmra.mxu0 %vm284_vm1, %v3589_v25 }
 0x122   : > { %v6766_v49 = vadd.f32 %v1313_v12, %v920_v43  ;;  %v935_v55 = vadd.f32 %v5353_v38, %v6522_v23  ;;  %5672 = vmatprep.mubr.msk.f32.mxu1 %vm284_vm1, %v3160_v34  ;;  %5728 = vmatprep.mubr.msk.f32.mxu0 %vm284_vm1, %v3590_v37  ;;  %v3165_v12 = vld [vmem:[%s5842_s26 + $0xad] sm:$0xff]  ;;  %v3166_v43 = vld [vmem:[%s5842_s26 + $0xb5] sm:$0xff] }
 0x123   : > { %v929_v52 = vpop.f32.mrf.mxu1  ;;  %v1323_v20 = vpop.f32.mrf.mxu0  ;;  %v3595_v34 = vld [vmem:[%s5842_s26 + $0xae] sm:$0xff]  ;;  %v3596_v38 = vld [vmem:[%s5842_s26 + $0xb6] sm:$0xff] }
 0x124   : > { %v6775_v54 = vadd.f32 %v5409_v15, %v935_v55  ;;  %v930_v2 = vadd.f32 %v929_v52, %v6534_v27 }
 0x125   : > { %v5356_v44 = vpop.f32.mrf.mxu1  ;;  %v5412_v23 = vpop.f32.mrf.mxu0  ;;  %5673 = vmatmul.mubr.msk.f32.gmra.mxu1 %vm284_vm1, %v3161_v47  ;;  %5729 = vmatmul.mubr.msk.f32.gmra.mxu0 %vm284_vm1, %v3591_v3 }
 0x126   : > { %v6780_v26 = vadd.f32 %v1323_v20, %v930_v2  ;;  %v945_v5 = vadd.f32 %v5356_v44, %v6539_v30  ;;  %5675 = vmatprep.mubr.msk.f32.mxu1 %vm284_vm1, %v3162_v60  ;;  %5731 = vmatprep.mubr.msk.f32.mxu0 %vm284_vm1, %v3592_v62  ;;  %v3167_v20 = vld [vmem:[%s5842_s26 + $0xbd] sm:$0xff]  ;;  %v3168_v2 = vld [vmem:[%s5842_s26 + $0xc5] sm:$0xff] }
 0x127   : > { %v939_v13 = vpop.f32.mrf.mxu1  ;;  %v1333_v27 = vpop.f32.mrf.mxu0  ;;  %v3597_v60 = vld [vmem:[%s5842_s26 + $0xbe] sm:$0xff]  ;;  %v3598_v44 = vld [vmem:[%s5842_s26 + $0xc6] sm:$0xff] }
 0x128   : > { %v6789_v7 = vadd.f32 %v5412_v23, %v945_v5  ;;  %v940_v21 = vadd.f32 %v939_v13, %v6548_v33 }
 0x129   : > { %v5359_v59 = vpop.f32.mrf.mxu1  ;;  %v5415_v30 = vpop.f32.mrf.mxu0  ;;  %5676 = vmatmul.mubr.msk.f32.gmra.mxu1 %vm284_vm1, %v3163_v1  ;;  %5732 = vmatmul.mubr.msk.f32.gmra.mxu0 %vm284_vm1, %v3593_v9 }
 0x12a   : > { %v6794_v25 = vadd.f32 %v1333_v27, %v940_v21  ;;  %v955_v11 = vadd.f32 %v5359_v59, %v6553_v36  ;;  %5678 = vmatprep.mubr.msk.f32.mxu1 %vm284_vm1, %v3164_v17  ;;  %5734 = vmatprep.mubr.msk.f32.mxu0 %vm284_vm1, %v3594_v18  ;;  %v3169_v27 = vld [vmem:[%s5842_s26 + $0xcd] sm:$0xff]  ;;  %v3170_v21 = vld [vmem:[%s5842_s26 + $0xd5] sm:$0xff] }
 0x12b   : > { %v949_v37 = vpop.f32.mrf.mxu1  ;;  %v1343_v33 = vpop.f32.mrf.mxu0  ;;  %v3599_v17 = vld [vmem:[%s5842_s26 + $0xce] sm:$0xff]  ;;  %v3600_v59 = vld [vmem:[%s5842_s26 + $0xd6] sm:$0xff] }
 0x12c   : > { %v6803_v15 = vadd.f32 %v5415_v30, %v955_v11  ;;  %v950_v55 = vadd.f32 %v949_v37, %v6562_v39 }
 0x12d   : > { %v5362_v47 = vpop.f32.mrf.mxu1  ;;  %v5418_v36 = vpop.f32.mrf.mxu0  ;;  %5679 = vmatmul.mubr.msk.f32.gmra.mxu1 %vm284_vm1, %v3165_v12  ;;  %5735 = vmatmul.mubr.msk.f32.gmra.mxu0 %vm284_vm1, %v3595_v34 }
 0x12e   : > { %v6808_v3 = vadd.f32 %v1343_v33, %v950_v55  ;;  %v965_v52 = vadd.f32 %v5362_v47, %v6567_v42  ;;  %5681 = vmatprep.mubr.msk.f32.mxu1 %vm284_vm1, %v3166_v43  ;;  %5737 = vmatprep.mubr.msk.f32.mxu0 %vm284_vm1, %v3596_v38  ;;  %v3171_v33 = vld [vmem:[%s5842_s26 + $0xdd] sm:$0xff]  ;;  %v3172_v55 = vld [vmem:[%s5842_s26 + $0xe5] sm:$0xff] }
 0x12f   : > { %v959_v62 = vpop.f32.mrf.mxu1  ;;  %v1353_v39 = vpop.f32.mrf.mxu0  ;;  %v3601_v43 = vld [vmem:[%s5842_s26 + $0xde] sm:$0xff]  ;;  %v3602_v47 = vld [vmem:[%s5842_s26 + $0xe6] sm:$0xff] }
 0x130   : > { %v6817_v23 = vadd.f32 %v5418_v36, %v965_v52  ;;  %v960_v5 = vadd.f32 %v959_v62, %v6576_v45 }
 0x131   : > { %v5365_v1 = vpop.f32.mrf.mxu1  ;;  %v5421_v42 = vpop.f32.mrf.mxu0  ;;  %5682 = vmatmul.mubr.msk.f32.gmra.mxu1 %vm284_vm1, %v3167_v20  ;;  %5738 = vmatmul.mubr.msk.f32.gmra.mxu0 %vm284_vm1, %v3597_v60 }
 0x132   : > { %v6822_v9 = vadd.f32 %v1353_v39, %v960_v5  ;;  %v975_v13 = vadd.f32 %v5365_v1, %v6581_v53  ;;  %5684 = vmatprep.mubr.msk.f32.mxu1 %vm284_vm1, %v3168_v2  ;;  %5740 = vmatprep.mubr.msk.f32.mxu0 %vm284_vm1, %v3598_v44  ;;  %v3173_v39 = vld [vmem:[%s5842_s26 + $0xed] sm:$0xff]  ;;  %v3174_v5 = vld [vmem:[%s5842_s26 + $0xf5] sm:$0xff] }
 0x133   : > { %v969_v18 = vpop.f32.mrf.mxu1  ;;  %v1363_v45 = vpop.f32.mrf.mxu0  ;;  %v3603_v2 = vld [vmem:[%s5842_s26 + $0xee] sm:$0xff]  ;;  %v3604_v1 = vld [vmem:[%s5842_s26 + $0xf6] sm:$0xff] }
 0x134   : > { %v6831_v30 = vadd.f32 %v5421_v42, %v975_v13  ;;  %v970_v11 = vadd.f32 %v969_v18, %v6590_v57 }
 0x135   : > { %v5368_v12 = vpop.f32.mrf.mxu1  ;;  %v5424_v53 = vpop.f32.mrf.mxu0  ;;  %5685 = vmatmul.mubr.msk.f32.gmra.mxu1 %vm284_vm1, %v3169_v27  ;;  %5741 = vmatmul.mubr.msk.f32.gmra.mxu0 %vm284_vm1, %v3599_v17 }
 0x136   : > { %v6836_v34 = vadd.f32 %v1363_v45, %v970_v11  ;;  %v985_v37 = vadd.f32 %v5368_v12, %v6595_v50  ;;  %5687 = vmatprep.mubr.msk.f32.mxu1 %vm284_vm1, %v3170_v21  ;;  %5743 = vmatprep.mubr.msk.f32.mxu0 %vm284_vm1, %v3600_v59  ;;  %v3175_v45 = vld [vmem:[%s5842_s26 + $0xfd] sm:$0xff]  ;;  %v3176_v11 = vld [vmem:[%s5842_s26 + $0x105] sm:$0xff] }
 0x137   : > { %v979_v38 = vpop.f32.mrf.mxu1  ;;  %v1373_v57 = vpop.f32.mrf.mxu0  ;;  %v3605_v21 = vld [vmem:[%s5842_s26 + $0xfe] sm:$0xff]  ;;  %v3606_v12 = vld [vmem:[%s5842_s26 + $0x106] sm:$0xff] }
 0x138   : > { %v6845_v36 = vadd.f32 %v5424_v53, %v985_v37  ;;  %v980_v52 = vadd.f32 %v979_v38, %v6604_v48 }
 0x139   : > { %v5371_v20 = vpop.f32.mrf.mxu1  ;;  %v5427_v50 = vpop.f32.mrf.mxu0  ;;  %5688 = vmatmul.mubr.msk.f32.gmra.mxu1 %vm284_vm1, %v3171_v33  ;;  %5744 = vmatmul.mubr.msk.f32.gmra.mxu0 %vm284_vm1, %v3601_v43 }
 0x13a   : > { %v6850_v60 = vadd.f32 %v1373_v57, %v980_v52  ;;  %v995_v62 = vadd.f32 %v5371_v20, %v6609_v56  ;;  %5690 = vmatprep.mubr.msk.f32.mxu1 %vm284_vm1, %v3172_v55  ;;  %5746 = vmatprep.mubr.msk.f32.mxu0 %vm284_vm1, %v3602_v47  ;;  %v3177_v57 = vld [vmem:[%s5842_s26 + $0x10d] sm:$0xff]  ;;  %v3178_v52 = vld [vmem:[%s5842_s26 + $0x115] sm:$0xff] }
 0x13b   : > { %v989_v44 = vpop.f32.mrf.mxu1  ;;  %v1383_v48 = vpop.f32.mrf.mxu0  ;;  %v3607_v55 = vld [vmem:[%s5842_s26 + $0x10e] sm:$0xff]  ;;  %v3608_v20 = vld [vmem:[%s5842_s26 + $0x116] sm:$0xff] }
 0x13c   : > { %v6859_v42 = vadd.f32 %v5427_v50, %v995_v62  ;;  %v990_v13 = vadd.f32 %v989_v44, %v6618_v46 }
 0x13d   : > { %v5432_v27 = vpop.f32.mrf.mxu1  ;;  %v5488_v56 = vpop.f32.mrf.mxu0  ;;  %5691 = vmatmul.mubr.msk.f32.gmra.mxu1 %vm284_vm1, %v3173_v39  ;;  %5747 = vmatmul.mubr.msk.f32.gmra.mxu0 %vm284_vm1, %v3603_v2 }
 0x13e   : > { %v6864_v17 = vadd.f32 %v1383_v48, %v990_v13  ;;  %v1823_v18 = vadd.f32 %v5432_v27, %v6628_v10  ;;  %5693 = vmatprep.mubr.msk.f32.mxu1 %vm284_vm1, %v3174_v5  ;;  %5749 = vmatprep.mubr.msk.f32.mxu0 %vm284_vm1, %v3604_v1  ;;  %v3179_v48 = vld [vmem:[%s5842_s26 + $0x11d] sm:$0xff]  ;;  %v3180_v13 = vld [vmem:[%s5842_s26 + $0x125] sm:$0xff] }
 0x13f   : > { %v1643_v59 = vpop.f32.mrf.mxu1  ;;  %v2073_v46 = vpop.f32.mrf.mxu0  ;;  %v3609_v5 = vld [vmem:[%s5842_s26 + $0x11e] sm:$0xff]  ;;  %v3610_v27 = vld [vmem:[%s5842_s26 + $0x126] sm:$0xff] }
 0x140   : > { %v6873_v53 = vadd.f32 %v5488_v56, %v1823_v18  ;;  %v1822_v37 = vadd.f32 %v1643_v59, %v6633_v6 }
 0x141   : > { %v5435_v33 = vpop.f32.mrf.mxu1  ;;  %v5491_v10 = vpop.f32.mrf.mxu0  ;;  %5694 = vmatmul.mubr.msk.f32.gmra.mxu1 %vm284_vm1, %v3175_v45  ;;  %5750 = vmatmul.mubr.msk.f32.gmra.mxu0 %vm284_vm1, %v3605_v21 }
 0x142   : > { %v6878_v43 = vadd.f32 %v2073_v46, %v1822_v37  ;;  %v1825_v38 = vadd.f32 %v5435_v33, %v6640_v28  ;;  %5696 = vmatprep.mubr.msk.f32.mxu1 %vm284_vm1, %v3176_v11  ;;  %5752 = vmatprep.mubr.msk.f32.mxu0 %vm284_vm1, %v3606_v12  ;;  %v3181_v46 = vld [vmem:[%s5842_s26 + $0x12d] sm:$0xff]  ;;  %v3182_v37 = vld [vmem:[%s5842_s26 + $0x135] sm:$0xff] }
 0x143   : > { %v1653_v47 = vpop.f32.mrf.mxu1  ;;  %v2083_v6 = vpop.f32.mrf.mxu0  ;;  %v3611_v11 = vld [vmem:[%s5842_s26 + $0x12e] sm:$0xff]  ;;  %v3612_v33 = vld [vmem:[%s5842_s26 + $0x136] sm:$0xff] }
 0x144   : > { %v6887_v50 = vadd.f32 %v5491_v10, %v1825_v38  ;;  %v1824_v62 = vadd.f32 %v1653_v47, %v6645_v14 }
 0x145   : > { %v5438_v39 = vpop.f32.mrf.mxu1  ;;  %v5494_v28 = vpop.f32.mrf.mxu0  ;;  %5697 = vmatmul.mubr.msk.f32.gmra.mxu1 %vm284_vm1, %v3177_v57  ;;  %5753 = vmatmul.mubr.msk.f32.gmra.mxu0 %vm284_vm1, %v3607_v55 }
 0x146   : > { %v6892_v2 = vadd.f32 %v2083_v6, %v1824_v62  ;;  %v1827_v44 = vadd.f32 %v5438_v39, %v6652_v61  ;;  %5699 = vmatprep.mubr.msk.f32.mxu1 %vm284_vm1, %v3178_v52  ;;  %5755 = vmatprep.mubr.msk.f32.mxu0 %vm284_vm1, %v3608_v20  ;;  %v3183_v6 = vld [vmem:[%s5842_s26 + $0x13d] sm:$0xff] }
 0x147   : > { %v1663_v1 = vpop.f32.mrf.mxu1  ;;  %v2093_v14 = vpop.f32.mrf.mxu0  ;;  %v3613_v52 = vld [vmem:[%s5842_s26 + $0x13e] sm:$0xff]  ;;  %s5767_s26 = smul.u32 288, %s7394_s16 }
 0x148   : > { %v6901_v56 = vadd.f32 %v5494_v28, %v1827_v44  ;;  %v1826_v18 = vadd.f32 %v1663_v1, %v6657_v22 }
 0x149   : > { %v5441_v45 = vpop.f32.mrf.mxu1  ;;  %v5497_v61 = vpop.f32.mrf.mxu0  ;;  %5700 = vmatmul.mubr.msk.f32.gmra.mxu1 %vm284_vm1, %v3179_v48  ;;  %5756 = vmatmul.mubr.msk.f32.gmra.mxu0 %vm284_vm1, %v3609_v5  ;;  %s7147_s20 = scalar_lea.vmem %s7391_s3, %s5767_s26 }
 0x14a   : > { %v6906_v21 = vadd.f32 %v2093_v14, %v1826_v18  ;;  %v1829_v59 = vadd.f32 %v5441_v45, %v6664_v4  ;;  %5702 = vmatprep.mubr.msk.f32.mxu1 %vm284_vm1, %v3180_v13  ;;  %5758 = vmatprep.mubr.msk.f32.mxu0 %vm284_vm1, %v3610_v27 }
 0x14b   : > { %v1673_v12 = vpop.f32.mrf.mxu1  ;;  %v2103_v22 = vpop.f32.mrf.mxu0 }
 0x14c   : > { %v6915_v10 = vadd.f32 %v5497_v61, %v1829_v59  ;;  %v1828_v38 = vadd.f32 %v1673_v12, %v6669_v29 }
 0x14d   : > { %v5444_v57 = vpop.f32.mrf.mxu1  ;;  %v5500_v55 = vpop.f32.mrf.mxu0  ;;  %5703 = vmatmul.mubr.msk.f32.gmra.mxu1 %vm284_vm1, %v3181_v46  ;;  %5759 = vmatmul.mubr.msk.f32.gmra.mxu0 %vm284_vm1, %v3611_v11 }
 0x14e   : > { %v6920_v4 = vadd.f32 %v2103_v22, %v1828_v38  ;;  %v1831_v47 = vadd.f32 %v5444_v57, %v6677_v24  ;;  %5705 = vmatprep.mubr.msk.f32.mxu1 %vm284_vm1, %v3182_v37  ;;  %5761 = vmatprep.mubr.msk.f32.mxu0 %vm284_vm1, %v3612_v33 }
 0x14f   : > { %v1683_v20 = vpop.f32.mrf.mxu1  ;;  %v2113_v62 = vpop.f32.mrf.mxu0 }
 0x150   : > { %v6927_v39 = vadd.f32 %v5500_v55, %v1831_v47  ;;  %v1830_v29 = vadd.f32 %v1683_v20, %v6682_v35 }
 0x151   : > { %v5447_v28 = vpop.f32.mrf.mxu1  ;;  %v5503_v44 = vpop.f32.mrf.mxu0  ;;  %5706 = vmatmul.mubr.msk.f32.gmra.mxu1 %vm284_vm1, %v3183_v6  ;;  %5762 = vmatmul.mubr.msk.f32.gmra.mxu0 %vm284_vm1, %v3613_v52 }
 0x152   : > { %v6932_v48 = vadd.f32 %v2113_v62, %v1830_v29  ;;  %v1833_v24 = vadd.f32 %v5447_v28, %v6691_v19 }
 0x153   : > { %v1693_v5 = vpop.f32.mrf.mxu1  ;;  %v2123_v1 = vpop.f32.mrf.mxu0 }
 0x154   : > { %v6935_v14 = vadd.f32 %v5503_v44, %v1833_v24  ;;  %v1832_v13 = vadd.f32 %v1693_v5, %v6696_v58 }
 0x155   : > { %v5450_v27 = vpop.f32.mrf.mxu1  ;;  %v5506_v18 = vpop.f32.mrf.mxu0 }
 0x156   : > { %v6938_v45 = vadd.f32 %v2123_v1, %v1832_v13  ;;  %v1835_v35 = vadd.f32 %v5450_v27, %v6705_v8 }
 0x157   : > { %v1703_v61 = vpop.f32.mrf.mxu1  ;;  %v2133_v59 = vpop.f32.mrf.mxu0 }
 0x158   : > { %v6941_v46 = vadd.f32 %v5506_v18, %v1835_v35  ;;  %v1834_v11 = vadd.f32 %v1703_v61, %v6710_v16 }
 0x159   : > { %v5453_v12 = vpop.f32.mrf.mxu1  ;;  %v5509_v19 = vpop.f32.mrf.mxu0 }
 0x15a   : > { %v6944_v22 = vadd.f32 %v2133_v59, %v1834_v11  ;;  %v1837_v37 = vadd.f32 %v5453_v12, %v6719_v31 }
 0x15b   : > { %v1713_v33 = vpop.f32.mrf.mxu1  ;;  %v2143_v58 = vpop.f32.mrf.mxu0 }
 0x15c   : > { %v6947_v38 = vadd.f32 %v5509_v19, %v1837_v37  ;;  %v1836_v57 = vadd.f32 %v1713_v33, %v6724_v40 }
 0x15d   : > { %v5456_v55 = vpop.f32.mrf.mxu1  ;;  %v5512_v8 = vpop.f32.mrf.mxu0 }
 0x15e   : > { %v6950_v47 = vadd.f32 %v2143_v58, %v1836_v57  ;;  %v1839_v6 = vadd.f32 %v5456_v55, %v6733_v41 }
 0x15f   : > { %v1723_v52 = vpop.f32.mrf.mxu1  ;;  %v2153_v16 = vpop.f32.mrf.mxu0 }
 0x160   : > { %v6953_v20 = vadd.f32 %v5512_v8, %v1839_v6  ;;  %v1838_v62 = vadd.f32 %v1723_v52, %v6738_v0 }
 0x161   : > { %v5459_v29 = vpop.f32.mrf.mxu1  ;;  %v5515_v31 = vpop.f32.mrf.mxu0 }
 0x162   : > { %v6956_v28 = vadd.f32 %v2153_v16, %v1838_v62  ;;  %v1841_v44 = vadd.f32 %v5459_v29, %v6747_v51 }
 0x163   : > { %v1733_v24 = vpop.f32.mrf.mxu1  ;;  %v2163_v40 = vpop.f32.mrf.mxu0 }
 0x164   : > { %v6959_v5 = vadd.f32 %v5515_v31, %v1841_v44  ;;  %v1840_v1 = vadd.f32 %v1733_v24, %v6752_v32 }
 0x165   : > { %v5462_v13 = vpop.f32.mrf.mxu1  ;;  %v5518_v41 = vpop.f32.mrf.mxu0 }
 0x166   : > { %v6962_v27 = vadd.f32 %v2163_v40, %v1840_v1  ;;  %v1843_v18 = vadd.f32 %v5462_v13, %v6761_v63 }
 0x167   : > { %v1743_v35 = vpop.f32.mrf.mxu1  ;;  %v2173_v0 = vpop.f32.mrf.mxu0 }
 0x168   : > { %v6965_v61 = vadd.f32 %v5518_v41, %v1843_v18  ;;  %v1842_v59 = vadd.f32 %v1743_v35, %v6766_v49 }
 0x169   : > { %v5465_v11 = vpop.f32.mrf.mxu1  ;;  %v5521_v51 = vpop.f32.mrf.mxu0 }
 0x16a   : > { %v6968_v12 = vadd.f32 %v2173_v0, %v1842_v59  ;;  %v1845_v19 = vadd.f32 %v5465_v11, %v6775_v54 }
 0x16b   : > { %v1753_v37 = vpop.f32.mrf.mxu1  ;;  %v2183_v32 = vpop.f32.mrf.mxu0 }
 0x16c   : > { %v6971_v33 = vadd.f32 %v5521_v51, %v1845_v19  ;;  %v1844_v58 = vadd.f32 %v1753_v37, %v6780_v26 }
 0x16d   : > { %v5468_v57 = vpop.f32.mrf.mxu1  ;;  %v5524_v63 = vpop.f32.mrf.mxu0 }
 0x16e   : > { %v6974_v55 = vadd.f32 %v2183_v32, %v1844_v58  ;;  %v1847_v8 = vadd.f32 %v5468_v57, %v6789_v7 }
 0x16f   : > { %v1763_v6 = vpop.f32.mrf.mxu1  ;;  %v2193_v49 = vpop.f32.mrf.mxu0 }
 0x170   : > { %v6977_v52 = vadd.f32 %v5524_v63, %v1847_v8  ;;  %v1846_v16 = vadd.f32 %v1763_v6, %v6794_v25 }
 0x171   : > { %v5471_v62 = vpop.f32.mrf.mxu1  ;;  %v5527_v54 = vpop.f32.mrf.mxu0 }
 0x172   : > { %v6980_v29 = vadd.f32 %v2193_v49, %v1846_v16  ;;  %v1849_v31 = vadd.f32 %v5471_v62, %v6803_v15 }
 0x173   : > { %v1773_v44 = vpop.f32.mrf.mxu1  ;;  %v2203_v26 = vpop.f32.mrf.mxu0 }
 0x174   : > { %v6983_v24 = vadd.f32 %v5527_v54, %v1849_v31  ;;  %v1848_v40 = vadd.f32 %v1773_v44, %v6808_v3 }
 0x175   : > { %v5474_v1 = vpop.f32.mrf.mxu1  ;;  %v5530_v7 = vpop.f32.mrf.mxu0 }
 0x176   : > { %v6986_v13 = vadd.f32 %v2203_v26, %v1848_v40  ;;  %v1851_v41 = vadd.f32 %v5474_v1, %v6817_v23 }
 0x177   : > { %v1783_v18 = vpop.f32.mrf.mxu1  ;;  %v2213_v25 = vpop.f32.mrf.mxu0 }
 0x178   : > { %v6989_v35 = vadd.f32 %v5530_v7, %v1851_v41  ;;  %v1850_v0 = vadd.f32 %v1783_v18, %v6822_v9 }
 0x179   : > { %v5477_v59 = vpop.f32.mrf.mxu1  ;;  %v5533_v15 = vpop.f32.mrf.mxu0 }
 0x17a   : > { %v6992_v11 = vadd.f32 %v2213_v25, %v1850_v0  ;;  %v1853_v51 = vadd.f32 %v5477_v59, %v6831_v30 }
 0x17b   : > { %v1793_v19 = vpop.f32.mrf.mxu1  ;;  %v2223_v3 = vpop.f32.mrf.mxu0 }
 0x17c   : > { %v6995_v37 = vadd.f32 %v5533_v15, %v1853_v51  ;;  %v1852_v32 = vadd.f32 %v1793_v19, %v6836_v34 }
 0x17d   : > { %v5480_v58 = vpop.f32.mrf.mxu1  ;;  %v5536_v23 = vpop.f32.mrf.mxu0 }
 0x17e   : > { %v6998_v57 = vadd.f32 %v2223_v3, %v1852_v32  ;;  %v1855_v63 = vadd.f32 %v5480_v58, %v6845_v36 }
 0x17f   : > { %v1803_v8 = vpop.f32.mrf.mxu1  ;;  %v2233_v9 = vpop.f32.mrf.mxu0 }
 0x180   : > { %v7001_v6 = vadd.f32 %v5536_v23, %v1855_v63  ;;  %v1854_v49 = vadd.f32 %v1803_v8, %v6850_v60 }
 0x181   : > { %v5483_v16 = vpop.f32.mrf.mxu1  ;;  %v5539_v30 = vpop.f32.mrf.mxu0 }
 0x182   : > { %v7004_v62 = vadd.f32 %v2233_v9, %v1854_v49  ;;  %v1857_v54 = vadd.f32 %v5483_v16, %v6859_v42 }
 0x183   : > { %v1813_v31 = vpop.f32.mrf.mxu1  ;;  %v2243_v34 = vpop.f32.mrf.mxu0 }
 0x184   : > { %v7007_v44 = vadd.f32 %v5539_v30, %v1857_v54  ;;  %v1856_v26 = vadd.f32 %v1813_v31, %v6864_v17 }
 0x185   : > { %v5544_v40 = vpop.f32.mrf.mxu1  ;;  %v5600_v36 = vpop.f32.mrf.mxu0 }
 0x186   : > { %v7010_v1 = vadd.f32 %v2243_v34, %v1856_v26  ;;  %v2683_v7 = vadd.f32 %v5544_v40, %v6873_v53 }
 0x187   : > { %v2503_v41 = vpop.f32.mrf.mxu1  ;;  %v2933_v60 = vpop.f32.mrf.mxu0 }
 0x188   : > { %v7013_v18 = vadd.f32 %v5600_v36, %v2683_v7  ;;  %v2682_v25 = vadd.f32 %v2503_v41, %v6878_v43 }
 0x189   : > { %v5547_v0 = vpop.f32.mrf.mxu1  ;;  %v5603_v42 = vpop.f32.mrf.mxu0 }
 0x18a   : > { %v7016_v59 = vadd.f32 %v2933_v60, %v2682_v25  ;;  %v2685_v15 = vadd.f32 %v5547_v0, %v6887_v50 }
 0x18b   : > { %v2513_v51 = vpop.f32.mrf.mxu1  ;;  %v2943_v17 = vpop.f32.mrf.mxu0 }
 0x18c   : > { %v7019_v19 = vadd.f32 %v5603_v42, %v2685_v15  ;;  %v2684_v3 = vadd.f32 %v2513_v51, %v6892_v2 }
 0x18d   : > { %v5550_v32 = vpop.f32.mrf.mxu1  ;;  %v5606_v53 = vpop.f32.mrf.mxu0 }
 0x18e   : > { %v7022_v58 = vadd.f32 %v2943_v17, %v2684_v3  ;;  %v2687_v23 = vadd.f32 %v5550_v32, %v6901_v56 }
 0x18f   : > { %v2523_v63 = vpop.f32.mrf.mxu1  ;;  %v2953_v43 = vpop.f32.mrf.mxu0 }
 0x190   : > { %v7025_v8 = vadd.f32 %v5606_v53, %v2687_v23  ;;  %v2686_v9 = vadd.f32 %v2523_v63, %v6906_v21 }
 0x191   : > { %v5553_v49 = vpop.f32.mrf.mxu1  ;;  %v5609_v50 = vpop.f32.mrf.mxu0 }
 0x192   : > { %v7028_v16 = vadd.f32 %v2953_v43, %v2686_v9  ;;  %v2689_v30 = vadd.f32 %v5553_v49, %v6915_v10 }
 0x193   : > { %v2533_v54 = vpop.f32.mrf.mxu1  ;;  %v2963_v2 = vpop.f32.mrf.mxu0 }
 0x194   : > { %v7031_v31 = vadd.f32 %v5609_v50, %v2689_v30  ;;  %v2688_v34 = vadd.f32 %v2533_v54, %v6920_v4 }
 0x195   : > { %v5556_v26 = vpop.f32.mrf.mxu1  ;;  %v5612_v56 = vpop.f32.mrf.mxu0 }
 0x196   : > { %v7034_v40 = vadd.f32 %v2963_v2, %v2688_v34  ;;  %v2691_v36 = vadd.f32 %v5556_v26, %v6927_v39 }
 0x197   : > { %v2543_v7 = vpop.f32.mrf.mxu1  ;;  %v2973_v21 = vpop.f32.mrf.mxu0 }
 0x198   : > { %v7037_v41 = vadd.f32 %v5612_v56, %v2691_v36  ;;  %v2690_v60 = vadd.f32 %v2543_v7, %v6932_v48 }
 0x199   : > { %v5559_v25 = vpop.f32.mrf.mxu1  ;;  %v5615_v10 = vpop.f32.mrf.mxu0 }
 0x19a   : > { %v7040_v0 = vadd.f32 %v2973_v21, %v2690_v60  ;;  %v2693_v42 = vadd.f32 %v5559_v25, %v6935_v14 }
 0x19b   : > { %v2553_v15 = vpop.f32.mrf.mxu1  ;;  %v2983_v4 = vpop.f32.mrf.mxu0 }
 0x19c   : > { %v7043_v51 = vadd.f32 %v5615_v10, %v2693_v42  ;;  %v2692_v17 = vadd.f32 %v2553_v15, %v6938_v45 }
 0x19d   : > { %v5562_v3 = vpop.f32.mrf.mxu1  ;;  %v5618_v39 = vpop.f32.mrf.mxu0 }
 0x19e   : > { %v7046_v32 = vadd.f32 %v2983_v4, %v2692_v17  ;;  %v2695_v53 = vadd.f32 %v5562_v3, %v6941_v46 }
 0x19f   : > { %v2563_v23 = vpop.f32.mrf.mxu1  ;;  %v2993_v48 = vpop.f32.mrf.mxu0 }
 0x1a0   : > { %v7049_v63 = vadd.f32 %v5618_v39, %v2695_v53  ;;  %v2694_v43 = vadd.f32 %v2563_v23, %v6944_v22  ;;  %v7073_v23 = vpop.permute.xlu1 %4093 }
 0x1a1   : > { %v5565_v9 = vpop.f32.mrf.mxu1  ;;  %v5621_v14 = vpop.f32.mrf.mxu0 }
 0x1a2   : > { %v7052_v49 = vadd.f32 %v2993_v48, %v2694_v43  ;;  %v2697_v50 = vadd.f32 %v5565_v9, %v6947_v38 }
 0x1a3   : > { %v2573_v30 = vpop.f32.mrf.mxu1  ;;  %v3003_v45 = vpop.f32.mrf.mxu0 }
 0x1a4   : > { %v7055_v54 = vadd.f32 %v5621_v14, %v2697_v50  ;;  %v2696_v2 = vadd.f32 %v2573_v30, %v6950_v47  ;;  %v7078_v14 = vpop.permute.xlu0 %4083 }
 0x1a5   : > { %v5568_v34 = vpop.f32.mrf.mxu1  ;;  %v5624_v46 = vpop.f32.mrf.mxu0 }
 0x1a6   : > { %v7058_v26 = vadd.f32 %v3003_v45, %v2696_v2  ;;  %v2699_v56 = vadd.f32 %v5568_v34, %v6953_v20 }
 0x1a7   : > { %v2583_v36 = vpop.f32.mrf.mxu1  ;;  %v3013_v22 = vpop.f32.mrf.mxu0 }
 0x1a8   : > { %v7061_v7 = vadd.f32 %v5624_v46, %v2699_v56  ;;  %v2698_v21 = vadd.f32 %v2583_v36, %v6956_v28  ;;  %v7086_v56 = vpop.permute.xlu1 %4098 }
 0x1a9   : > { %v5571_v60 = vpop.f32.mrf.mxu1  ;;  %v5627_v38 = vpop.f32.mrf.mxu0 }
 0x1aa   : > { %v7064_v25 = vadd.f32 %v3013_v22, %v2698_v21  ;;  %v2701_v10 = vadd.f32 %v5571_v60, %v6959_v5  ;;  %v7091_v60 = vpop.permute.xlu0 %4088 }
 0x1ab   : > { %v2593_v42 = vpop.f32.mrf.mxu1  ;;  %v3023_v47 = vpop.f32.mrf.mxu0 }
 0x1ac   : > { %v7067_v15 = vadd.f32 %v5627_v38, %v2701_v10  ;;  %v2700_v4 = vadd.f32 %v2593_v42, %v6962_v27 }
 0x1ad   : > { %v5574_v17 = vpop.f32.mrf.mxu1  ;;  %v5630_v20 = vpop.f32.mrf.mxu0 }
 0x1ae   : > { %v7070_v3 = vadd.f32 %v3023_v47, %v2700_v4  ;;  %v2703_v39 = vadd.f32 %v5574_v17, %v6965_v61 }
 0x1af   : > { %v2603_v53 = vpop.f32.mrf.mxu1  ;;  %v3033_v28 = vpop.f32.mrf.mxu0 }
 0x1b0   : > { %v7075_v48 = vadd.f32 %v5630_v20, %v2703_v39  ;;  %v2702_v5 = vadd.f32 %v2603_v53, %v6968_v12  ;;  %v7099_v20 = vpop.permute.xlu1 %4108 }
 0x1b1   : > { %v5577_v43 = vpop.f32.mrf.mxu1  ;;  %v5633_v9 = vpop.f32.mrf.mxu0 }
 0x1b2   : > { %v7080_v50 = vadd.f32 %v3033_v28, %v2702_v5  ;;  %v2705_v27 = vadd.f32 %v5577_v43, %v6971_v33  ;;  %v7104_v5 = vpop.permute.xlu0 %4103 }
 0x1b3   : > { %v2613_v30 = vpop.f32.mrf.mxu1  ;;  %v3043_v45 = vpop.f32.mrf.mxu0 }
 0x1b4   : > { %v7083_v2 = vadd.f32 %v5633_v9, %v2705_v27  ;;  %v2704_v61 = vadd.f32 %v2613_v30, %v6974_v55 }
 0x1b5   : > { %v5580_v34 = vpop.f32.mrf.mxu1  ;;  %v5636_v46 = vpop.f32.mrf.mxu0 }
 0x1b6   : > { %v7088_v36 = vadd.f32 %v3043_v45, %v2704_v61  ;;  %v2707_v12 = vadd.f32 %v5580_v34, %v6977_v52  ;;  %v7112_v34 = vpop.permute.xlu1 %4118 }
 0x1b7   : > { %v2623_v22 = vpop.f32.mrf.mxu1  ;;  %v3053_v21 = vpop.f32.mrf.mxu0 }
 0x1b8   : > { %v7093_v38 = vadd.f32 %v5636_v46, %v2707_v12  ;;  %v2706_v33 = vadd.f32 %v2623_v22, %v6980_v29 }
 0x1b9   : > { %v5583_v10 = vpop.f32.mrf.mxu1  ;;  %v5639_v42 = vpop.f32.mrf.mxu0 }
 0x1ba   : > { %v7096_v47 = vadd.f32 %v3053_v21, %v2706_v33  ;;  %v2709_v55 = vadd.f32 %v5583_v10, %v6983_v24  ;;  %v7117_v21 = vpop.permute.xlu0 %4113 }
 0x1bb   : > { %v2633_v4 = vpop.f32.mrf.mxu1  ;;  %v3063_v17 = vpop.f32.mrf.mxu0 }
 0x1bc   : > { %v7101_v39 = vadd.f32 %v5639_v42, %v2709_v55  ;;  %v2708_v52 = vadd.f32 %v2633_v4, %v6986_v13 }
 0x1bd   : > { %v5586_v53 = vpop.f32.mrf.mxu1  ;;  %v5642_v28 = vpop.f32.mrf.mxu0 }
 0x1be   : > { %v7106_v43 = vadd.f32 %v3063_v17, %v2708_v52  ;;  %v2711_v29 = vadd.f32 %v5586_v53, %v6989_v35  ;;  %v7125_v52 = vpop.permute.xlu1 %4128 }
 0x1bf   : > { %v2643_v9 = vpop.f32.mrf.mxu1  ;;  %v3073_v27 = vpop.f32.mrf.mxu0 }
 0x1c0   : > { %v7109_v30 = vadd.f32 %v5642_v28, %v2711_v29  ;;  %v2710_v24 = vadd.f32 %v2643_v9, %v6992_v11  ;;  %v7130_v9 = vpop.permute.xlu0 %4123 }
 0x1c1   : > { %v5589_v45 = vpop.f32.mrf.mxu1  ;;  %v5645_v61 = vpop.f32.mrf.mxu0 }
 0x1c2   : > { %v7114_v46 = vadd.f32 %v3073_v27, %v2710_v24  ;;  %v2713_v13 = vadd.f32 %v5589_v45, %v6995_v37 }
 0x1c3   : > { %v2653_v12 = vpop.f32.mrf.mxu1  ;;  %v3083_v22 = vpop.f32.mrf.mxu0 }
 0x1c4   : > { %v7119_v33 = vadd.f32 %v5645_v61, %v2713_v13  ;;  %v2712_v35 = vadd.f32 %v2653_v12, %v6998_v57 }
 0x1c5   : > { %v5592_v10 = vpop.f32.mrf.mxu1  ;;  %v5648_v42 = vpop.f32.mrf.mxu0 }
 0x1c6   : > { %v7122_v11 = vadd.f32 %v3083_v22, %v2712_v35  ;;  %v2715_v55 = vadd.f32 %v5592_v10, %v7001_v6  ;;  %v7139_v22 = vpop.permute.xlu1 %4138 }
 0x1c7   : > { %v2663_v4 = vpop.f32.mrf.mxu1  ;;  %v3093_v17 = vpop.f32.mrf.mxu0 }
 0x1c8   : > { %v7127_v37 = vadd.f32 %v5648_v42, %v2715_v55  ;;  %v2714_v53 = vadd.f32 %v2663_v4, %v7004_v62  ;;  %v7149_v42 = vpop.permute.xlu0 %4133 }
 0x1c9   : > { %v5595_v28 = vpop.f32.mrf.mxu1  ;;  %v5651_v29 = vpop.f32.mrf.mxu0 }
 0x1ca   : > { %v7132_v57 = vadd.f32 %v3093_v17, %v2714_v53  ;;  %v2717_v27 = vadd.f32 %v5595_v28, %v7007_v44 }
 0x1cb   : > { %v2673_v24 = vpop.f32.mrf.mxu1  ;;  %v3103_v45 = vpop.f32.mrf.mxu0 }
 0x1cc   : > { %v7136_v6 = vadd.f32 %v5651_v29, %v2717_v27  ;;  %v2716_v61 = vadd.f32 %v2673_v24, %v7010_v1  ;;  %v7156_v24 = vpop.permute.xlu1 %4148 }
 0x1cd   : > { %v5656_v13 = vpop.f32.mrf.mxu1  ;;  %v5712_v12 = vpop.f32.mrf.mxu0 }
 0x1ce   : > { %v7141_v62 = vadd.f32 %v3103_v45, %v2716_v61  ;;  %v3543_v35 = vadd.f32 %v5656_v13, %v7013_v18 }
 0x1cf   : > { %v3363_v44 = vpop.f32.mrf.mxu1  ;;  %v3793_v10 = vpop.f32.mrf.mxu0 }
 0x1d0   : > { %v3973_v1 = vadd.f32 %v5712_v12, %v3543_v35  ;;  %v3542_v55 = vadd.f32 %v3363_v44, %v7016_v59 }
 0x1d1   : > { %v5659_v4 = vpop.f32.mrf.mxu1  ;;  %v5715_v17 = vpop.f32.mrf.mxu0 }
 0x1d2   : > { %4010 = vst.msk [vmem:[%s7147_s20 + $0x8] sm:$0xff] %vm4008_vm2, %v3973_v1  ;;  %v4262_v18 = vmul.f32 %v7091_v60, %v3973_v1  ;;  %v3972_v53 = vadd.f32 %v3793_v10, %v3542_v55  ;;  %v3545_v28 = vadd.f32 %v5659_v4, %v7019_v19  ;;  %v7162_v60 = vpop.permute.xlu0 %4143 }
 0x1d3   : > { %v3373_v29 = vpop.f32.mrf.mxu1  ;;  %v3803_v27 = vpop.f32.mrf.mxu0 }
 0x1d4   : > { %v4377_v45 = vmul.f32 %v4262_v18, %v4262_v18  ;;  %4009 = vst.msk [vmem:[%s7147_s20] sm:$0xff] %vm4008_vm2, %v3972_v53  ;;  %v4261_v61 = vmul.f32 %v7078_v14, %v3972_v53  ;;  %v3975_v59 = vadd.f32 %v5715_v17, %v3545_v28  ;;  %v3544_v13 = vadd.f32 %v3373_v29, %v7022_v58 }
 0x1d5   : > { %v5662_v12 = vpop.f32.mrf.mxu1  ;;  %v5718_v35 = vpop.f32.mrf.mxu0  ;;  %v4298_v44 = vsel %vm4008_vm2, %v4262_v18, 0.0 }
 0x1d6   : > { %v4297_v19 = vsel %vm4008_vm2, %v4261_v61, 0.0  ;;  %v4376_v10 = vmul.f32 %v4261_v61, %v4261_v61  ;;  %4012 = vst.msk [vmem:[%s7147_s20 + $0x18] sm:$0xff] %vm4008_vm2, %v3975_v59  ;;  %v4264_v55 = vmul.f32 %v7086_v56, %v3975_v59  ;;  %v3974_v4 = vadd.f32 %v3803_v27, %v3544_v13  ;;  %v7176_v59 = vpop.permute.xlu1 %4158 }
 0x1d7   : > { %v4299_v1 = vadd.f32 %v4298_v44, %v4297_v19  ;;  %v3547_v14 = vadd.f32 %v5662_v12, %v7025_v8  ;;  %v3383_v17 = vpop.f32.mrf.mxu1  ;;  %v3813_v58 = vpop.f32.mrf.mxu0  ;;  %v4413_v53 = vsel %vm4008_vm2, %v4377_v45, 0.0 }
 0x1d8   : > { %v4412_v28 = vsel %vm4008_vm2, %v4376_v10, 0.0  ;;  %v3546_v18 = vadd.f32 %v3383_v17, %v7028_v16  ;;  %4011 = vst.msk [vmem:[%s7147_s20 + $0x10] sm:$0xff] %vm4008_vm2, %v3974_v4  ;;  %v4263_v61 = vmul.f32 %v7073_v23, %v3974_v4  ;;  %v4379_v12 = vmul.f32 %v4264_v55, %v4264_v55  ;;  %v7183_v23 = vpop.permute.xlu0 %4153 }
 0x1d9   : > { %v4414_v29 = vadd.f32 %v4413_v53, %v4412_v28  ;;  %v3977_v44 = vadd.f32 %v5718_v35, %v3547_v14  ;;  %v5665_v56 = vpop.f32.mrf.mxu1  ;;  %v5721_v27 = vpop.f32.mrf.mxu0 }
 0x1da   : > { %v3976_v8 = vadd.f32 %v3813_v58, %v3546_v18  ;;  %v3549_v13 = vadd.f32 %v5665_v56, %v7031_v31  ;;  %v4300_v45 = vsel %vm4008_vm2, %v4263_v61, 0.0  ;;  %v4378_v19 = vmul.f32 %v4263_v61, %v4263_v61 }
 0x1db   : > { %4014 = vst.msk [vmem:[%s7147_s20 + $0x28] sm:$0xff] %vm4008_vm2, %v3977_v44  ;;  %v4266_v16 = vmul.f32 %v7099_v20, %v3977_v44  ;;  %v3393_v10 = vpop.f32.mrf.mxu1  ;;  %v3823_v17 = vpop.f32.mrf.mxu0  ;;  %v4301_v35 = vadd.f32 %v4300_v45, %v4299_v1  ;;  %v4302_v58 = vsel %vm4008_vm2, %v4264_v55, 0.0 }
 0x1dc   : > { %4013 = vst.msk [vmem:[%s7147_s20 + $0x20] sm:$0xff] %vm4008_vm2, %v3976_v8  ;;  %v4265_v4 = vmul.f32 %v7104_v5, %v3976_v8  ;;  %v3979_v14 = vadd.f32 %v5721_v27, %v3549_v13  ;;  %v3548_v31 = vadd.f32 %v3393_v10, %v7034_v40  ;;  %v4415_v53 = vsel %vm4008_vm2, %v4378_v19, 0.0  ;;  %v7197_v45 = vpop.permute.xlu1 %4168 }
 0x1dd   : > { %v4381_v28 = vmul.f32 %v4266_v16, %v4266_v16  ;;  %v5668_v18 = vpop.f32.mrf.mxu1  ;;  %v5724_v20 = vpop.f32.mrf.mxu0  ;;  %v4416_v61 = vadd.f32 %v4415_v53, %v4414_v29  ;;  %v4303_v44 = vadd.f32 %v4302_v58, %v4301_v35  ;;  %v4417_v5 = vsel %vm4008_vm2, %v4379_v12, 0.0 }
 0x1de   : > { %v4304_v56 = vsel %vm4008_vm2, %v4265_v4, 0.0  ;;  %v4380_v1 = vmul.f32 %v4265_v4, %v4265_v4  ;;  %4016 = vst.msk [vmem:[%s7147_s20 + $0x38] sm:$0xff] %vm4008_vm2, %v3979_v14  ;;  %v4268_v27 = vmul.f32 %v7112_v34, %v3979_v14  ;;  %v3978_v40 = vadd.f32 %v3823_v17, %v3548_v31  ;;  %v7206_v31 = vpop.permute.xlu0 %4163 }
 0x1df   : > { %v3551_v55 = vadd.f32 %v5668_v18, %v7037_v41  ;;  %v3403_v8 = vpop.f32.mrf.mxu1  ;;  %v3833_v13 = vpop.f32.mrf.mxu0  ;;  %v4305_v19 = vadd.f32 %v4304_v56, %v4303_v44  ;;  %v4418_v29 = vadd.f32 %v4417_v5, %v4416_v61  ;;  %v4306_v4 = vsel %vm4008_vm2, %v4266_v16, 0.0 }
 0x1e0   : > { %v4419_v10 = vsel %vm4008_vm2, %v4380_v1, 0.0  ;;  %v3550_v35 = vadd.f32 %v3403_v8, %v7040_v0  ;;  %v4421_v12 = vsel %vm4008_vm2, %v4381_v28, 0.0  ;;  %4015 = vst.msk [vmem:[%s7147_s20 + $0x30] sm:$0xff] %vm4008_vm2, %v3978_v40  ;;  %v4267_v34 = vmul.f32 %v7117_v21, %v3978_v40 }
 0x1e1   : > { %v3981_v41 = vadd.f32 %v5724_v20, %v3551_v55  ;;  %v5671_v17 = vpop.f32.mrf.mxu1  ;;  %v5727_v14 = vpop.f32.mrf.mxu0  ;;  %v4420_v58 = vadd.f32 %v4419_v10, %v4418_v29  ;;  %v4307_v53 = vadd.f32 %v4306_v4, %v4305_v19  ;;  %v4383_v61 = vmul.f32 %v4268_v27, %v4268_v27 }
 0x1e2   : > { %v3980_v18 = vadd.f32 %v3833_v13, %v3550_v35  ;;  %v3553_v0 = vadd.f32 %v5671_v17, %v7043_v51  ;;  %v4308_v16 = vsel %vm4008_vm2, %v4267_v34, 0.0  ;;  %v4382_v44 = vmul.f32 %v4267_v34, %v4267_v34 }
 0x1e3   : > { %4018 = vst.msk [vmem:[%s7147_s20 + $0x48] sm:$0xff] %vm4008_vm2, %v3981_v41  ;;  %v4270_v28 = vmul.f32 %v7125_v52, %v3981_v41  ;;  %v3413_v21 = vpop.f32.mrf.mxu1  ;;  %v3843_v20 = vpop.f32.mrf.mxu0  ;;  %v4309_v56 = vadd.f32 %v4308_v16, %v4307_v53  ;;  %v4422_v1 = vadd.f32 %v4421_v12, %v4420_v58  ;;  %v4310_v51 = vsel %vm4008_vm2, %v4268_v27, 0.0 }
 0x1e4   : > { %4017 = vst.msk [vmem:[%s7147_s20 + $0x40] sm:$0xff] %vm4008_vm2, %v3980_v18  ;;  %v4269_v5 = vmul.f32 %v7130_v9, %v3980_v18  ;;  %v3983_v40 = vadd.f32 %v5727_v14, %v3553_v0  ;;  %v4423_v55 = vsel %vm4008_vm2, %v4382_v44, 0.0  ;;  %v3552_v13 = vadd.f32 %v3413_v21, %v7046_v32  ;;  %v7219_v52 = vpop.permute.xlu1 %4178  ;;  %v7227_v14 = vpop.permute.xlu0 %4173 }
 0x1e5   : > { %v4385_v8 = vmul.f32 %v4270_v28, %v4270_v28  ;;  %v5674_v19 = vpop.f32.mrf.mxu1  ;;  %v5730_v29 = vpop.f32.mrf.mxu0  ;;  %v4424_v10 = vadd.f32 %v4423_v55, %v4422_v1  ;;  %v4311_v35 = vadd.f32 %v4310_v51, %v4309_v56  ;;  %v4425_v9 = vsel %vm4008_vm2, %v4383_v61, 0.0 }
 0x1e6   : > { %v4312_v4 = vsel %vm4008_vm2, %v4269_v5, 0.0  ;;  %v4384_v12 = vmul.f32 %v4269_v5, %v4269_v5  ;;  %4020 = vst.msk [vmem:[%s7147_s20 + $0x58] sm:$0xff] %vm4008_vm2, %v3983_v40  ;;  %v4272_v27 = vmul.f32 %v7139_v22, %v3983_v40  ;;  %v3982_v34 = vadd.f32 %v3843_v20, %v3552_v13 }
 0x1e7   : > { %v3555_v41 = vadd.f32 %v5674_v19, %v7049_v63  ;;  %v3423_v32 = vpop.f32.mrf.mxu1  ;;  %v3853_v17 = vpop.f32.mrf.mxu0  ;;  %v4313_v58 = vadd.f32 %v4312_v4, %v4311_v35  ;;  %v4426_v53 = vadd.f32 %v4425_v9, %v4424_v10  ;;  %v4314_v16 = vsel %vm4008_vm2, %v4270_v28, 0.0 }
 0x1e8   : > { %v4427_v18 = vsel %vm4008_vm2, %v4384_v12, 0.0  ;;  %v3554_v0 = vadd.f32 %v3423_v32, %v7052_v49  ;;  %v4429_v61 = vsel %vm4008_vm2, %v4385_v8, 0.0  ;;  %4019 = vst.msk [vmem:[%s7147_s20 + $0x50] sm:$0xff] %vm4008_vm2, %v3982_v34  ;;  %v4271_v22 = vmul.f32 %v7149_v42, %v3982_v34  ;;  %v7241_v42 = vpop.permute.xlu1 %4188  ;;  %v7249_v34 = vpop.permute.xlu0 %4183 }
 0x1e9   : > { %v3985_v63 = vadd.f32 %v5730_v29, %v3555_v41  ;;  %v5677_v44 = vpop.f32.mrf.mxu1  ;;  %v5733_v21 = vpop.f32.mrf.mxu0  ;;  %v4428_v20 = vadd.f32 %v4427_v18, %v4426_v53  ;;  %v4315_v56 = vadd.f32 %v4314_v16, %v4313_v58  ;;  %v4387_v40 = vmul.f32 %v4272_v27, %v4272_v27 }
 0x1ea   : > { %v3984_v1 = vadd.f32 %v3853_v17, %v3554_v0  ;;  %v3557_v5 = vadd.f32 %v5677_v44, %v7055_v54  ;;  %v4316_v49 = vsel %vm4008_vm2, %v4271_v22, 0.0  ;;  %v4386_v51 = vmul.f32 %v4271_v22, %v4271_v22 }
 0x1eb   : > { %4022 = vst.msk [vmem:[%s7147_s20 + $0x68] sm:$0xff] %vm4008_vm2, %v3985_v63  ;;  %v4274_v28 = vmul.f32 %v7156_v24, %v3985_v63  ;;  %v3433_v55 = vpop.f32.mrf.mxu1  ;;  %v3863_v8 = vpop.f32.mrf.mxu0  ;;  %v4317_v13 = vadd.f32 %v4316_v49, %v4315_v56  ;;  %v4430_v19 = vadd.f32 %v4429_v61, %v4428_v20  ;;  %v4318_v10 = vsel %vm4008_vm2, %v4272_v27, 0.0 }
 0x1ec   : > { %4021 = vst.msk [vmem:[%s7147_s20 + $0x60] sm:$0xff] %vm4008_vm2, %v3984_v1  ;;  %v4273_v29 = vmul.f32 %v7162_v60, %v3984_v1  ;;  %v3987_v54 = vadd.f32 %v5733_v21, %v3557_v5  ;;  %v4431_v35 = vsel %vm4008_vm2, %v4386_v51, 0.0  ;;  %v3556_v12 = vadd.f32 %v3433_v55, %v7058_v26  ;;  %v7264_v1 = vpop.permute.xlu1 %4198 }
 0x1ed   : > { %v4389_v4 = vmul.f32 %v4274_v28, %v4274_v28  ;;  %v5680_v24 = vpop.f32.mrf.mxu1  ;;  %v5736_v9 = vpop.f32.mrf.mxu0  ;;  %v4432_v41 = vadd.f32 %v4431_v35, %v4430_v19  ;;  %v4319_v32 = vadd.f32 %v4318_v10, %v4317_v13  ;;  %v4433_v60 = vsel %vm4008_vm2, %v4387_v40, 0.0 }
 0x1ee   : > { %v4320_v17 = vsel %vm4008_vm2, %v4273_v29, 0.0  ;;  %v4388_v58 = vmul.f32 %v4273_v29, %v4273_v29  ;;  %4024 = vst.msk [vmem:[%s7147_s20 + $0x78] sm:$0xff] %vm4008_vm2, %v3987_v54  ;;  %v4276_v27 = vmul.f32 %v7176_v59, %v3987_v54  ;;  %v3986_v53 = vadd.f32 %v3863_v8, %v3556_v12  ;;  %v7271_v19 = vpop.permute.xlu0 %4193 }
 0x1ef   : > { %v3559_v18 = vadd.f32 %v5680_v24, %v7061_v7  ;;  %v3443_v26 = vpop.f32.mrf.mxu1  ;;  %v3873_v0 = vpop.f32.mrf.mxu0  ;;  %v4321_v16 = vadd.f32 %v4320_v17, %v4319_v32  ;;  %v4434_v61 = vadd.f32 %v4433_v60, %v4432_v41  ;;  %v4322_v44 = vsel %vm4008_vm2, %v4274_v28, 0.0 }
 0x1f0   : > { %v4435_v22 = vsel %vm4008_vm2, %v4388_v58, 0.0  ;;  %v3558_v63 = vadd.f32 %v3443_v26, %v7064_v25  ;;  %v4437_v21 = vsel %vm4008_vm2, %v4389_v4, 0.0  ;;  %4023 = vst.msk [vmem:[%s7147_s20 + $0x70] sm:$0xff] %vm4008_vm2, %v3986_v53  ;;  %v4275_v59 = vmul.f32 %v7183_v23, %v3986_v53 }
 0x1f1   : > { %v3989_v20 = vadd.f32 %v5736_v9, %v3559_v18  ;;  %v5683_v56 = vpop.f32.mrf.mxu1  ;;  %v5739_v7 = vpop.f32.mrf.mxu0  ;;  %v4436_v5 = vadd.f32 %v4435_v22, %v4434_v61  ;;  %v4323_v40 = vadd.f32 %v4322_v44, %v4321_v16  ;;  %v4391_v51 = vmul.f32 %v4276_v27, %v4276_v27 }
 0x1f2   : > { %v3988_v49 = vadd.f32 %v3873_v0, %v3558_v63  ;;  %v3561_v25 = vadd.f32 %v5683_v56, %v7067_v15  ;;  %v4324_v28 = vsel %vm4008_vm2, %v4275_v59, 0.0  ;;  %v4390_v55 = vmul.f32 %v4275_v59, %v4275_v59 }
 0x1f3   : > { %4026 = vst.msk [vmem:[%s7147_s20 + $0x88] sm:$0xff] %vm4008_vm2, %v3989_v20  ;;  %v4278_v8 = vmul.f32 %v7197_v45, %v3989_v20  ;;  %v3453_v23 = vpop.f32.mrf.mxu1  ;;  %v3883_v13 = vpop.f32.mrf.mxu0  ;;  %v4325_v29 = vadd.f32 %v4324_v28, %v4323_v40  ;;  %v4438_v54 = vadd.f32 %v4437_v21, %v4436_v5  ;;  %v4326_v35 = vsel %vm4008_vm2, %v4276_v27, 0.0 }
 0x1f4   : > { %4025 = vst.msk [vmem:[%s7147_s20 + $0x80] sm:$0xff] %vm4008_vm2, %v3988_v49  ;;  %v4277_v10 = vmul.f32 %v7206_v31, %v3988_v49  ;;  %v3991_v15 = vadd.f32 %v5739_v7, %v3561_v25  ;;  %v4439_v4 = vsel %vm4008_vm2, %v4390_v55, 0.0  ;;  %v3560_v24 = vadd.f32 %v3453_v23, %v7070_v3  ;;  %v7285_v3 = vpop.permute.xlu1 %4208  ;;  %v4204_v20 = vpop.permute.xlu0 %4203 }
 0x1f5   : > { %v4393_v12 = vmul.f32 %v4278_v8, %v4278_v8  ;;  %v5686_v45 = vpop.f32.mrf.mxu1  ;;  %v5742_v9 = vpop.f32.mrf.mxu0  ;;  %v4440_v41 = vadd.f32 %v4439_v4, %v4438_v54  ;;  %v4327_v32 = vadd.f32 %v4326_v35, %v4325_v29  ;;  %v4441_v31 = vsel %vm4008_vm2, %v4391_v51, 0.0 }
 0x1f6   : > { %v4328_v17 = vsel %vm4008_vm2, %v4277_v10, 0.0  ;;  %v4392_v58 = vmul.f32 %v4277_v10, %v4277_v10  ;;  %4028 = vst.msk [vmem:[%s7147_s20 + $0x98] sm:$0xff] %vm4008_vm2, %v3991_v15  ;;  %v4280_v60 = vmul.f32 %v7219_v52, %v3991_v15  ;;  %v3990_v27 = vadd.f32 %v3883_v13, %v3560_v24 }
 0x1f7   : > { %v3563_v53 = vadd.f32 %v5686_v45, %v7075_v48  ;;  %v3463_v18 = vpop.f32.mrf.mxu1  ;;  %v3893_v26 = vpop.f32.mrf.mxu0  ;;  %v4329_v0 = vadd.f32 %v4328_v17, %v4327_v32  ;;  %v4442_v16 = vadd.f32 %v4441_v31, %v4440_v41  ;;  %v4330_v63 = vsel %vm4008_vm2, %v4278_v8, 0.0 }
 0x1f8   : > { %v4443_v61 = vsel %vm4008_vm2, %v4392_v58, 0.0  ;;  %v3562_v22 = vadd.f32 %v3463_v18, %v7080_v50  ;;  %v4445_v44 = vsel %vm4008_vm2, %v4393_v12, 0.0  ;;  %4027 = vst.msk [vmem:[%s7147_s20 + $0x90] sm:$0xff] %vm4008_vm2, %v3990_v27  ;;  %v4279_v52 = vmul.f32 %v7227_v14, %v3990_v27  ;;  %v4214_v58 = vpop.permute.xlu0 %4213 }
 0x1f9   : > { %v3993_v48 = vadd.f32 %v5742_v9, %v3563_v53  ;;  %v5689_v21 = vpop.f32.mrf.mxu1  ;;  %v5745_v59 = vpop.f32.mrf.mxu0  ;;  %v4444_v56 = vadd.f32 %v4443_v61, %v4442_v16  ;;  %v4331_v7 = vadd.f32 %v4330_v63, %v4329_v0  ;;  %v4395_v50 = vmul.f32 %v4280_v60, %v4280_v60 }
 0x1fa   : > { %v3992_v5 = vadd.f32 %v3893_v26, %v3562_v22  ;;  %v3565_v40 = vadd.f32 %v5689_v21, %v7083_v2  ;;  %v4332_v49 = vsel %vm4008_vm2, %v4279_v52, 0.0  ;;  %v4394_v25 = vmul.f32 %v4279_v52, %v4279_v52 }
 0x1fb   : > { %4030 = vst.msk [vmem:[%s7147_s20 + $0xa8] sm:$0xff] %vm4008_vm2, %v3993_v48  ;;  %v4282_v51 = vmul.f32 %v7241_v42, %v3993_v48  ;;  %v3473_v28 = vpop.f32.mrf.mxu1  ;;  %v3903_v14 = vpop.f32.mrf.mxu0  ;;  %v4333_v55 = vadd.f32 %v4332_v49, %v4331_v7  ;;  %v4446_v8 = vadd.f32 %v4445_v44, %v4444_v56  ;;  %v4334_v2 = vsel %vm4008_vm2, %v4280_v60, 0.0 }
 0x1fc   : > { %4029 = vst.msk [vmem:[%s7147_s20 + $0xa0] sm:$0xff] %vm4008_vm2, %v3992_v5  ;;  %v4281_v23 = vmul.f32 %v7249_v34, %v3992_v5  ;;  %v3995_v13 = vadd.f32 %v5745_v59, %v3565_v40  ;;  %v4447_v29 = vsel %vm4008_vm2, %v4394_v25, 0.0  ;;  %v3564_v10 = vadd.f32 %v3473_v28, %v7088_v36  ;;  %v4219_v42 = vpop.permute.xlu1 %4218 }
 0x1fd   : > { %v4397_v54 = vmul.f32 %v4282_v51, %v4282_v51  ;;  %v5692_v15 = vpop.f32.mrf.mxu1  ;;  %v5748_v35 = vpop.f32.mrf.mxu0  ;;  %v4448_v4 = vadd.f32 %v4447_v29, %v4446_v8  ;;  %v4335_v12 = vadd.f32 %v4334_v2, %v4333_v55  ;;  %v4449_v34 = vsel %vm4008_vm2, %v4395_v50, 0.0 }
 0x1fe   : > { %v4336_v24 = vsel %vm4008_vm2, %v4281_v23, 0.0  ;;  %v4396_v45 = vmul.f32 %v4281_v23, %v4281_v23  ;;  %4032 = vst.msk [vmem:[%s7147_s20 + $0xb8] sm:$0xff] %vm4008_vm2, %v3995_v13  ;;  %v4284_v9 = vmul.f32 %v7264_v1, %v3995_v13  ;;  %v3994_v41 = vadd.f32 %v3903_v14, %v3564_v10 }
 0x1ff   : > { %v3567_v32 = vadd.f32 %v5692_v15, %v7093_v38  ;;  %v3483_v17 = vpop.f32.mrf.mxu1  ;;  %v3913_v36 = vpop.f32.mrf.mxu0  ;;  %v4337_v31 = vadd.f32 %v4336_v24, %v4335_v12  ;;  %v4450_v60 = vadd.f32 %v4449_v34, %v4448_v4  ;;  %v4338_v18 = vsel %vm4008_vm2, %v4282_v51, 0.0 }
 0x200   : > { %v4451_v27 = vsel %vm4008_vm2, %v4396_v45, 0.0  ;;  %v3566_v53 = vadd.f32 %v3483_v17, %v7096_v47  ;;  %v4453_v26 = vsel %vm4008_vm2, %v4397_v54, 0.0  ;;  %4031 = vst.msk [vmem:[%s7147_s20 + $0xb0] sm:$0xff] %vm4008_vm2, %v3994_v41  ;;  %v4283_v1 = vmul.f32 %v7271_v19, %v3994_v41  ;;  %v4229_v19 = vpop.permute.xlu1 %4228 }
 0x201   : > { %v3997_v0 = vadd.f32 %v5748_v35, %v3567_v32  ;;  %v5695_v38 = vpop.f32.mrf.mxu1  ;;  %v5751_v16 = vpop.f32.mrf.mxu0  ;;  %v4452_v61 = vadd.f32 %v4451_v27, %v4450_v60  ;;  %v4339_v22 = vadd.f32 %v4338_v18, %v4337_v31  ;;  %v4399_v52 = vmul.f32 %v4284_v9, %v4284_v9 }
 0x202   : > { %v3996_v63 = vadd.f32 %v3913_v36, %v3566_v53  ;;  %v3569_v44 = vadd.f32 %v5695_v38, %v7101_v39  ;;  %v4340_v47 = vsel %vm4008_vm2, %v4283_v1, 0.0  ;;  %v4398_v48 = vmul.f32 %v4283_v1, %v4283_v1 }
 0x203   : > { %4034 = vst.msk [vmem:[%s7147_s20 + $0xc8] sm:$0xff] %vm4008_vm2, %v3997_v0  ;;  %v4286_v21 = vmul.f32 %v7285_v3, %v3997_v0  ;;  %v3493_v59 = vpop.f32.mrf.mxu1  ;;  %v3923_v56 = vpop.f32.mrf.mxu0  ;;  %v4341_v7 = vadd.f32 %v4340_v47, %v4339_v22  ;;  %v4454_v5 = vadd.f32 %v4453_v26, %v4452_v61  ;;  %v4342_v39 = vsel %vm4008_vm2, %v4284_v9, 0.0 }
 0x204   : > { %4033 = vst.msk [vmem:[%s7147_s20 + $0xc0] sm:$0xff] %vm4008_vm2, %v3996_v63  ;;  %v4285_v40 = vmul.f32 %v4204_v20, %v3996_v63  ;;  %v3999_v50 = vadd.f32 %v5751_v16, %v3569_v44  ;;  %v4455_v49 = vsel %vm4008_vm2, %v4398_v48, 0.0  ;;  %v3568_v51 = vadd.f32 %v3493_v59, %v7106_v43  ;;  %v4224_v3 = vpop.permute.xlu0 %4223 }
 0x205   : > { %v4401_v25 = vmul.f32 %v4286_v21, %v4286_v21  ;;  %v5698_v28 = vpop.f32.mrf.mxu1  ;;  %v5754_v14 = vpop.f32.mrf.mxu0  ;;  %v4456_v55 = vadd.f32 %v4455_v49, %v4454_v5  ;;  %v4343_v8 = vadd.f32 %v4342_v39, %v4341_v7  ;;  %v4457_v20 = vsel %vm4008_vm2, %v4399_v52, 0.0 }
 0x206   : > { %v4344_v23 = vsel %vm4008_vm2, %v4285_v40, 0.0  ;;  %v4400_v13 = vmul.f32 %v4285_v40, %v4285_v40  ;;  %4036 = vst.msk [vmem:[%s7147_s20 + $0xd8] sm:$0xff] %vm4008_vm2, %v3999_v50  ;;  %v4288_v2 = vmul.f32 %v4219_v42, %v3999_v50  ;;  %v3998_v29 = vadd.f32 %v3923_v56, %v3568_v51 }
 0x207   : > { %v3571_v54 = vadd.f32 %v5698_v28, %v7109_v30  ;;  %v3503_v10 = vpop.f32.mrf.mxu1  ;;  %v3933_v15 = vpop.f32.mrf.mxu0  ;;  %v4345_v43 = vadd.f32 %v4344_v23, %v4343_v8  ;;  %v4458_v35 = vadd.f32 %v4457_v20, %v4456_v55  ;;  %v4346_v24 = vsel %vm4008_vm2, %v4286_v21, 0.0 }
 0x208   : > { %v4459_v4 = vsel %vm4008_vm2, %v4400_v13, 0.0  ;;  %v3570_v12 = vadd.f32 %v3503_v10, %v7114_v46  ;;  %v4461_v45 = vsel %vm4008_vm2, %v4401_v25, 0.0  ;;  %4035 = vst.msk [vmem:[%s7147_s20 + $0xd0] sm:$0xff] %vm4008_vm2, %v3998_v29  ;;  %v4287_v34 = vmul.f32 %v4214_v58, %v3998_v29  ;;  %v4239_v30 = vpop.permute.xlu1 %4238  ;;  %v4234_v58 = vpop.permute.xlu0 %4233 }
 0x209   : > { %v4001_v42 = vadd.f32 %v5754_v14, %v3571_v54  ;;  %v5701_v9 = vpop.f32.mrf.mxu1  ;;  %v5757_v41 = vpop.f32.mrf.mxu0  ;;  %v4460_v32 = vadd.f32 %v4459_v4, %v4458_v35  ;;  %v4347_v17 = vadd.f32 %v4346_v24, %v4345_v43  ;;  %v4403_v60 = vmul.f32 %v4288_v2, %v4288_v2 }
 0x20a   : > { %v4000_v36 = vadd.f32 %v3933_v15, %v3570_v12  ;;  %v3573_v31 = vadd.f32 %v5701_v9, %v7119_v33  ;;  %v4348_v46 = vsel %vm4008_vm2, %v4287_v34, 0.0  ;;  %v4402_v27 = vmul.f32 %v4287_v34, %v4287_v34 }
 0x20b   : > { %4038 = vst.msk [vmem:[%s7147_s20 + $0xe8] sm:$0xff] %vm4008_vm2, %v4001_v42  ;;  %v4290_v53 = vmul.f32 %v4229_v19, %v4001_v42  ;;  %v3513_v18 = vpop.f32.mrf.mxu1  ;;  %v3943_v26 = vpop.f32.mrf.mxu0  ;;  %v4349_v1 = vadd.f32 %v4348_v46, %v4347_v17  ;;  %v4462_v0 = vadd.f32 %v4461_v45, %v4460_v32  ;;  %v4350_v61 = vsel %vm4008_vm2, %v4288_v2, 0.0 }
 0x20c   : > { %4037 = vst.msk [vmem:[%s7147_s20 + $0xe0] sm:$0xff] %vm4008_vm2, %v4000_v36  ;;  %v4289_v38 = vmul.f32 %v4224_v3, %v4000_v36  ;;  %v4003_v16 = vadd.f32 %v5757_v41, %v3573_v31  ;;  %v4463_v33 = vsel %vm4008_vm2, %v4402_v27, 0.0  ;;  %v3572_v63 = vadd.f32 %v3513_v18, %v7122_v11  ;;  %v4249_v39 = vpop.permute.xlu1 %4248  ;;  %v4244_v8 = vpop.permute.xlu0 %4243 }
 0x20d   : > { %v4405_v22 = vmul.f32 %v4290_v53, %v4290_v53  ;;  %v5704_v44 = vpop.f32.mrf.mxu1  ;;  %v5760_v52 = vpop.f32.mrf.mxu0  ;;  %v4464_v47 = vadd.f32 %v4463_v33, %v4462_v0  ;;  %v4351_v48 = vadd.f32 %v4350_v61, %v4349_v1  ;;  %v4465_v56 = vsel %vm4008_vm2, %v4403_v60, 0.0 }
 0x20e   : > { %v4352_v21 = vsel %vm4008_vm2, %v4289_v38, 0.0  ;;  %v4404_v59 = vmul.f32 %v4289_v38, %v4289_v38  ;;  %4040 = vst.msk [vmem:[%s7147_s20 + $0xf8] sm:$0xff] %vm4008_vm2, %v4003_v16  ;;  %v4292_v19 = vmul.f32 %v4239_v30, %v4003_v16  ;;  %v4002_v7 = vadd.f32 %v3943_v26, %v3572_v63 }
 0x20f   : > { %v3575_v5 = vadd.f32 %v5704_v44, %v7127_v37  ;;  %v3523_v40 = vpop.f32.mrf.mxu1  ;;  %v3953_v50 = vpop.f32.mrf.mxu0  ;;  %v4353_v11 = vadd.f32 %v4352_v21, %v4351_v48  ;;  %v4466_v49 = vadd.f32 %v4465_v56, %v4464_v47  ;;  %v4354_v28 = vsel %vm4008_vm2, %v4290_v53, 0.0 }
 0x210   : > { %v4467_v25 = vsel %vm4008_vm2, %v4404_v59, 0.0  ;;  %v3574_v51 = vadd.f32 %v3523_v40, %v7132_v57  ;;  %v4469_v14 = vsel %vm4008_vm2, %v4405_v22, 0.0  ;;  %4039 = vst.msk [vmem:[%s7147_s20 + $0xf0] sm:$0xff] %vm4008_vm2, %v4002_v7  ;;  %v4291_v3 = vmul.f32 %v4234_v58, %v4002_v7  ;;  %v4259_v42 = vpop.permute.xlu1 %4258  ;;  %v4254_v27 = vpop.permute.xlu0 %4253 }
 0x211   : > { %v4005_v55 = vadd.f32 %v5760_v52, %v3575_v5  ;;  %v5707_v37 = vpop.f32.mrf.mxu1  ;;  %v4468_v23 = vadd.f32 %v4467_v25, %v4466_v49  ;;  %v4355_v13 = vadd.f32 %v4354_v28, %v4353_v11  ;;  %v5763_v29 = vpop.f32.mrf.mxu0  ;;  %v4407_v54 = vmul.f32 %v4292_v19, %v4292_v19 }
 0x212   : > { %v4004_v20 = vadd.f32 %v3953_v50, %v3574_v51  ;;  %v3577_v2 = vadd.f32 %v5707_v37, %v7136_v6  ;;  %v4356_v57 = vsel %vm4008_vm2, %v4291_v3, 0.0  ;;  %v4406_v10 = vmul.f32 %v4291_v3, %v4291_v3 }
 0x213   : > { %4042 = vst.msk [vmem:[%s7147_s20 + $0x108] sm:$0xff] %vm4008_vm2, %v4005_v55  ;;  %v4294_v15 = vmul.f32 %v4249_v39, %v4005_v55  ;;  %v3533_v43 = vpop.f32.mrf.mxu1  ;;  %v4357_v35 = vadd.f32 %v4356_v57, %v4355_v13  ;;  %v4470_v4 = vadd.f32 %v4469_v14, %v4468_v23  ;;  %v4358_v45 = vsel %vm4008_vm2, %v4292_v19, 0.0  ;;  %v3963_v17 = vpop.f32.mrf.mxu0 }
 0x214   : > { %4041 = vst.msk [vmem:[%s7147_s20 + $0x100] sm:$0xff] %vm4008_vm2, %v4004_v20  ;;  %v4293_v12 = vmul.f32 %v4244_v8, %v4004_v20  ;;  %v4007_v24 = vadd.f32 %v5763_v29, %v3577_v2  ;;  %v4471_v6 = vsel %vm4008_vm2, %v4406_v10, 0.0  ;;  %v3576_v34 = vadd.f32 %v3533_v43, %v7141_v62 }
 0x215   : > { %v4472_v9 = vadd.f32 %v4471_v6, %v4470_v4  ;;  %v4359_v41 = vadd.f32 %v4358_v45, %v4357_v35  ;;  %v4473_v36 = vsel %vm4008_vm2, %v4407_v54, 0.0  ;;  %v4409_v31 = vmul.f32 %v4294_v15, %v4294_v15 }
 0x216   : > { %v4360_v30 = vsel %vm4008_vm2, %v4293_v12, 0.0  ;;  %v4408_v32 = vmul.f32 %v4293_v12, %v4293_v12  ;;  %4044 = vst.msk [vmem:[%s7147_s20 + $0x118] sm:$0xff] %vm4008_vm2, %v4007_v24  ;;  %v4296_v60 = vmul.f32 %v4259_v42, %v4007_v24  ;;  %v4006_v46 = vadd.f32 %v3963_v17, %v3576_v34 }
 0x217   : > { %v4361_v53 = vadd.f32 %v4360_v30, %v4359_v41  ;;  %v4474_v18 = vadd.f32 %v4473_v36, %v4472_v9  ;;  %v4362_v26 = vsel %vm4008_vm2, %v4294_v15, 0.0  ;;  %v4477_v38 = vsel %vm4008_vm2, %v4409_v31, 0.0 }
 0x218   : > { %v4475_v62 = vsel %vm4008_vm2, %v4408_v32, 0.0  ;;  %4043 = vst.msk [vmem:[%s7147_s20 + $0x110] sm:$0xff] %vm4008_vm2, %v4006_v46  ;;  %v4295_v58 = vmul.f32 %v4254_v27, %v4006_v46  ;;  %v4411_v16 = vmul.f32 %v4296_v60, %v4296_v60  ;;  %v4366_v44 = vsel %vm4008_vm2, %v4296_v60, 0.0 }
 0x219   : > { %v4476_v1 = vadd.f32 %v4475_v62, %v4474_v18  ;;  %v4363_v0 = vadd.f32 %v4362_v26, %v4361_v53 }
 0x21a   : > { %v4364_v61 = vsel %vm4008_vm2, %v4295_v58, 0.0  ;;  %v4410_v33 = vmul.f32 %v4295_v58, %v4295_v58  ;;  %v4481_v21 = vsel %vm4008_vm2, %v4411_v16, 0.0 }
 0x21b   : > { %v4365_v22 = vadd.f32 %v4364_v61, %v4363_v0  ;;  %v4478_v63 = vadd.f32 %v4477_v38, %v4476_v1 }
 0x21c   : > { %v4479_v52 = vsel %vm4008_vm2, %v4410_v33, 0.0 }
 0x21d   : > { %v4367_v47 = vadd.f32 %v4366_v44, %v4365_v22  ;;  %v4480_v48 = vadd.f32 %v4479_v52, %v4478_v63 }
 0x21f   : > { %v4368_v59 = vrot.slane %v4367_v47, 4  ;;  %v4482_v56 = vadd.f32 %v4481_v21, %v4480_v48 }
 0x221   : > { %v4369_v19 = vadd.f32 %v4368_v59, %v4367_v47  ;;  %v4483_v7 = vrot.slane %v4482_v56, 4 }
 0x223   : > { %v4370_v5 = vrot.slane %v4369_v19, 2  ;;  %v4484_v40 = vadd.f32 %v4483_v7, %v4482_v56 }
 0x225   : > { %v4371_v50 = vadd.f32 %v4370_v5, %v4369_v19  ;;  %v4485_v39 = vrot.slane %v4484_v40, 2 }
 0x227   : > { %v4372_v11 = vrot.slane %v4371_v50, 1  ;;  %v4486_v49 = vadd.f32 %v4485_v39, %v4484_v40 }
 0x229   : > { %v4373_v25 = vadd.f32 %v4372_v11, %v4371_v50  ;;  %v4487_v51 = vrot.slane %v4486_v49, 1 }
 0x22b   : > { %4375 = vst.msk [vmem:[%s208_s24] sm:$0x1] %vm4374_vm3, %v4373_v25  ;;  %v4488_v28 = vadd.f32 %v4487_v51, %v4486_v49 }
 0x22d   : > { %4489 = vst.msk [vmem:[%s208_s24 + $0x1] sm:$0x1] %vm4374_vm3, %v4488_v28 }
 0x22e PF: > { %s15_s15 = sadd.s32 1, %s5785_s15  }
 0x22f   : > { %p12_p4 = scmp.ge.s32.totalorder %s15_s15, 4  }
 0x231   :  { %14 = sbr.rel (!%p12_p4) target bundleno = 1 (0x1), region = 82 }

</bundles_post_ra>
